<compile_context>
chip_gen: v7x
topology: tpu7x:2x2x1
jax: 0.10.0
libtpu: 0.0.40
codegen_flags: <defaults>
</compile_context>

<pallas_src>
import functools

import jax
import jax.numpy as jnp
from jax.experimental import pallas as pl
from jax.experimental.pallas import tpu as pltpu

VMEM = pltpu.MemorySpace.VMEM

HEAD_DOUTS = (1, 2, 5)   # age, gender, ethnicity output widths (static)


# ----------------------------- Pallas kernels -----------------------------

def conv_pool_kernel(p_ref, w_ref, b_ref, o_ref, mx_ref, sm_ref, *, inv_hw):
    """Fused conv-as-matmul + ReLU + AdaptiveConcatPool.

    Grid = (batch, spatial_tiles); spatial axis is the reduction axis (last).
      p_ref: (TM, Kp)  bf16 im2col patches tile
      w_ref: (Kp, C)   bf16 conv weights
      b_ref: (1, C)    f32 bias
      o_ref: (1, 2*C)  f32 pooled output for this batch element (resident)
      mx_ref/sm_ref: (1, C) f32 VMEM max / sum accumulators
    """
    t = pl.program_id(1)
    cout = w_ref.shape[1]

    @pl.when(t == 0)
    def _init():
        mx_ref[...] = jnp.full_like(mx_ref, -jnp.inf)
        sm_ref[...] = jnp.zeros_like(sm_ref)

    acc = jnp.dot(p_ref[...], w_ref[...], preferred_element_type=jnp.float32)
    feat = jnp.maximum(acc + b_ref[...], 0.0)                 # (TM, C) f32

    mx_ref[...] = jnp.maximum(mx_ref[...], jnp.max(feat, axis=0, keepdims=True))
    sm_ref[...] = sm_ref[...] + jnp.sum(feat, axis=0, keepdims=True)

    @pl.when(t == pl.num_programs(1) - 1)
    def _finalize():
        # write max / mean straight into their destination lanes (no concat)
        o_ref[:, :cout] = mx_ref[...]
        o_ref[:, cout:] = sm_ref[...] * inv_hw


def heads_kernel(x_ref, w1_ref, b1_ref, s2_ref, t2_ref, w2_ref, b2_ref, o_ref):
    """Three fastai heads fused into one call.

    BN1 is pre-folded into w1/b1. w1 is the column-concat of the three heads'
    first linears; w2 is block-diagonal; output is (N, 8) = [age|gender|eth].
    Matmul operands are bf16, accumulation + BN/ReLU/sigmoid in f32.
    """
    x = x_ref[...].astype(jnp.bfloat16)
    h = jnp.dot(x, w1_ref[...], preferred_element_type=jnp.float32) + b1_ref[...]
    h = jnp.maximum(h, 0.0)
    h = h * s2_ref[...] + t2_ref[...]
    out = jnp.dot(h.astype(jnp.bfloat16), w2_ref[...],
                  preferred_element_type=jnp.float32) + b2_ref[...]
    # sigmoid only on the age column (col 0), computed in f32
    col = jax.lax.broadcasted_iota(jnp.int32, out.shape, 1)
    o_ref[...] = jnp.where(col == 0, jax.nn.sigmoid(out), out)


# ----------------------------- wrappers -----------------------------------

def _pick_spatial_tile(hw, cap=512):
    for t in (512, 256, 128, 64, 32, 16, 8):
        if t <= cap and hw % t == 0:
            return t
    return hw


def encoder_concat_pool(x_nchw, wmat, bias):
    """3x3 conv (as matmul) + ReLU + concat(max,mean) pool, fused in Pallas.

    x_nchw: (N, Cin, H, W) f32; wmat: (Kp, Cout) bf16; bias: (1, Cout) f32
    -> (N, 2*Cout) f32
    """
    N, Cin, H, W = x_nchw.shape
    Kp, Cout = wmat.shape
    HW = H * W
    K = 9 * Cin

    # one small NHWC transpose, then layout-preserving 9-tap gather on last axis
    xh = jnp.transpose(x_nchw, (0, 2, 3, 1))                    # (N, H, W, Cin)
    xp = jnp.pad(xh, ((0, 0), (1, 1), (1, 1), (0, 0)))
    taps = [xp[:, kh:kh + H, kw:kw + W, :] for kh in range(3) for kw in range(3)]
    patches = jnp.concatenate(taps, axis=-1).reshape(N, HW, K)  # (N, HW, 9*Cin)
    if Kp != K:
        patches = jnp.pad(patches, ((0, 0), (0, 0), (0, Kp - K)))
    patches = patches.astype(jnp.bfloat16)

    TM = _pick_spatial_tile(HW)
    num_tiles = HW // TM
    kern = functools.partial(conv_pool_kernel, inv_hw=1.0 / HW)

    pooled = pl.pallas_call(
        kern,
        out_shape=jax.ShapeDtypeStruct((N, 1, 2 * Cout), jnp.float32),
        grid_spec=pltpu.PrefetchScalarGridSpec(
            num_scalar_prefetch=0,
            grid=(N, num_tiles),
            in_specs=[
                pl.BlockSpec((None, TM, Kp), lambda n, t: (n, t, 0)),
                pl.BlockSpec((Kp, Cout), lambda n, t: (0, 0)),
                pl.BlockSpec((1, Cout), lambda n, t: (0, 0)),
            ],
            out_specs=pl.BlockSpec((None, 1, 2 * Cout), lambda n, t: (n, 0, 0)),
            scratch_shapes=[
                pltpu.VMEM((1, Cout), jnp.float32),   # running max
                pltpu.VMEM((1, Cout), jnp.float32),   # running sum
            ],
        ),
        compiler_params=pltpu.CompilerParams(
            dimension_semantics=("parallel", "arbitrary")),
    )(patches, wmat, bias)
    return pooled.reshape(N, 2 * Cout)


def fused_heads_forward(pooled, hp):
    """pooled: (N, 1024) f32 -> (N, 8) f32 (col 0 already sigmoided)."""
    N = pooled.shape[0]
    nout = hp["w2"].shape[1]
    return pl.pallas_call(
        heads_kernel,
        out_shape=jax.ShapeDtypeStruct((N, nout), jnp.float32),
        in_specs=[pl.BlockSpec(memory_space=VMEM) for _ in range(7)],
        out_specs=pl.BlockSpec(memory_space=VMEM),
    )(pooled, hp["w1"], hp["b1"], hp["s2"], hp["t2"], hp["w2"], hp["b2"])


# ----------------------------- parameter setup -----------------------------

def _bn_scale_shift(key, dim):
    kg, kb, km, kv = jax.random.split(key, 4)
    gamma = 1.0 + 0.1 * jax.random.normal(kg, (dim,), jnp.float32)
    beta = 0.1 * jax.random.normal(kb, (dim,), jnp.float32)
    mean = 0.1 * jax.random.normal(km, (dim,), jnp.float32)
    var = jnp.abs(1.0 + 0.1 * jax.random.normal(kv, (dim,), jnp.float32))
    scale = gamma / jnp.sqrt(var + 1e-5)
    shift = beta - mean * scale
    return scale.reshape(1, dim), shift.reshape(1, dim)


def make_raw_head(key, din, dmid, dout):
    k1, k2, k3, k4 = jax.random.split(key, 4)
    s1, t1 = _bn_scale_shift(k1, din)
    s2, t2 = _bn_scale_shift(k2, dmid)
    w1 = jax.random.normal(k3, (din, dmid), jnp.float32) / jnp.sqrt(din)
    b1 = jnp.zeros((1, dmid), jnp.float32)
    w2 = jax.random.normal(k4, (dmid, dout), jnp.float32) / jnp.sqrt(dmid)
    b2 = jnp.zeros((1, dout), jnp.float32)
    return dict(s1=s1, t1=t1, w1=w1, b1=b1, s2=s2, t2=t2, w2=w2, b2=b2)


def make_raw_params(key, cin=3, cenc=512):
    k_conv, k_f1, k_f2, k_f3 = jax.random.split(key, 4)
    conv_w = (jax.random.normal(k_conv, (cenc, cin, 3, 3), jnp.float32)
              / jnp.sqrt(cin * 9))
    conv_b = jnp.zeros((cenc,), jnp.float32)
    return dict(
        conv_w=conv_w, conv_b=conv_b,
        fc1=make_raw_head(k_f1, 2 * cenc, 512, HEAD_DOUTS[0]),   # age (sigmoid)
        fc2=make_raw_head(k_f2, 2 * cenc, 512, HEAD_DOUTS[1]),   # gender
        fc3=make_raw_head(k_f3, 2 * cenc, 512, HEAD_DOUTS[2]),   # ethnicity
    )


def prepare_params(raw):
    """Fold / fuse / cast raw f32 params into the kernel-friendly layout."""
    conv_w, conv_b = raw["conv_w"], raw["conv_b"]
    cout, cin, _, _ = conv_w.shape
    K = 9 * cin
    Kp = ((K + 31) // 32) * 32
    # (Cout, Cin, kh, kw) -> (kh, kw, Cin, Cout) -> (K, Cout): matches patch order
    wmat = jnp.transpose(conv_w, (2, 3, 1, 0)).reshape(K, cout)
    if Kp != K:
        wmat = jnp.pad(wmat, ((0, Kp - K), (0, 0)))
    conv = dict(wmat=wmat.astype(jnp.bfloat16),
                bias=conv_b.reshape(1, cout).astype(jnp.float32))

    heads = [raw["fc1"], raw["fc2"], raw["fc3"]]
    w1_list, b1_list = [], []
    for h in heads:
        # fold BN1 into the first linear: (x*s1+t1)@w1+b1 = x@(s1.T*w1) + (t1@w1+b1)
        w1_list.append(h["w1"] * h["s1"].reshape(-1, 1))
        b1_list.append(h["t1"] @ h["w1"] + h["b1"])
    w1cat = jnp.concatenate(w1_list, axis=1)                       # (1024, 1536)
    b1cat = jnp.concatenate(b1_list, axis=1)                       # (1, 1536)
    s2cat = jnp.concatenate([h["s2"] for h in heads], axis=1)
    t2cat = jnp.concatenate([h["t2"] for h in heads], axis=1)
    dmids = [h["w1"].shape[1] for h in heads]
    douts = [h["w2"].shape[1] for h in heads]
    w2cat = jnp.zeros((sum(dmids), sum(douts)), jnp.float32)       # block-diag
    b2cat = jnp.zeros((1, sum(douts)), jnp.float32)
    ro = co = 0
    for h, dm, do in zip(heads, dmids, douts):
        w2cat = w2cat.at[ro:ro + dm, co:co + do].set(h["w2"])
        b2cat = b2cat.at[:, co:co + do].set(h["b2"])
        ro += dm
        co += do
    head_p = dict(w1=w1cat.astype(jnp.bfloat16), b1=b1cat,
                  s2=s2cat, t2=t2cat,
                  w2=w2cat.astype(jnp.bfloat16), b2=b2cat)
    return dict(conv=conv, heads=head_p)


# ----------------------------- forward -------------------------------------

def multitask_forward(params, x):
    pooled = encoder_concat_pool(x, params["conv"]["wmat"], params["conv"]["bias"])
    out = fused_heads_forward(pooled, params["heads"])              # (N, 8)
    d0, d1, d2 = HEAD_DOUTS
    age = out[:, :d0]                      # already sigmoided in-kernel
    gender = out[:, d0:d0 + d1]
    ethnicity = out[:, d0 + d1:d0 + d1 + d2]
    return [age, gender, ethnicity]


# ----------------------------- pure-JAX reference ---------------------------

def reference_forward(raw, x):
    feat = jax.lax.conv_general_dilated(
        x, raw["conv_w"], (1, 1), "SAME",
        dimension_numbers=("NCHW", "OIHW", "NCHW"))
    feat = jnp.maximum(feat + raw["conv_b"].reshape(1, -1, 1, 1), 0.0)
    mx = jnp.max(feat, axis=(2, 3))
    av = jnp.mean(feat, axis=(2, 3))
    pooled = jnp.concatenate([mx, av], axis=1)

    def head(p, z):
        h = z * p["s1"] + p["t1"]
        h = jnp.maximum(h @ p["w1"] + p["b1"], 0.0)
        h = h * p["s2"] + p["t2"]
        return h @ p["w2"] + p["b2"]

    age = jax.nn.sigmoid(head(raw["fc1"], pooled))
    gender = head(raw["fc2"], pooled)
    ethnicity = head(raw["fc3"], pooled)
    return [age, gender, ethnicity]


if __name__ == "__main__":
    key = jax.random.PRNGKey(0)
    k_param, k_x = jax.random.split(key)
    raw = make_raw_params(k_param, cin=3, cenc=512)
    params = prepare_params(raw)
    x = jax.random.normal(k_x, (2, 3, 16, 16), jnp.float32)   # NCHW

    outs = jax.jit(multitask_forward)(params, x)
    outs = [jax.block_until_ready(o) for o in outs]

    assert outs[0].shape == (2, 1)
    assert outs[1].shape == (2, 2)
    assert outs[2].shape == (2, 5)
    assert bool(jnp.all((outs[0] >= 0.0) & (outs[0] <= 1.0)))

    # loose numerical check vs. f32 reference (kernel uses bf16 MXU operands)
    refs = reference_forward(raw, x)
    for o, r in zip(outs, refs):
        assert float(jnp.max(jnp.abs(o - r))) < 0.5, float(jnp.max(jnp.abs(o - r)))

    print("KERNEL_OK")
</pallas_src>

<mosaic_0001>
module attributes {stable_mosaic.version = 11 : i64} {
  func.func @conv_pool_kernel(%arg0: i32, %arg1: i32, %arg2: memref<1x256x32xbf16, #tpu.memory_space<vmem>>, %arg3: memref<32x512xbf16, #tpu.memory_space<vmem>>, %arg4: memref<1x512xf32, #tpu.memory_space<vmem>>, %arg5: memref<1x1x1024xf32, #tpu.memory_space<vmem>>, %arg6: memref<1x512xf32, #tpu.memory_space<vmem>>, %arg7: memref<1x512xf32, #tpu.memory_space<vmem>>) attributes {dimension_semantics = [#tpu.dimension_semantics<parallel>, #tpu.dimension_semantics<arbitrary>], iteration_bounds = array<i64: 2, 1>, scalar_prefetch = 0 : i64, scratch_operands = 2 : i64, tpu.core_type = #tpu.core_type<tc>, window_params = [{transform_indices = @transform_0, window_bounds = array<i64: 1, 256, 32>}, {pipeline_mode = #tpu.pipeline_mode<synchronous>, transform_indices = @transform_1, window_bounds = array<i64: 32, 512>}, {pipeline_mode = #tpu.pipeline_mode<synchronous>, transform_indices = @transform_2, window_bounds = array<i64: 1, 512>}, {transform_indices = @transform_3, window_bounds = array<i64: 1, 1, 1024>}]} {
    %c0_i32 = arith.constant 0 : i32
    %0 = arith.cmpi eq, %arg1, %c0_i32 : i32
    %1 = arith.extui %0 : i1 to i32
    %c0_i32_0 = arith.constant 0 : i32
    %2 = arith.cmpi ne, %1, %c0_i32_0 : i32
    scf.if %2 {
      %cst_20 = arith.constant 0xFF800000 : f32
      %25 = vector.broadcast %cst_20 : f32 to vector<1x512xf32>
      %c0_21 = arith.constant 0 : index
      %c0_22 = arith.constant 0 : index
      %26 = vector.load %arg6[%c0_21, %c0_22] : memref<1x512xf32, #tpu.memory_space<vmem>>, vector<1x512xf32>
      tpu.vector_store %arg6[%c0_21, %c0_22], %25 {strides = array<i32>} : memref<1x512xf32, #tpu.memory_space<vmem>>, vector<1x512xf32>,
      %cst_23 = arith.constant 0.000000e+00 : f32
      %27 = vector.broadcast %cst_23 : f32 to vector<1x512xf32>
      %c0_24 = arith.constant 0 : index
      %c0_25 = arith.constant 0 : index
      %28 = vector.load %arg7[%c0_24, %c0_25] : memref<1x512xf32, #tpu.memory_space<vmem>>, vector<1x512xf32>
      tpu.vector_store %arg7[%c0_24, %c0_25], %27 {strides = array<i32>} : memref<1x512xf32, #tpu.memory_space<vmem>>, vector<1x512xf32>,
    } else {
    }
    %c0 = arith.constant 0 : index
    %c0_1 = arith.constant 0 : index
    %c0_2 = arith.constant 0 : index
    %3 = vector.load %arg2[%c0, %c0_1, %c0_2] : memref<1x256x32xbf16, #tpu.memory_space<vmem>>, vector<1x256x32xbf16>
    %4 = vector.shape_cast %3 : vector<1x256x32xbf16> to vector<256x32xbf16>
    %c0_3 = arith.constant 0 : index
    %c0_4 = arith.constant 0 : index
    %5 = vector.load %arg3[%c0_3, %c0_4] : memref<32x512xbf16, #tpu.memory_space<vmem>>, vector<32x512xbf16>
    %cst = arith.constant dense<0.000000e+00> : vector<256x512xf32>
    %6 = tpu.matmul %4, %5, %cst {dimension_numbers = #tpu.dot_dimension_numbers<[1], [0], [0], [1], [0, 0, 1, 1], [], []>} : vector<256x32xbf16>, vector<32x512xbf16>, vector<256x512xf32> -> vector<256x512xf32>
    %c0_5 = arith.constant 0 : index
    %c0_6 = arith.constant 0 : index
    %7 = vector.load %arg4[%c0_5, %c0_6] : memref<1x512xf32, #tpu.memory_space<vmem>>, vector<1x512xf32>
    %8 = vector.broadcast %7 : vector<1x512xf32> to vector<256x512xf32>
    %9 = arith.addf %6, %8 : vector<256x512xf32>
    %cst_7 = arith.constant 0.000000e+00 : f32
    %10 = vector.broadcast %cst_7 : f32 to vector<256x512xf32>
    %11 = arith.maximumf %9, %10 : vector<256x512xf32>
    %c0_8 = arith.constant 0 : index
    %c0_9 = arith.constant 0 : index
    %12 = vector.load %arg6[%c0_8, %c0_9] : memref<1x512xf32, #tpu.memory_space<vmem>>, vector<1x512xf32>
    %cst_10 = arith.constant dense<0xFF800000> : vector<512xf32>
    %13 = vector.multi_reduction <maximumf>, %11, %cst_10 [0] : vector<256x512xf32> to vector<512xf32>
    %14 = vector.shape_cast %13 : vector<512xf32> to vector<1x512xf32>
    %15 = arith.maximumf %12, %14 : vector<1x512xf32>
    %c0_11 = arith.constant 0 : index
    %c0_12 = arith.constant 0 : index
    %16 = vector.load %arg6[%c0_11, %c0_12] : memref<1x512xf32, #tpu.memory_space<vmem>>, vector<1x512xf32>
    tpu.vector_store %arg6[%c0_11, %c0_12], %15 {strides = array<i32>} : memref<1x512xf32, #tpu.memory_space<vmem>>, vector<1x512xf32>,
    %c0_13 = arith.constant 0 : index
    %c0_14 = arith.constant 0 : index
    %17 = vector.load %arg7[%c0_13, %c0_14] : memref<1x512xf32, #tpu.memory_space<vmem>>, vector<1x512xf32>
    %cst_15 = arith.constant dense<0.000000e+00> : vector<512xf32>
    %18 = vector.multi_reduction <add>, %11, %cst_15 [0] : vector<256x512xf32> to vector<512xf32>
    %19 = vector.shape_cast %18 : vector<512xf32> to vector<1x512xf32>
    %20 = arith.addf %17, %19 : vector<1x512xf32>
    %c0_16 = arith.constant 0 : index
    %c0_17 = arith.constant 0 : index
    %21 = vector.load %arg7[%c0_16, %c0_17] : memref<1x512xf32, #tpu.memory_space<vmem>>, vector<1x512xf32>
    tpu.vector_store %arg7[%c0_16, %c0_17], %20 {strides = array<i32>} : memref<1x512xf32, #tpu.memory_space<vmem>>, vector<1x512xf32>,
    %c0_i32_18 = arith.constant 0 : i32
    %22 = arith.cmpi eq, %arg1, %c0_i32_18 : i32
    %23 = arith.extui %22 : i1 to i32
    %c0_i32_19 = arith.constant 0 : i32
    %24 = arith.cmpi ne, %23, %c0_i32_19 : i32
    scf.if %24 {
      %c0_20 = arith.constant 0 : index
      %c0_21 = arith.constant 0 : index
      %25 = vector.load %arg6[%c0_20, %c0_21] : memref<1x512xf32, #tpu.memory_space<vmem>>, vector<1x512xf32>
      %c0_22 = arith.constant 0 : index
      %c0_23 = arith.constant 0 : index
      %c0_24 = arith.constant 0 : index
      %26 = vector.load %arg5[%c0_22, %c0_23, %c0_24] : memref<1x1x1024xf32, #tpu.memory_space<vmem>>, vector<1x1x512xf32>
      %27 = vector.shape_cast %26 : vector<1x1x512xf32> to vector<1x512xf32>
      %28 = vector.shape_cast %25 : vector<1x512xf32> to vector<1x1x512xf32>
      tpu.vector_store %arg5[%c0_22, %c0_23, %c0_24], %28 {strides = array<i32>} : memref<1x1x1024xf32, #tpu.memory_space<vmem>>, vector<1x1x512xf32>,
      %c0_25 = arith.constant 0 : index
      %c0_26 = arith.constant 0 : index
      %29 = vector.load %arg7[%c0_25, %c0_26] : memref<1x512xf32, #tpu.memory_space<vmem>>, vector<1x512xf32>
      %cst_27 = arith.constant 3.906250e-03 : f32
      %30 = vector.broadcast %cst_27 : f32 to vector<1x512xf32>
      %31 = arith.mulf %29, %30 : vector<1x512xf32>
      %c0_28 = arith.constant 0 : index
      %c0_29 = arith.constant 0 : index
      %c512 = arith.constant 512 : index
      %32 = vector.load %arg5[%c0_28, %c0_29, %c512] : memref<1x1x1024xf32, #tpu.memory_space<vmem>>, vector<1x1x512xf32>
      %33 = vector.shape_cast %32 : vector<1x1x512xf32> to vector<1x512xf32>
      %34 = vector.shape_cast %31 : vector<1x512xf32> to vector<1x1x512xf32>
      tpu.vector_store %arg5[%c0_28, %c0_29, %c512], %34 {strides = array<i32>} : memref<1x1x1024xf32, #tpu.memory_space<vmem>>, vector<1x1x512xf32>,
    } else {
    }
    return
  }
  func.func @transform_0(%arg0: i32, %arg1: i32) -> (i32, i32, i32) {
    %c0_i32 = arith.constant 0 : i32
    %c0_i32_0 = arith.constant 0 : i32
    return %arg0, %arg1, %c0_i32 : i32, i32, i32
  }
  func.func @transform_1(%arg0: i32, %arg1: i32) -> (i32, i32) {
    %c0_i32 = arith.constant 0 : i32
    %c0_i32_0 = arith.constant 0 : i32
    %c0_i32_1 = arith.constant 0 : i32
    return %c0_i32, %c0_i32_0 : i32, i32
  }
  func.func @transform_2(%arg0: i32, %arg1: i32) -> (i32, i32) {
    %c0_i32 = arith.constant 0 : i32
    %c0_i32_0 = arith.constant 0 : i32
    %c0_i32_1 = arith.constant 0 : i32
    return %c0_i32, %c0_i32_0 : i32, i32
  }
  func.func @transform_3(%arg0: i32, %arg1: i32) -> (i32, i32, i32) {
    %c0_i32 = arith.constant 0 : i32
    %c0_i32_0 = arith.constant 0 : i32
    %c0_i32_1 = arith.constant 0 : i32
    return %arg0, %c0_i32, %c0_i32_0 : i32, i32, i32
  }
}

module attributes {stable_mosaic.version = 11 : i64} {
  func.func @heads_kernel(%arg0: memref<2x1024xf32, #tpu.memory_space<vmem>>, %arg1: memref<1024x1536xbf16, #tpu.memory_space<vmem>>, %arg2: memref<1x1536xf32, #tpu.memory_space<vmem>>, %arg3: memref<1x1536xf32, #tpu.memory_space<vmem>>, %arg4: memref<1x1536xf32, #tpu.memory_space<vmem>>, %arg5: memref<1536x8xbf16, #tpu.memory_space<vmem>>, %arg6: memref<1x8xf32, #tpu.memory_space<vmem>>, %arg7: memref<2x8xf32, #tpu.memory_space<vmem>>) attributes {dimension_semantics = [], scalar_prefetch = 0 : i64, scratch_operands = 0 : i64, tpu.core_type = #tpu.core_type<tc>} {
    %c0 = arith.constant 0 : index
    %c0_0 = arith.constant 0 : index
    %0 = vector.load %arg0[%c0, %c0_0] : memref<2x1024xf32, #tpu.memory_space<vmem>>, vector<2x1024xf32>
    %1 = arith.truncf %0 : vector<2x1024xf32> to vector<2x1024xbf16>
    %c0_1 = arith.constant 0 : index
    %c0_2 = arith.constant 0 : index
    %2 = vector.load %arg1[%c0_1, %c0_2] : memref<1024x1536xbf16, #tpu.memory_space<vmem>>, vector<1024x1536xbf16>
    %cst = arith.constant dense<0.000000e+00> : vector<2x1536xf32>
    %3 = tpu.matmul %1, %2, %cst {dimension_numbers = #tpu.dot_dimension_numbers<[1], [0], [0], [1], [0, 0, 1, 1], [], []>} : vector<2x1024xbf16>, vector<1024x1536xbf16>, vector<2x1536xf32> -> vector<2x1536xf32>
    %c0_3 = arith.constant 0 : index
    %c0_4 = arith.constant 0 : index
    %4 = vector.load %arg2[%c0_3, %c0_4] : memref<1x1536xf32, #tpu.memory_space<vmem>>, vector<1x1536xf32>
    %5 = vector.broadcast %4 : vector<1x1536xf32> to vector<2x1536xf32>
    %6 = arith.addf %3, %5 : vector<2x1536xf32>
    %cst_5 = arith.constant 0.000000e+00 : f32
    %7 = vector.broadcast %cst_5 : f32 to vector<2x1536xf32>
    %8 = arith.maximumf %6, %7 : vector<2x1536xf32>
    %c0_6 = arith.constant 0 : index
    %c0_7 = arith.constant 0 : index
    %9 = vector.load %arg3[%c0_6, %c0_7] : memref<1x1536xf32, #tpu.memory_space<vmem>>, vector<1x1536xf32>
    %10 = vector.broadcast %9 : vector<1x1536xf32> to vector<2x1536xf32>
    %11 = arith.mulf %8, %10 : vector<2x1536xf32>
    %c0_8 = arith.constant 0 : index
    %c0_9 = arith.constant 0 : index
    %12 = vector.load %arg4[%c0_8, %c0_9] : memref<1x1536xf32, #tpu.memory_space<vmem>>, vector<1x1536xf32>
    %13 = vector.broadcast %12 : vector<1x1536xf32> to vector<2x1536xf32>
    %14 = arith.addf %11, %13 : vector<2x1536xf32>
    %15 = arith.truncf %14 : vector<2x1536xf32> to vector<2x1536xbf16>
    %c0_10 = arith.constant 0 : index
    %c0_11 = arith.constant 0 : index
    %16 = vector.load %arg5[%c0_10, %c0_11] : memref<1536x8xbf16, #tpu.memory_space<vmem>>, vector<1536x8xbf16>
    %cst_12 = arith.constant dense<0.000000e+00> : vector<2x8xf32>
    %17 = tpu.matmul %15, %16, %cst_12 {dimension_numbers = #tpu.dot_dimension_numbers<[1], [0], [0], [1], [0, 0, 1, 1], [], []>} : vector<2x1536xbf16>, vector<1536x8xbf16>, vector<2x8xf32> -> vector<2x8xf32>
    %c0_13 = arith.constant 0 : index
    %c0_14 = arith.constant 0 : index
    %18 = vector.load %arg6[%c0_13, %c0_14] : memref<1x8xf32, #tpu.memory_space<vmem>>, vector<1x8xf32>
    %19 = vector.broadcast %18 : vector<1x8xf32> to vector<2x8xf32>
    %20 = arith.addf %17, %19 : vector<2x8xf32>
    %21 = tpu.iota {dimensions = array<i32: 1>} : vector<2x8xi32>
    %c0_i32 = arith.constant 0 : i32
    %22 = vector.broadcast %c0_i32 : i32 to vector<2x8xi32>
    %23 = arith.cmpi eq, %21, %22 : vector<2x8xi32>
    %24 = arith.negf %20 : vector<2x8xf32>
    %25 = math.exp %24 : vector<2x8xf32>
    %cst_15 = arith.constant 1.000000e+00 : f32
    %26 = vector.broadcast %cst_15 : f32 to vector<2x8xf32>
    %27 = arith.addf %26, %25 : vector<2x8xf32>
    %28 = arith.divf %26, %27 : vector<2x8xf32>
    %29 = arith.select %23, %28, %20 : vector<2x8xi1>, vector<2x8xf32>
    %c0_16 = arith.constant 0 : index
    %c0_17 = arith.constant 0 : index
    %30 = vector.load %arg7[%c0_16, %c0_17] : memref<2x8xf32, #tpu.memory_space<vmem>>, vector<2x8xf32>
    tpu.vector_store %arg7[%c0_16, %c0_17], %29 {strides = array<i32>} : memref<2x8xf32, #tpu.memory_space<vmem>>, vector<2x8xf32>,
    return
  }
}

</mosaic_0001>

<bundles_post_ra>
// kernel: multitask_forward.2
= control target key start
LH: loop header
LB: loop body
LE: loop exit
PB: predicated region body
PF: predicated region fallthrough
CT: control target
= control target key end

     0   :  { %8 = vsyncpa [#allocation5], 0  ;;  %s2069_s0 = inlined_call_operand.vmem [shape: bf16[2,256,32], index: 0, kind: input, shape index: {}]   ;;  %s2070_s1 = inlined_call_operand.hbm [shape: bf16[32,512], index: 1, kind: input, shape index: {}]   ;;  %s2071_s2 = inlined_call_operand.hbm [shape: f32[1,512], index: 2, kind: input, shape index: {}]   ;;  %s2072_s3 = inlined_call_operand.vmem [shape: f32[2,1,1024], index: 3, kind: output, shape index: {}]  }
   0x1   :  { %9 = vsyncpa [#allocation7], 0  ;;  %s1709_s12 = smov 0   ;;  %s1711_s13 = smov 0  }
   0x2   :  { %s1713_s14 = smov 0  }
   0x3 LB: > { %s1443_s15 = sadd.s32 4294967295, %s1679_s14   ;;  %s27_s16 = sadd.s32 1, %s1675_s13  ;;  %s1679_s14 = sphi %s1713_s14, %s15_s14   ;;  %s1675_s13 = sphi %s1711_s13, %s2084_s13   ;;  %s1671_s12 = sphi %s1709_s12, %s2083_s12  }
   0x4   : > { %p29_p0 = scmp.ge.s32.totalorder %s27_s16, 2  ;;  %p1445_p1 = scmp.ge.s32.totalorder %s1679_s14, 1 }
   0x5   : > { %p128_p2 = scmp.lt.s32.totalorder %s1679_s14, 3  ;;  %p1734_p4 = scmp.eq.s32.totalorder %s1443_s15, 0 }
   0x6   : > { %s2086_s16 = smov (%p29_p0, %s27_s16), 0  ;;  %s1681_s19 = smov [#allocation4]  }
   0x7   : > { %p1730_p3 = pnand %p1445_p1, %p128_p2  ;;  %s140_s20 = sshll.u32 %s1681_s19, 4  ;;  %s141_s20 = int_to_ptr.vmem [resolvable:$true] %s140_s20 }
   0x8   : > { %s2077_s18 = scalar_select %p1734_p4, 1, 0 }
   0x9   : > { %s2076_s17 = scalar_select %p1730_p3, 1, 0 }
   0xa   : > { %p1522_p5 = pneg %p1730_p3  ;;  %s1682_s22 = smov [#allocation6]  }
   0xb   : > { %s154_s23 = sshll.u32 %s1682_s22, 4  ;;  %s1593_s26 = scalar_lea.hbm %s2070_s1, 1024  ;;  %s1746_s23 = int_to_ptr.vmem [resolvable:$true] %s154_s23 }
   0xc   : > { %p1742_p6 = pnand %p1734_p4, %p1522_p5  ;;  %p1594_p7 = scmp.ne.s32.totalorder %s2070_s1, %s1593_s26 }
   0xd   : > { %p1600_p11 = scmp.lt.u32.totalorder %s1593_s26, %s2070_s1 }
   0xe   : > { %p1595_p8 = pneg %p1742_p6 }
  0x10   : > { %p1596_p9 = pnand %p1595_p8, %p1594_p7 }
  0x12   : > { %p1597_p10 = pneg %p1596_p9 }
  0x14   : > { %p1602_p12 = pnand %p1600_p11, %p1597_p10 }
  0x16   : > { %1605 = shalt.err (!%p1602_p12)
}
  0x17   : > { %s1606_s4 = scalar_lea.vmem %s141_s20, 1024  ;;  %p1614_p2 = scmp.lt.s32.totalorder %s141_s20, %s141_s20 }
  0x18   : > { %p1607_p13 = scmp.ne.s32.totalorder %s141_s20, %s1606_s4  ;;  %p1615_p5 = scmp.lt.s32.totalorder %s1606_s4, %s1606_s4 }
  0x1a   : > { %p1609_p0 = pnand %p1607_p13, %p1595_p8  ;;  %p1616_p4 = por %p1615_p5, %p1614_p2 }
  0x1c   : > { %p1610_p1 = pneg %p1609_p0 }
  0x1e   : > { %p1617_p3 = pnand %p1616_p4, %p1610_p1 }
  0x20   : > { %1620 = shalt.err (!%p1617_p3)
}
  0x21   : > { %s1683_s5 = smov 256   ;;  %s1684_s6 = smov 16  }
  0x22   : > { %1525 = dma.hbm_to_vmem [thread:$0]  (!%p1742_p6), %s2070_s1, 1024, %s141_s20, [#allocation5], %s1683_s5, %s1683_s5, %s1684_s6  }
  0x23   : > { %s1621_s11 = scalar_lea.hbm %s2071_s2, 64 }
  0x24   : > { %p1622_p7 = scmp.ne.s32.totalorder %s2071_s2, %s1621_s11  ;;  %p1628_p9 = scmp.lt.u32.totalorder %s1621_s11, %s2071_s2 }
  0x26   : > { %p1624_p3 = pnand %p1622_p7, %p1595_p8 }
  0x28   : > { %p1625_p4 = pneg %p1624_p3 }
  0x2a   : > { %p1630_p10 = pnand %p1628_p9, %p1625_p4 }
  0x2c   : > { %1633 = shalt.err (!%p1630_p10)
}
  0x2d   : > { %s1634_s20 = scalar_lea.vmem %s1746_s23, 64  ;;  %p1642_p0 = scmp.lt.s32.totalorder %s1746_s23, %s1746_s23 }
  0x2e   : > { %p1635_p11 = scmp.ne.s32.totalorder %s1746_s23, %s1634_s20  ;;  %p1643_p1 = scmp.lt.s32.totalorder %s1634_s20, %s1634_s20 }
  0x30   : > { %p1637_p12 = pnand %p1635_p11, %p1595_p8  ;;  %p1644_p2 = por %p1643_p1, %p1642_p0 }
  0x32   : > { %p1638_p13 = pneg %p1637_p12 }
  0x34   : > { %p1645_p5 = pnand %p1644_p2, %p1638_p13 }
  0x36   : > { %1648 = shalt.err (!%p1645_p5)
}
  0x37   : > { %1528 = dma.hbm_to_vmem [thread:$0]  (!%p1742_p6), %s2071_s2, 64, %s1746_s23, [#allocation7]  }
  0x38   : > { %p2079_p7 = scmp.ne.s32.totalorder %s2076_s17, 0 }
  0x39   : > { %p2080_p3 = scmp.ne.s32.totalorder (!%p2079_p7), %s2077_s18, 0 }
  0x3a   : > { %180 = sbr.rel (%p2079_p7) target bundleno = 458 (0x1ca), region = 32 }
  0x41   : > { %1662 = dma.done.wait (%p2080_p3), [#allocation5], 1024  }
  0x42   : > { %1664 = vsyncadd (%p2080_p3), [#allocation5], 4294966272 }
  0x43   : > { %1666 = dma.done.wait (%p2080_p3), [#allocation7], 64  }
  0x44   : > { %1668 = vsyncadd (%p2080_p3), [#allocation7], 4294967232  ;;  %p212_p8 = scmp.lt.s32.totalorder %s1671_s12, 1  ;;  %v1685_v0 = vmov 0   ;;  %v1565_v1 = vld [vmem:[#allocation4 + $0x4] ss:$16 sps:$4 sm:$0xff]   ;;  %v230_v25 = vlaneseq }
  0x45   : > { %499 = vmatprep.mubr.bf16.mxu0 %v1685_v0  ;;  %692 = vmatprep.mubr.bf16.mxu1 %v1685_v0  ;;  %v1567_v2 = vld [vmem:[#allocation4 + $0xc] ss:$16 sps:$4 sm:$0xff]   ;;  %v1569_v3 = vld [vmem:[#allocation4] ss:$16 sps:$4 sm:$0xff]   ;;  %v1570_v4 = vld [vmem:[#allocation4 + $0x8] ss:$16 sps:$4 sm:$0xff]  }
  0x46   : > { %s2088_s12 = smov (!%p212_p8, %s1671_s12), 1  ;;  %467 = vmatprep.subr.bf16.mxu0 %v1565_v1  ;;  %660 = vmatprep.subr.bf16.mxu1 %v1567_v2  ;;  %v1571_v5 = vld [vmem:[#allocation4 + $0x24] ss:$16 sps:$4 sm:$0xff]   ;;  %v1573_v6 = vld [vmem:[#allocation4 + $0x2c] ss:$16 sps:$4 sm:$0xff]   ;;  %vm418_vm0 = vcmask 261120  }
  0x47   : > { %s1513_s17 = sshll.u32 %s2088_s12, 7  ;;  %468 = vmatpush1.bf16.msra.mxu0 %v1569_v3  ;;  %661 = vmatpush1.bf16.msra.mxu1 %v1570_v4  ;;  %v1575_v7 = vld [vmem:[#allocation4 + $0x20] ss:$16 sps:$4 sm:$0xff]   ;;  %v1576_v8 = vld [vmem:[#allocation4 + $0x28] ss:$16 sps:$4 sm:$0xff]   ;;  %v1896_v26 = vshrl.u32 %v230_v25, 7 }
  0x48   : > { %s1815_s23 = scalar_lea.vmem %s2069_s0, %s1513_s17  ;;  %469 = vmatprep.subr.bf16.mxu0 %v1571_v5  ;;  %662 = vmatprep.subr.bf16.mxu1 %v1573_v6  ;;  %v276_v29 = vld [vmem:[#allocation6] sm:$0xf]  ;;  %vm1927_vm1 = vcmp.lt.s32.totalorder %v230_v25, 512  ;;  %s1454_s27 = sshll.u32 %s2088_s12, 3 }
  0x49   : > { %v1577_v9 = vld [vmem:[%s1815_s23] sm:$0xff]   ;;  %v1578_v10 = vld [vmem:[%s1815_s23 + $0x8] sm:$0xff]   ;;  %v1579_v11 = vld [vmem:[%s1815_s23 + $0x10] sm:$0xff]   ;;  %v280_v27 = vsub.s32 0, %v1896_v26  ;;  %v288_v28 = vsub.s32 2, %v1896_v26  ;;  %v284_v30 = vsub.s32 1, %v1896_v26  ;;  %s224_s30 = scalar_lea.vmem %s2072_s3, %s1454_s27 }
  0x4a   : > { %v1580_v12 = vld [vmem:[%s1815_s23 + $0x18] sm:$0xff]   ;;  %v1581_v13 = vld [vmem:[%s1815_s23 + $0x20] sm:$0xff]   ;;  %v1582_v14 = vld [vmem:[%s1815_s23 + $0x28] sm:$0xff]   ;;  %v292_v31 = vsub.s32 3, %v1896_v26 }
  0x4b   : > { %470 = vmatpush1.bf16.msra.mxu0 %v1575_v7  ;;  %663 = vmatpush1.bf16.msra.mxu1 %v1576_v8  ;;  %v1583_v15 = vld [vmem:[%s1815_s23 + $0x30] sm:$0xff]   ;;  %v1584_v16 = vld [vmem:[%s1815_s23 + $0x38] sm:$0xff]   ;;  %v1585_v17 = vld [vmem:[%s1815_s23 + $0x40] sm:$0xff]   ;;  %v1902_v32 = vrot.slane %v276_v29, %v280_v27  ;;  %v1904_v33 = vrot.slane %v276_v29, %v288_v28  ;;  %v1906_v34 = vrot.slane %v276_v29, %v284_v30 }
  0x4c   : > { %v1586_v18 = vld [vmem:[%s1815_s23 + $0x48] sm:$0xff]   ;;  %v1587_v19 = vld [vmem:[%s1815_s23 + $0x50] sm:$0xff]   ;;  %v1588_v20 = vld [vmem:[%s1815_s23 + $0x58] sm:$0xff]   ;;  %v1908_v35 = vrot.slane %v276_v29, %v292_v31 }
  0x4d   : > { %v1589_v21 = vld [vmem:[%s1815_s23 + $0x60] sm:$0xff]   ;;  %v1590_v22 = vld [vmem:[%s1815_s23 + $0x68] sm:$0xff]   ;;  %v1591_v23 = vld [vmem:[%s1815_s23 + $0x70] sm:$0xff]  }
  0x4e   : > { %1479 = vmatmul.mubr.msk.bf16.vlgmr.msra.gmra.mrb[0].mxu0 %vm418_vm0, %v1577_v9  ;;  %1495 = vmatmul.mubr.msk.bf16.vlgmr.msra.gmra.mrb[0].mxu1 %vm418_vm0, %v1577_v9  ;;  %v1592_v24 = vld [vmem:[%s1815_s23 + $0x78] sm:$0xff]  }
  0x4f   : > { %509 = vmatprep.mubr.bf16.mxu0 %v1685_v0  ;;  %702 = vmatprep.mubr.bf16.mxu1 %v1685_v0 }
  0x56   : > { %1480 = vmatmul.mubr.msk.bf16.gmra.mrb[4].mxu0 %vm418_vm0, %v1578_v10  ;;  %1496 = vmatmul.mubr.msk.bf16.gmra.mrb[4].mxu1 %vm418_vm0, %v1578_v10 }
  0x57   : > { %519 = vmatprep.mubr.bf16.mxu0 %v1685_v0  ;;  %712 = vmatprep.mubr.bf16.mxu1 %v1685_v0 }
  0x5e   : > { %1481 = vmatmul.mubr.msk.bf16.gmra.mrb[8].mxu0 %vm418_vm0, %v1579_v11  ;;  %1497 = vmatmul.mubr.msk.bf16.gmra.mrb[8].mxu1 %vm418_vm0, %v1579_v11 }
  0x5f   : > { %529 = vmatprep.mubr.bf16.mxu0 %v1685_v0  ;;  %722 = vmatprep.mubr.bf16.mxu1 %v1685_v0 }
  0x66   : > { %1482 = vmatmul.mubr.msk.bf16.gmra.mrb[12].mxu0 %vm418_vm0, %v1580_v12  ;;  %1498 = vmatmul.mubr.msk.bf16.gmra.mrb[12].mxu1 %vm418_vm0, %v1580_v12 }
  0x67   : > { %539 = vmatprep.mubr.bf16.mxu0 %v1685_v0  ;;  %732 = vmatprep.mubr.bf16.mxu1 %v1685_v0 }
  0x6e   : > { %1483 = vmatmul.mubr.msk.bf16.gmra.mrb[16].mxu0 %vm418_vm0, %v1581_v13  ;;  %1499 = vmatmul.mubr.msk.bf16.gmra.mrb[16].mxu1 %vm418_vm0, %v1581_v13 }
  0x6f   : > { %549 = vmatprep.mubr.bf16.mxu0 %v1685_v0  ;;  %742 = vmatprep.mubr.bf16.mxu1 %v1685_v0 }
  0x76   : > { %1484 = vmatmul.mubr.msk.bf16.gmra.mrb[20].mxu0 %vm418_vm0, %v1582_v14  ;;  %1500 = vmatmul.mubr.msk.bf16.gmra.mrb[20].mxu1 %vm418_vm0, %v1582_v14 }
  0x77   : > { %559 = vmatprep.mubr.bf16.mxu0 %v1685_v0  ;;  %752 = vmatprep.mubr.bf16.mxu1 %v1685_v0 }
  0x7e   : > { %1485 = vmatmul.mubr.msk.bf16.gmra.mrb[24].mxu0 %vm418_vm0, %v1583_v15  ;;  %1501 = vmatmul.mubr.msk.bf16.gmra.mrb[24].mxu1 %vm418_vm0, %v1583_v15 }
  0x7f   : > { %569 = vmatprep.mubr.bf16.mxu0 %v1685_v0  ;;  %762 = vmatprep.mubr.bf16.mxu1 %v1685_v0 }
  0x86   : > { %1486 = vmatmul.mubr.msk.bf16.gmra.mrb[28].mxu0 %vm418_vm0, %v1584_v16  ;;  %1502 = vmatmul.mubr.msk.bf16.gmra.mrb[28].mxu1 %vm418_vm0, %v1584_v16 }
  0x87   : > { %579 = vmatprep.mubr.bf16.mxu0 %v1685_v0  ;;  %772 = vmatprep.mubr.bf16.mxu1 %v1685_v0 }
  0x8e   : > { %1487 = vmatmul.mubr.msk.bf16.gmra.mrb[32].mxu0 %vm418_vm0, %v1585_v17  ;;  %1503 = vmatmul.mubr.msk.bf16.gmra.mrb[32].mxu1 %vm418_vm0, %v1585_v17 }
  0x8f   : > { %589 = vmatprep.mubr.bf16.mxu0 %v1685_v0  ;;  %782 = vmatprep.mubr.bf16.mxu1 %v1685_v0 }
  0x96   : > { %1488 = vmatmul.mubr.msk.bf16.gmra.mrb[36].mxu0 %vm418_vm0, %v1586_v18  ;;  %1504 = vmatmul.mubr.msk.bf16.gmra.mrb[36].mxu1 %vm418_vm0, %v1586_v18 }
  0x97   : > { %599 = vmatprep.mubr.bf16.mxu0 %v1685_v0  ;;  %792 = vmatprep.mubr.bf16.mxu1 %v1685_v0 }
  0x9e   : > { %1489 = vmatmul.mubr.msk.bf16.gmra.mrb[40].mxu0 %vm418_vm0, %v1587_v19  ;;  %1505 = vmatmul.mubr.msk.bf16.gmra.mrb[40].mxu1 %vm418_vm0, %v1587_v19 }
  0x9f   : > { %609 = vmatprep.mubr.bf16.mxu0 %v1685_v0  ;;  %802 = vmatprep.mubr.bf16.mxu1 %v1685_v0 }
  0xa6   : > { %1490 = vmatmul.mubr.msk.bf16.gmra.mrb[44].mxu0 %vm418_vm0, %v1588_v20  ;;  %1506 = vmatmul.mubr.msk.bf16.gmra.mrb[44].mxu1 %vm418_vm0, %v1588_v20 }
  0xa7   : > { %619 = vmatprep.mubr.bf16.mxu0 %v1685_v0  ;;  %812 = vmatprep.mubr.bf16.mxu1 %v1685_v0 }
  0xae   : > { %1491 = vmatmul.mubr.msk.bf16.gmra.mrb[48].mxu0 %vm418_vm0, %v1589_v21  ;;  %1507 = vmatmul.mubr.msk.bf16.gmra.mrb[48].mxu1 %vm418_vm0, %v1589_v21 }
  0xaf   : > { %629 = vmatprep.mubr.bf16.mxu0 %v1685_v0  ;;  %822 = vmatprep.mubr.bf16.mxu1 %v1685_v0 }
  0xb6   : > { %1492 = vmatmul.mubr.msk.bf16.gmra.mrb[52].mxu0 %vm418_vm0, %v1590_v22  ;;  %1508 = vmatmul.mubr.msk.bf16.gmra.mrb[52].mxu1 %vm418_vm0, %v1590_v22 }
  0xb7   : > { %639 = vmatprep.mubr.bf16.mxu0 %v1685_v0  ;;  %832 = vmatprep.mubr.bf16.mxu1 %v1685_v0 }
  0xbe   : > { %1493 = vmatmul.mubr.msk.bf16.gmra.mrb[56].mxu0 %vm418_vm0, %v1591_v23  ;;  %1509 = vmatmul.mubr.msk.bf16.gmra.mrb[56].mxu1 %vm418_vm0, %v1591_v23 }
  0xbf   : > { %649 = vmatprep.mubr.bf16.mxu0 %v1685_v0  ;;  %842 = vmatprep.mubr.bf16.mxu1 %v1685_v0 }
  0xc6   : > { %1494 = vmatmul.mubr.msk.bf16.gmra.mrb[60].mxu0 %vm418_vm0, %v1592_v24  ;;  %1510 = vmatmul.mubr.msk.bf16.gmra.mrb[60].mxu1 %vm418_vm0, %v1592_v24 }
 0x121   : > { %v501_v36 = vpop.f32.mrb[0].mxu0  ;;  %v694_v37 = vpop.f32.mrb[0].mxu1 }
 0x122   : > { %v502_v38 = vadd.f32 %v501_v36, %v1902_v32  ;;  %v695_v39 = vadd.f32 %v694_v37, %v1904_v33  ;;  %v503_v40 = vpop.f32.mrb[1].mxu0  ;;  %v696_v41 = vpop.f32.mrb[1].mxu1 }
 0x123   : > { %v504_v42 = vadd.f32 %v503_v40, %v1906_v34  ;;  %v697_v43 = vadd.f32 %v696_v41, %v1908_v35  ;;  %v505_v44 = vpop.f32.mrb[2].mxu0  ;;  %v698_v45 = vpop.f32.mrb[2].mxu1 }
 0x124   : > { %v506_v46 = vadd.f32 %v505_v44, %v1902_v32  ;;  %v699_v47 = vadd.f32 %v698_v45, %v1904_v33  ;;  %v507_v48 = vpop.f32.mrb[3].mxu0  ;;  %v700_v49 = vpop.f32.mrb[3].mxu1  ;;  %v853_v52 = vmax.f32 %v502_v38, 0.0  ;;  %v855_v53 = vmax.f32 %v695_v39, 0.0 }
 0x125   : > { %v508_v50 = vadd.f32 %v507_v48, %v1906_v34  ;;  %v701_v51 = vadd.f32 %v700_v49, %v1908_v35  ;;  %v854_v56 = vmax.f32 %v504_v42, 0.0  ;;  %v856_v57 = vmax.f32 %v697_v43, 0.0 }
 0x126   : > { %v857_v54 = vmax.f32 %v506_v46, 0.0  ;;  %v859_v55 = vmax.f32 %v699_v47, 0.0 }
 0x127   : > { %v858_v58 = vmax.f32 %v508_v50, 0.0  ;;  %v860_v59 = vmax.f32 %v701_v51, 0.0  ;;  %v1686_v51 = vmov -inf  }
 0x128   : > { %v982_v60 = vmax.f32 %v853_v52, %v857_v54  ;;  %v1166_v61 = vadd.f32 %v857_v54, %v853_v52  ;;  %v1056_v62 = vmax.f32 %v855_v53, %v859_v55  ;;  %v1240_v63 = vadd.f32 %v859_v55, %v855_v53  ;;  %234 = vst.msk [vmem:[#allocation2] sm:$0xf] %vm1927_vm1, %v1686_v51 }
 0x129   : > { %v1019_v0 = vmax.f32 %v854_v56, %v858_v58  ;;  %v1203_v1 = vadd.f32 %v858_v58, %v854_v56  ;;  %v1093_v2 = vmax.f32 %v856_v57, %v860_v59  ;;  %v1277_v3 = vadd.f32 %v860_v59, %v856_v57  ;;  %v511_v4 = vpop.f32.mrb[4].mxu0  ;;  %v704_v5 = vpop.f32.mrb[4].mxu1 }
 0x12a   : > { %v512_v6 = vadd.f32 %v511_v4, %v1902_v32  ;;  %v705_v7 = vadd.f32 %v704_v5, %v1904_v33  ;;  %v513_v8 = vpop.f32.mrb[5].mxu0  ;;  %v706_v9 = vpop.f32.mrb[5].mxu1 }
 0x12b   : > { %v514_v10 = vadd.f32 %v513_v8, %v1906_v34  ;;  %v707_v11 = vadd.f32 %v706_v9, %v1908_v35  ;;  %v515_v12 = vpop.f32.mrb[6].mxu0  ;;  %v708_v13 = vpop.f32.mrb[6].mxu1 }
 0x12c   : > { %v861_v14 = vmax.f32 %v512_v6, 0.0  ;;  %v863_v15 = vmax.f32 %v705_v7, 0.0  ;;  %v516_v16 = vadd.f32 %v515_v12, %v1902_v32  ;;  %v709_v17 = vadd.f32 %v708_v13, %v1904_v33  ;;  %v517_v18 = vpop.f32.mrb[7].mxu0  ;;  %v710_v19 = vpop.f32.mrb[7].mxu1 }
 0x12d   : > { %v862_v20 = vmax.f32 %v514_v10, 0.0  ;;  %v864_v21 = vmax.f32 %v707_v11, 0.0  ;;  %v518_v22 = vadd.f32 %v517_v18, %v1906_v34  ;;  %v711_v23 = vadd.f32 %v710_v19, %v1908_v35 }
 0x12e   : > { %v983_v24 = vmax.f32 %v982_v60, %v861_v14  ;;  %v1167_v27 = vadd.f32 %v1166_v61, %v861_v14  ;;  %v1057_v28 = vmax.f32 %v1056_v62, %v863_v15  ;;  %v1241_v29 = vadd.f32 %v1240_v63, %v863_v15 }
 0x12f   : > { %v1020_v30 = vmax.f32 %v1019_v0, %v862_v20  ;;  %v1204_v31 = vadd.f32 %v1203_v1, %v862_v20  ;;  %v1094_v36 = vmax.f32 %v1093_v2, %v864_v21  ;;  %v1278_v37 = vadd.f32 %v1277_v3, %v864_v21 }
 0x130   : > { %v865_v38 = vmax.f32 %v516_v16, 0.0  ;;  %v867_v39 = vmax.f32 %v709_v17, 0.0  ;;  %v866_v40 = vmax.f32 %v518_v22, 0.0  ;;  %v868_v41 = vmax.f32 %v711_v23, 0.0 }
 0x131   : > { %v521_v42 = vpop.f32.mrb[8].mxu0  ;;  %v714_v43 = vpop.f32.mrb[8].mxu1 }
 0x132   : > { %v984_v45 = vmax.f32 %v983_v24, %v865_v38  ;;  %v1168_v46 = vadd.f32 %v1167_v27, %v865_v38  ;;  %v1058_v47 = vmax.f32 %v1057_v28, %v867_v39  ;;  %v1242_v48 = vadd.f32 %v1241_v29, %v867_v39  ;;  %v523_v49 = vpop.f32.mrb[9].mxu0  ;;  %v716_v50 = vpop.f32.mrb[9].mxu1 }
 0x133   : > { %v1021_v52 = vmax.f32 %v1020_v30, %v866_v40  ;;  %v1205_v53 = vadd.f32 %v1204_v31, %v866_v40  ;;  %v1095_v54 = vmax.f32 %v1094_v36, %v868_v41  ;;  %v1279_v55 = vadd.f32 %v1278_v37, %v868_v41  ;;  %v525_v56 = vpop.f32.mrb[10].mxu0  ;;  %v718_v57 = vpop.f32.mrb[10].mxu1 }
 0x134   : > { %v522_v25 = vadd.f32 %v521_v42, %v1902_v32  ;;  %v715_v58 = vadd.f32 %v714_v43, %v1904_v33  ;;  %v524_v59 = vadd.f32 %v523_v49, %v1906_v34  ;;  %v717_v60 = vadd.f32 %v716_v50, %v1908_v35  ;;  %v527_v61 = vpop.f32.mrb[11].mxu0  ;;  %v720_v62 = vpop.f32.mrb[11].mxu1 }
 0x135   : > { %v526_v63 = vadd.f32 %v525_v56, %v1902_v32  ;;  %v719_v0 = vadd.f32 %v718_v57, %v1904_v33  ;;  %v528_v1 = vadd.f32 %v527_v61, %v1906_v34  ;;  %v721_v2 = vadd.f32 %v720_v62, %v1908_v35 }
 0x136   : > { %v869_v3 = vmax.f32 %v522_v25, 0.0  ;;  %v871_v4 = vmax.f32 %v715_v58, 0.0  ;;  %v870_v5 = vmax.f32 %v524_v59, 0.0  ;;  %v872_v6 = vmax.f32 %v717_v60, 0.0 }
 0x137   : > { %v873_v7 = vmax.f32 %v526_v63, 0.0  ;;  %v875_v8 = vmax.f32 %v719_v0, 0.0  ;;  %v874_v9 = vmax.f32 %v528_v1, 0.0  ;;  %v876_v10 = vmax.f32 %v721_v2, 0.0 }
 0x138   : > { %v985_v11 = vmax.f32 %v984_v45, %v869_v3  ;;  %v1169_v12 = vadd.f32 %v1168_v46, %v869_v3  ;;  %v1059_v13 = vmax.f32 %v1058_v47, %v871_v4  ;;  %v1243_v14 = vadd.f32 %v1242_v48, %v871_v4 }
 0x139   : > { %v1022_v15 = vmax.f32 %v1021_v52, %v870_v5  ;;  %v1206_v16 = vadd.f32 %v1205_v53, %v870_v5  ;;  %v1096_v17 = vmax.f32 %v1095_v54, %v872_v6  ;;  %v1280_v18 = vadd.f32 %v1279_v55, %v872_v6  ;;  %v531_v19 = vpop.f32.mrb[12].mxu0  ;;  %v724_v20 = vpop.f32.mrb[12].mxu1 }
 0x13a   : > { %v986_v21 = vmax.f32 %v985_v11, %v873_v7  ;;  %v1170_v22 = vadd.f32 %v1169_v12, %v873_v7  ;;  %v1060_v23 = vmax.f32 %v1059_v13, %v875_v8  ;;  %v1244_v24 = vadd.f32 %v1243_v14, %v875_v8  ;;  %v533_v27 = vpop.f32.mrb[13].mxu0  ;;  %v726_v28 = vpop.f32.mrb[13].mxu1 }
 0x13b   : > { %v1023_v29 = vmax.f32 %v1022_v15, %v874_v9  ;;  %v1207_v30 = vadd.f32 %v1206_v16, %v874_v9  ;;  %v1097_v31 = vmax.f32 %v1096_v17, %v876_v10  ;;  %v1281_v36 = vadd.f32 %v1280_v18, %v876_v10  ;;  %v535_v37 = vpop.f32.mrb[14].mxu0  ;;  %v728_v38 = vpop.f32.mrb[14].mxu1 }
 0x13c   : > { %v532_v39 = vadd.f32 %v531_v19, %v1902_v32  ;;  %v725_v40 = vadd.f32 %v724_v20, %v1904_v33  ;;  %v534_v41 = vadd.f32 %v533_v27, %v1906_v34  ;;  %v727_v42 = vadd.f32 %v726_v28, %v1908_v35  ;;  %v537_v43 = vpop.f32.mrb[15].mxu0  ;;  %v730_v45 = vpop.f32.mrb[15].mxu1 }
 0x13d   : > { %v536_v46 = vadd.f32 %v535_v37, %v1902_v32  ;;  %v729_v47 = vadd.f32 %v728_v38, %v1904_v33  ;;  %v538_v48 = vadd.f32 %v537_v43, %v1906_v34  ;;  %v731_v49 = vadd.f32 %v730_v45, %v1908_v35 }
 0x13e   : > { %v877_v50 = vmax.f32 %v532_v39, 0.0  ;;  %v879_v51 = vmax.f32 %v725_v40, 0.0  ;;  %v878_v52 = vmax.f32 %v534_v41, 0.0  ;;  %v880_v53 = vmax.f32 %v727_v42, 0.0 }
 0x13f   : > { %v881_v54 = vmax.f32 %v536_v46, 0.0  ;;  %v883_v55 = vmax.f32 %v729_v47, 0.0  ;;  %v882_v56 = vmax.f32 %v538_v48, 0.0  ;;  %v884_v57 = vmax.f32 %v731_v49, 0.0 }
 0x140   : > { %v987_v25 = vmax.f32 %v986_v21, %v877_v50  ;;  %v1171_v58 = vadd.f32 %v1170_v22, %v877_v50  ;;  %v1061_v59 = vmax.f32 %v1060_v23, %v879_v51  ;;  %v1245_v60 = vadd.f32 %v1244_v24, %v879_v51 }
 0x141   : > { %v1024_v61 = vmax.f32 %v1023_v29, %v878_v52  ;;  %v1208_v62 = vadd.f32 %v1207_v30, %v878_v52  ;;  %v1098_v63 = vmax.f32 %v1097_v31, %v880_v53  ;;  %v1282_v0 = vadd.f32 %v1281_v36, %v880_v53  ;;  %v541_v1 = vpop.f32.mrb[16].mxu0  ;;  %v734_v2 = vpop.f32.mrb[16].mxu1 }
 0x142   : > { %v988_v3 = vmax.f32 %v987_v25, %v881_v54  ;;  %v1172_v4 = vadd.f32 %v1171_v58, %v881_v54  ;;  %v1062_v5 = vmax.f32 %v1061_v59, %v883_v55  ;;  %v1246_v6 = vadd.f32 %v1245_v60, %v883_v55  ;;  %v543_v7 = vpop.f32.mrb[17].mxu0  ;;  %v736_v8 = vpop.f32.mrb[17].mxu1 }
 0x143   : > { %v1025_v9 = vmax.f32 %v1024_v61, %v882_v56  ;;  %v1209_v10 = vadd.f32 %v1208_v62, %v882_v56  ;;  %v1099_v11 = vmax.f32 %v1098_v63, %v884_v57  ;;  %v1283_v12 = vadd.f32 %v1282_v0, %v884_v57  ;;  %v545_v13 = vpop.f32.mrb[18].mxu0  ;;  %v738_v14 = vpop.f32.mrb[18].mxu1 }
 0x144   : > { %v542_v15 = vadd.f32 %v541_v1, %v1902_v32  ;;  %v735_v16 = vadd.f32 %v734_v2, %v1904_v33  ;;  %v544_v17 = vadd.f32 %v543_v7, %v1906_v34  ;;  %v737_v18 = vadd.f32 %v736_v8, %v1908_v35  ;;  %v547_v19 = vpop.f32.mrb[19].mxu0  ;;  %v740_v20 = vpop.f32.mrb[19].mxu1 }
 0x145   : > { %v546_v21 = vadd.f32 %v545_v13, %v1902_v32  ;;  %v739_v22 = vadd.f32 %v738_v14, %v1904_v33  ;;  %v548_v23 = vadd.f32 %v547_v19, %v1906_v34  ;;  %v741_v24 = vadd.f32 %v740_v20, %v1908_v35 }
 0x146   : > { %v885_v27 = vmax.f32 %v542_v15, 0.0  ;;  %v887_v28 = vmax.f32 %v735_v16, 0.0  ;;  %v886_v29 = vmax.f32 %v544_v17, 0.0  ;;  %v888_v30 = vmax.f32 %v737_v18, 0.0 }
 0x147   : > { %v889_v31 = vmax.f32 %v546_v21, 0.0  ;;  %v891_v36 = vmax.f32 %v739_v22, 0.0  ;;  %v890_v37 = vmax.f32 %v548_v23, 0.0  ;;  %v892_v38 = vmax.f32 %v741_v24, 0.0 }
 0x148   : > { %v989_v39 = vmax.f32 %v988_v3, %v885_v27  ;;  %v1173_v40 = vadd.f32 %v1172_v4, %v885_v27  ;;  %v1063_v41 = vmax.f32 %v1062_v5, %v887_v28  ;;  %v1247_v42 = vadd.f32 %v1246_v6, %v887_v28 }
 0x149   : > { %v1026_v43 = vmax.f32 %v1025_v9, %v886_v29  ;;  %v1210_v45 = vadd.f32 %v1209_v10, %v886_v29  ;;  %v1100_v46 = vmax.f32 %v1099_v11, %v888_v30  ;;  %v1284_v47 = vadd.f32 %v1283_v12, %v888_v30  ;;  %v551_v48 = vpop.f32.mrb[20].mxu0  ;;  %v744_v49 = vpop.f32.mrb[20].mxu1 }
 0x14a   : > { %v990_v50 = vmax.f32 %v989_v39, %v889_v31  ;;  %v1174_v51 = vadd.f32 %v1173_v40, %v889_v31  ;;  %v1064_v52 = vmax.f32 %v1063_v41, %v891_v36  ;;  %v1248_v53 = vadd.f32 %v1247_v42, %v891_v36  ;;  %v553_v54 = vpop.f32.mrb[21].mxu0  ;;  %v746_v55 = vpop.f32.mrb[21].mxu1 }
 0x14b   : > { %v1027_v56 = vmax.f32 %v1026_v43, %v890_v37  ;;  %v1211_v57 = vadd.f32 %v1210_v45, %v890_v37  ;;  %v1101_v25 = vmax.f32 %v1100_v46, %v892_v38  ;;  %v1285_v58 = vadd.f32 %v1284_v47, %v892_v38  ;;  %v555_v59 = vpop.f32.mrb[22].mxu0  ;;  %v748_v60 = vpop.f32.mrb[22].mxu1 }
 0x14c   : > { %v552_v61 = vadd.f32 %v551_v48, %v1902_v32  ;;  %v745_v62 = vadd.f32 %v744_v49, %v1904_v33  ;;  %v554_v63 = vadd.f32 %v553_v54, %v1906_v34  ;;  %v747_v0 = vadd.f32 %v746_v55, %v1908_v35  ;;  %v557_v1 = vpop.f32.mrb[23].mxu0  ;;  %v750_v2 = vpop.f32.mrb[23].mxu1 }
 0x14d   : > { %v556_v3 = vadd.f32 %v555_v59, %v1902_v32  ;;  %v749_v4 = vadd.f32 %v748_v60, %v1904_v33  ;;  %v558_v5 = vadd.f32 %v557_v1, %v1906_v34  ;;  %v751_v6 = vadd.f32 %v750_v2, %v1908_v35 }
 0x14e   : > { %v893_v7 = vmax.f32 %v552_v61, 0.0  ;;  %v895_v8 = vmax.f32 %v745_v62, 0.0  ;;  %v894_v9 = vmax.f32 %v554_v63, 0.0  ;;  %v896_v10 = vmax.f32 %v747_v0, 0.0 }
 0x14f   : > { %v897_v11 = vmax.f32 %v556_v3, 0.0  ;;  %v899_v12 = vmax.f32 %v749_v4, 0.0  ;;  %v898_v13 = vmax.f32 %v558_v5, 0.0  ;;  %v900_v14 = vmax.f32 %v751_v6, 0.0 }
 0x150   : > { %v991_v15 = vmax.f32 %v990_v50, %v893_v7  ;;  %v1175_v16 = vadd.f32 %v1174_v51, %v893_v7  ;;  %v1065_v17 = vmax.f32 %v1064_v52, %v895_v8  ;;  %v1249_v18 = vadd.f32 %v1248_v53, %v895_v8 }
 0x151   : > { %v1028_v19 = vmax.f32 %v1027_v56, %v894_v9  ;;  %v1212_v20 = vadd.f32 %v1211_v57, %v894_v9  ;;  %v1102_v21 = vmax.f32 %v1101_v25, %v896_v10  ;;  %v1286_v22 = vadd.f32 %v1285_v58, %v896_v10  ;;  %v561_v23 = vpop.f32.mrb[24].mxu0  ;;  %v754_v24 = vpop.f32.mrb[24].mxu1 }
 0x152   : > { %v992_v27 = vmax.f32 %v991_v15, %v897_v11  ;;  %v1176_v28 = vadd.f32 %v1175_v16, %v897_v11  ;;  %v1066_v29 = vmax.f32 %v1065_v17, %v899_v12  ;;  %v1250_v30 = vadd.f32 %v1249_v18, %v899_v12  ;;  %v563_v31 = vpop.f32.mrb[25].mxu0  ;;  %v756_v36 = vpop.f32.mrb[25].mxu1 }
 0x153   : > { %v1029_v37 = vmax.f32 %v1028_v19, %v898_v13  ;;  %v1213_v38 = vadd.f32 %v1212_v20, %v898_v13  ;;  %v1103_v39 = vmax.f32 %v1102_v21, %v900_v14  ;;  %v1287_v40 = vadd.f32 %v1286_v22, %v900_v14  ;;  %v565_v41 = vpop.f32.mrb[26].mxu0  ;;  %v758_v42 = vpop.f32.mrb[26].mxu1 }
 0x154   : > { %v562_v43 = vadd.f32 %v561_v23, %v1902_v32  ;;  %v755_v45 = vadd.f32 %v754_v24, %v1904_v33  ;;  %v564_v46 = vadd.f32 %v563_v31, %v1906_v34  ;;  %v757_v47 = vadd.f32 %v756_v36, %v1908_v35  ;;  %v567_v48 = vpop.f32.mrb[27].mxu0  ;;  %v760_v49 = vpop.f32.mrb[27].mxu1 }
 0x155   : > { %v566_v50 = vadd.f32 %v565_v41, %v1902_v32  ;;  %v759_v51 = vadd.f32 %v758_v42, %v1904_v33  ;;  %v568_v52 = vadd.f32 %v567_v48, %v1906_v34  ;;  %v761_v53 = vadd.f32 %v760_v49, %v1908_v35 }
 0x156   : > { %v901_v54 = vmax.f32 %v562_v43, 0.0  ;;  %v903_v55 = vmax.f32 %v755_v45, 0.0  ;;  %v902_v56 = vmax.f32 %v564_v46, 0.0  ;;  %v904_v57 = vmax.f32 %v757_v47, 0.0 }
 0x157   : > { %v905_v25 = vmax.f32 %v566_v50, 0.0  ;;  %v907_v58 = vmax.f32 %v759_v51, 0.0  ;;  %v906_v59 = vmax.f32 %v568_v52, 0.0  ;;  %v908_v60 = vmax.f32 %v761_v53, 0.0 }
 0x158   : > { %v993_v61 = vmax.f32 %v992_v27, %v901_v54  ;;  %v1177_v62 = vadd.f32 %v1176_v28, %v901_v54  ;;  %v1067_v63 = vmax.f32 %v1066_v29, %v903_v55  ;;  %v1251_v0 = vadd.f32 %v1250_v30, %v903_v55 }
 0x159   : > { %v1030_v1 = vmax.f32 %v1029_v37, %v902_v56  ;;  %v1214_v2 = vadd.f32 %v1213_v38, %v902_v56  ;;  %v1104_v3 = vmax.f32 %v1103_v39, %v904_v57  ;;  %v1288_v4 = vadd.f32 %v1287_v40, %v904_v57  ;;  %v571_v5 = vpop.f32.mrb[28].mxu0  ;;  %v764_v6 = vpop.f32.mrb[28].mxu1 }
 0x15a   : > { %v994_v7 = vmax.f32 %v993_v61, %v905_v25  ;;  %v1178_v8 = vadd.f32 %v1177_v62, %v905_v25  ;;  %v1068_v9 = vmax.f32 %v1067_v63, %v907_v58  ;;  %v1252_v10 = vadd.f32 %v1251_v0, %v907_v58  ;;  %v573_v11 = vpop.f32.mrb[29].mxu0  ;;  %v766_v12 = vpop.f32.mrb[29].mxu1 }
 0x15b   : > { %v1031_v13 = vmax.f32 %v1030_v1, %v906_v59  ;;  %v1215_v14 = vadd.f32 %v1214_v2, %v906_v59  ;;  %v1105_v15 = vmax.f32 %v1104_v3, %v908_v60  ;;  %v1289_v16 = vadd.f32 %v1288_v4, %v908_v60  ;;  %v575_v17 = vpop.f32.mrb[30].mxu0  ;;  %v768_v18 = vpop.f32.mrb[30].mxu1 }
 0x15c   : > { %v572_v19 = vadd.f32 %v571_v5, %v1902_v32  ;;  %v765_v20 = vadd.f32 %v764_v6, %v1904_v33  ;;  %v574_v21 = vadd.f32 %v573_v11, %v1906_v34  ;;  %v767_v22 = vadd.f32 %v766_v12, %v1908_v35  ;;  %v577_v23 = vpop.f32.mrb[31].mxu0  ;;  %v770_v24 = vpop.f32.mrb[31].mxu1 }
 0x15d   : > { %v576_v27 = vadd.f32 %v575_v17, %v1902_v32  ;;  %v769_v28 = vadd.f32 %v768_v18, %v1904_v33  ;;  %v578_v29 = vadd.f32 %v577_v23, %v1906_v34  ;;  %v771_v30 = vadd.f32 %v770_v24, %v1908_v35 }
 0x15e   : > { %v909_v31 = vmax.f32 %v572_v19, 0.0  ;;  %v911_v36 = vmax.f32 %v765_v20, 0.0  ;;  %v910_v37 = vmax.f32 %v574_v21, 0.0  ;;  %v912_v38 = vmax.f32 %v767_v22, 0.0 }
 0x15f   : > { %v913_v39 = vmax.f32 %v576_v27, 0.0  ;;  %v915_v40 = vmax.f32 %v769_v28, 0.0  ;;  %v914_v41 = vmax.f32 %v578_v29, 0.0  ;;  %v916_v42 = vmax.f32 %v771_v30, 0.0 }
 0x160   : > { %v995_v43 = vmax.f32 %v994_v7, %v909_v31  ;;  %v1179_v45 = vadd.f32 %v1178_v8, %v909_v31  ;;  %v1069_v46 = vmax.f32 %v1068_v9, %v911_v36  ;;  %v1253_v47 = vadd.f32 %v1252_v10, %v911_v36 }
 0x161   : > { %v1032_v48 = vmax.f32 %v1031_v13, %v910_v37  ;;  %v1216_v49 = vadd.f32 %v1215_v14, %v910_v37  ;;  %v1106_v50 = vmax.f32 %v1105_v15, %v912_v38  ;;  %v1290_v51 = vadd.f32 %v1289_v16, %v912_v38  ;;  %v581_v52 = vpop.f32.mrb[32].mxu0  ;;  %v774_v53 = vpop.f32.mrb[32].mxu1 }
 0x162   : > { %v996_v54 = vmax.f32 %v995_v43, %v913_v39  ;;  %v1180_v55 = vadd.f32 %v1179_v45, %v913_v39  ;;  %v1070_v56 = vmax.f32 %v1069_v46, %v915_v40  ;;  %v1254_v57 = vadd.f32 %v1253_v47, %v915_v40  ;;  %v583_v25 = vpop.f32.mrb[33].mxu0  ;;  %v776_v58 = vpop.f32.mrb[33].mxu1 }
 0x163   : > { %v1033_v59 = vmax.f32 %v1032_v48, %v914_v41  ;;  %v1217_v60 = vadd.f32 %v1216_v49, %v914_v41  ;;  %v1107_v61 = vmax.f32 %v1106_v50, %v916_v42  ;;  %v1291_v62 = vadd.f32 %v1290_v51, %v916_v42  ;;  %v585_v63 = vpop.f32.mrb[34].mxu0  ;;  %v778_v0 = vpop.f32.mrb[34].mxu1 }
 0x164   : > { %v582_v1 = vadd.f32 %v581_v52, %v1902_v32  ;;  %v775_v2 = vadd.f32 %v774_v53, %v1904_v33  ;;  %v584_v3 = vadd.f32 %v583_v25, %v1906_v34  ;;  %v777_v4 = vadd.f32 %v776_v58, %v1908_v35  ;;  %v587_v5 = vpop.f32.mrb[35].mxu0  ;;  %v780_v6 = vpop.f32.mrb[35].mxu1 }
 0x165   : > { %v586_v7 = vadd.f32 %v585_v63, %v1902_v32  ;;  %v779_v8 = vadd.f32 %v778_v0, %v1904_v33  ;;  %v588_v9 = vadd.f32 %v587_v5, %v1906_v34  ;;  %v781_v10 = vadd.f32 %v780_v6, %v1908_v35 }
 0x166   : > { %v917_v11 = vmax.f32 %v582_v1, 0.0  ;;  %v919_v12 = vmax.f32 %v775_v2, 0.0  ;;  %v918_v13 = vmax.f32 %v584_v3, 0.0  ;;  %v920_v14 = vmax.f32 %v777_v4, 0.0 }
 0x167   : > { %v921_v15 = vmax.f32 %v586_v7, 0.0  ;;  %v923_v16 = vmax.f32 %v779_v8, 0.0  ;;  %v922_v17 = vmax.f32 %v588_v9, 0.0  ;;  %v924_v18 = vmax.f32 %v781_v10, 0.0 }
 0x168   : > { %v997_v19 = vmax.f32 %v996_v54, %v917_v11  ;;  %v1181_v20 = vadd.f32 %v1180_v55, %v917_v11  ;;  %v1071_v21 = vmax.f32 %v1070_v56, %v919_v12  ;;  %v1255_v22 = vadd.f32 %v1254_v57, %v919_v12 }
 0x169   : > { %v1034_v23 = vmax.f32 %v1033_v59, %v918_v13  ;;  %v1218_v24 = vadd.f32 %v1217_v60, %v918_v13  ;;  %v1108_v27 = vmax.f32 %v1107_v61, %v920_v14  ;;  %v1292_v28 = vadd.f32 %v1291_v62, %v920_v14  ;;  %v591_v29 = vpop.f32.mrb[36].mxu0  ;;  %v784_v30 = vpop.f32.mrb[36].mxu1 }
 0x16a   : > { %v998_v31 = vmax.f32 %v997_v19, %v921_v15  ;;  %v1182_v36 = vadd.f32 %v1181_v20, %v921_v15  ;;  %v1072_v37 = vmax.f32 %v1071_v21, %v923_v16  ;;  %v1256_v38 = vadd.f32 %v1255_v22, %v923_v16  ;;  %v593_v39 = vpop.f32.mrb[37].mxu0  ;;  %v786_v40 = vpop.f32.mrb[37].mxu1 }
 0x16b   : > { %v1035_v41 = vmax.f32 %v1034_v23, %v922_v17  ;;  %v1219_v42 = vadd.f32 %v1218_v24, %v922_v17  ;;  %v1109_v43 = vmax.f32 %v1108_v27, %v924_v18  ;;  %v1293_v45 = vadd.f32 %v1292_v28, %v924_v18  ;;  %v595_v46 = vpop.f32.mrb[38].mxu0  ;;  %v788_v47 = vpop.f32.mrb[38].mxu1 }
 0x16c   : > { %v592_v48 = vadd.f32 %v591_v29, %v1902_v32  ;;  %v785_v49 = vadd.f32 %v784_v30, %v1904_v33  ;;  %v594_v50 = vadd.f32 %v593_v39, %v1906_v34  ;;  %v787_v51 = vadd.f32 %v786_v40, %v1908_v35  ;;  %v597_v52 = vpop.f32.mrb[39].mxu0  ;;  %v790_v53 = vpop.f32.mrb[39].mxu1 }
 0x16d   : > { %v596_v54 = vadd.f32 %v595_v46, %v1902_v32  ;;  %v789_v55 = vadd.f32 %v788_v47, %v1904_v33  ;;  %v598_v56 = vadd.f32 %v597_v52, %v1906_v34  ;;  %v791_v57 = vadd.f32 %v790_v53, %v1908_v35 }
 0x16e   : > { %v925_v25 = vmax.f32 %v592_v48, 0.0  ;;  %v927_v58 = vmax.f32 %v785_v49, 0.0  ;;  %v926_v59 = vmax.f32 %v594_v50, 0.0  ;;  %v928_v60 = vmax.f32 %v787_v51, 0.0 }
 0x16f   : > { %v929_v61 = vmax.f32 %v596_v54, 0.0  ;;  %v931_v62 = vmax.f32 %v789_v55, 0.0  ;;  %v930_v63 = vmax.f32 %v598_v56, 0.0  ;;  %v932_v0 = vmax.f32 %v791_v57, 0.0 }
 0x170   : > { %v999_v1 = vmax.f32 %v998_v31, %v925_v25  ;;  %v1183_v2 = vadd.f32 %v1182_v36, %v925_v25  ;;  %v1073_v3 = vmax.f32 %v1072_v37, %v927_v58  ;;  %v1257_v4 = vadd.f32 %v1256_v38, %v927_v58 }
 0x171   : > { %v1036_v5 = vmax.f32 %v1035_v41, %v926_v59  ;;  %v1220_v6 = vadd.f32 %v1219_v42, %v926_v59  ;;  %v1110_v7 = vmax.f32 %v1109_v43, %v928_v60  ;;  %v1294_v8 = vadd.f32 %v1293_v45, %v928_v60  ;;  %v601_v9 = vpop.f32.mrb[40].mxu0  ;;  %v794_v10 = vpop.f32.mrb[40].mxu1 }
 0x172   : > { %v1000_v11 = vmax.f32 %v999_v1, %v929_v61  ;;  %v1184_v12 = vadd.f32 %v1183_v2, %v929_v61  ;;  %v1074_v13 = vmax.f32 %v1073_v3, %v931_v62  ;;  %v1258_v14 = vadd.f32 %v1257_v4, %v931_v62  ;;  %v603_v15 = vpop.f32.mrb[41].mxu0  ;;  %v796_v16 = vpop.f32.mrb[41].mxu1 }
 0x173   : > { %v1037_v17 = vmax.f32 %v1036_v5, %v930_v63  ;;  %v1221_v18 = vadd.f32 %v1220_v6, %v930_v63  ;;  %v1111_v19 = vmax.f32 %v1110_v7, %v932_v0  ;;  %v1295_v20 = vadd.f32 %v1294_v8, %v932_v0  ;;  %v605_v21 = vpop.f32.mrb[42].mxu0  ;;  %v798_v22 = vpop.f32.mrb[42].mxu1 }
 0x174   : > { %v602_v23 = vadd.f32 %v601_v9, %v1902_v32  ;;  %v795_v24 = vadd.f32 %v794_v10, %v1904_v33  ;;  %v604_v27 = vadd.f32 %v603_v15, %v1906_v34  ;;  %v797_v28 = vadd.f32 %v796_v16, %v1908_v35  ;;  %v607_v29 = vpop.f32.mrb[43].mxu0  ;;  %v800_v30 = vpop.f32.mrb[43].mxu1 }
 0x175   : > { %v606_v31 = vadd.f32 %v605_v21, %v1902_v32  ;;  %v799_v36 = vadd.f32 %v798_v22, %v1904_v33  ;;  %v608_v37 = vadd.f32 %v607_v29, %v1906_v34  ;;  %v801_v38 = vadd.f32 %v800_v30, %v1908_v35 }
 0x176   : > { %v933_v39 = vmax.f32 %v602_v23, 0.0  ;;  %v935_v40 = vmax.f32 %v795_v24, 0.0  ;;  %v934_v41 = vmax.f32 %v604_v27, 0.0  ;;  %v936_v42 = vmax.f32 %v797_v28, 0.0 }
 0x177   : > { %v937_v43 = vmax.f32 %v606_v31, 0.0  ;;  %v939_v45 = vmax.f32 %v799_v36, 0.0  ;;  %v938_v46 = vmax.f32 %v608_v37, 0.0  ;;  %v940_v47 = vmax.f32 %v801_v38, 0.0 }
 0x178   : > { %v1001_v48 = vmax.f32 %v1000_v11, %v933_v39  ;;  %v1185_v49 = vadd.f32 %v1184_v12, %v933_v39  ;;  %v1075_v50 = vmax.f32 %v1074_v13, %v935_v40  ;;  %v1259_v51 = vadd.f32 %v1258_v14, %v935_v40 }
 0x179   : > { %v1038_v52 = vmax.f32 %v1037_v17, %v934_v41  ;;  %v1222_v53 = vadd.f32 %v1221_v18, %v934_v41  ;;  %v1112_v54 = vmax.f32 %v1111_v19, %v936_v42  ;;  %v1296_v55 = vadd.f32 %v1295_v20, %v936_v42  ;;  %v611_v56 = vpop.f32.mrb[44].mxu0  ;;  %v804_v57 = vpop.f32.mrb[44].mxu1 }
 0x17a   : > { %v1002_v25 = vmax.f32 %v1001_v48, %v937_v43  ;;  %v1186_v58 = vadd.f32 %v1185_v49, %v937_v43  ;;  %v1076_v59 = vmax.f32 %v1075_v50, %v939_v45  ;;  %v1260_v60 = vadd.f32 %v1259_v51, %v939_v45  ;;  %v613_v61 = vpop.f32.mrb[45].mxu0  ;;  %v806_v62 = vpop.f32.mrb[45].mxu1 }
 0x17b   : > { %v1039_v63 = vmax.f32 %v1038_v52, %v938_v46  ;;  %v1223_v0 = vadd.f32 %v1222_v53, %v938_v46  ;;  %v1113_v1 = vmax.f32 %v1112_v54, %v940_v47  ;;  %v1297_v2 = vadd.f32 %v1296_v55, %v940_v47  ;;  %v615_v3 = vpop.f32.mrb[46].mxu0  ;;  %v808_v4 = vpop.f32.mrb[46].mxu1 }
 0x17c   : > { %v612_v5 = vadd.f32 %v611_v56, %v1902_v32  ;;  %v805_v6 = vadd.f32 %v804_v57, %v1904_v33  ;;  %v614_v7 = vadd.f32 %v613_v61, %v1906_v34  ;;  %v807_v8 = vadd.f32 %v806_v62, %v1908_v35  ;;  %v617_v9 = vpop.f32.mrb[47].mxu0  ;;  %v810_v10 = vpop.f32.mrb[47].mxu1 }
 0x17d   : > { %v616_v11 = vadd.f32 %v615_v3, %v1902_v32  ;;  %v809_v12 = vadd.f32 %v808_v4, %v1904_v33  ;;  %v618_v13 = vadd.f32 %v617_v9, %v1906_v34  ;;  %v811_v14 = vadd.f32 %v810_v10, %v1908_v35 }
 0x17e   : > { %v941_v15 = vmax.f32 %v612_v5, 0.0  ;;  %v943_v16 = vmax.f32 %v805_v6, 0.0  ;;  %v942_v17 = vmax.f32 %v614_v7, 0.0  ;;  %v944_v18 = vmax.f32 %v807_v8, 0.0 }
 0x17f   : > { %v945_v19 = vmax.f32 %v616_v11, 0.0  ;;  %v947_v20 = vmax.f32 %v809_v12, 0.0  ;;  %v946_v21 = vmax.f32 %v618_v13, 0.0  ;;  %v948_v22 = vmax.f32 %v811_v14, 0.0 }
 0x180   : > { %v1003_v23 = vmax.f32 %v1002_v25, %v941_v15  ;;  %v1187_v24 = vadd.f32 %v1186_v58, %v941_v15  ;;  %v1077_v27 = vmax.f32 %v1076_v59, %v943_v16  ;;  %v1261_v28 = vadd.f32 %v1260_v60, %v943_v16 }
 0x181   : > { %v1040_v29 = vmax.f32 %v1039_v63, %v942_v17  ;;  %v1224_v30 = vadd.f32 %v1223_v0, %v942_v17  ;;  %v1114_v31 = vmax.f32 %v1113_v1, %v944_v18  ;;  %v1298_v36 = vadd.f32 %v1297_v2, %v944_v18  ;;  %v621_v37 = vpop.f32.mrb[48].mxu0  ;;  %v814_v38 = vpop.f32.mrb[48].mxu1 }
 0x182   : > { %v1004_v39 = vmax.f32 %v1003_v23, %v945_v19  ;;  %v1188_v40 = vadd.f32 %v1187_v24, %v945_v19  ;;  %v1078_v41 = vmax.f32 %v1077_v27, %v947_v20  ;;  %v1262_v42 = vadd.f32 %v1261_v28, %v947_v20  ;;  %v623_v43 = vpop.f32.mrb[49].mxu0  ;;  %v816_v45 = vpop.f32.mrb[49].mxu1 }
 0x183   : > { %v1041_v46 = vmax.f32 %v1040_v29, %v946_v21  ;;  %v1225_v47 = vadd.f32 %v1224_v30, %v946_v21  ;;  %v1115_v48 = vmax.f32 %v1114_v31, %v948_v22  ;;  %v1299_v49 = vadd.f32 %v1298_v36, %v948_v22  ;;  %v625_v50 = vpop.f32.mrb[50].mxu0  ;;  %v818_v51 = vpop.f32.mrb[50].mxu1 }
 0x184   : > { %v622_v52 = vadd.f32 %v621_v37, %v1902_v32  ;;  %v815_v53 = vadd.f32 %v814_v38, %v1904_v33  ;;  %v624_v54 = vadd.f32 %v623_v43, %v1906_v34  ;;  %v817_v55 = vadd.f32 %v816_v45, %v1908_v35  ;;  %v627_v56 = vpop.f32.mrb[51].mxu0  ;;  %v820_v57 = vpop.f32.mrb[51].mxu1 }
 0x185   : > { %v626_v25 = vadd.f32 %v625_v50, %v1902_v32  ;;  %v819_v58 = vadd.f32 %v818_v51, %v1904_v33  ;;  %v628_v59 = vadd.f32 %v627_v56, %v1906_v34  ;;  %v821_v60 = vadd.f32 %v820_v57, %v1908_v35 }
 0x186   : > { %v949_v61 = vmax.f32 %v622_v52, 0.0  ;;  %v951_v62 = vmax.f32 %v815_v53, 0.0  ;;  %v950_v63 = vmax.f32 %v624_v54, 0.0  ;;  %v952_v0 = vmax.f32 %v817_v55, 0.0 }
 0x187   : > { %v953_v1 = vmax.f32 %v626_v25, 0.0  ;;  %v955_v2 = vmax.f32 %v819_v58, 0.0  ;;  %v954_v3 = vmax.f32 %v628_v59, 0.0  ;;  %v956_v4 = vmax.f32 %v821_v60, 0.0 }
 0x188   : > { %v1005_v5 = vmax.f32 %v1004_v39, %v949_v61  ;;  %v1189_v6 = vadd.f32 %v1188_v40, %v949_v61  ;;  %v1079_v7 = vmax.f32 %v1078_v41, %v951_v62  ;;  %v1263_v8 = vadd.f32 %v1262_v42, %v951_v62 }
 0x189   : > { %v1042_v9 = vmax.f32 %v1041_v46, %v950_v63  ;;  %v1226_v10 = vadd.f32 %v1225_v47, %v950_v63  ;;  %v1116_v11 = vmax.f32 %v1115_v48, %v952_v0  ;;  %v1300_v12 = vadd.f32 %v1299_v49, %v952_v0  ;;  %v631_v13 = vpop.f32.mrb[52].mxu0  ;;  %v824_v14 = vpop.f32.mrb[52].mxu1 }
 0x18a   : > { %v1006_v15 = vmax.f32 %v1005_v5, %v953_v1  ;;  %v1190_v16 = vadd.f32 %v1189_v6, %v953_v1  ;;  %v1080_v17 = vmax.f32 %v1079_v7, %v955_v2  ;;  %v1264_v18 = vadd.f32 %v1263_v8, %v955_v2  ;;  %v633_v19 = vpop.f32.mrb[53].mxu0  ;;  %v826_v20 = vpop.f32.mrb[53].mxu1 }
 0x18b   : > { %v1043_v21 = vmax.f32 %v1042_v9, %v954_v3  ;;  %v1227_v22 = vadd.f32 %v1226_v10, %v954_v3  ;;  %v1117_v23 = vmax.f32 %v1116_v11, %v956_v4  ;;  %v1301_v24 = vadd.f32 %v1300_v12, %v956_v4  ;;  %v635_v27 = vpop.f32.mrb[54].mxu0  ;;  %v828_v28 = vpop.f32.mrb[54].mxu1 }
 0x18c   : > { %v632_v29 = vadd.f32 %v631_v13, %v1902_v32  ;;  %v825_v30 = vadd.f32 %v824_v14, %v1904_v33  ;;  %v634_v31 = vadd.f32 %v633_v19, %v1906_v34  ;;  %v827_v36 = vadd.f32 %v826_v20, %v1908_v35  ;;  %v637_v37 = vpop.f32.mrb[55].mxu0  ;;  %v830_v38 = vpop.f32.mrb[55].mxu1 }
 0x18d   : > { %v636_v39 = vadd.f32 %v635_v27, %v1902_v32  ;;  %v829_v40 = vadd.f32 %v828_v28, %v1904_v33  ;;  %v638_v41 = vadd.f32 %v637_v37, %v1906_v34  ;;  %v831_v42 = vadd.f32 %v830_v38, %v1908_v35 }
 0x18e   : > { %v957_v43 = vmax.f32 %v632_v29, 0.0  ;;  %v959_v45 = vmax.f32 %v825_v30, 0.0  ;;  %v958_v46 = vmax.f32 %v634_v31, 0.0  ;;  %v960_v47 = vmax.f32 %v827_v36, 0.0 }
 0x18f   : > { %v961_v48 = vmax.f32 %v636_v39, 0.0  ;;  %v963_v49 = vmax.f32 %v829_v40, 0.0  ;;  %v962_v50 = vmax.f32 %v638_v41, 0.0  ;;  %v964_v51 = vmax.f32 %v831_v42, 0.0 }
 0x190   : > { %v1007_v52 = vmax.f32 %v1006_v15, %v957_v43  ;;  %v1191_v53 = vadd.f32 %v1190_v16, %v957_v43  ;;  %v1081_v54 = vmax.f32 %v1080_v17, %v959_v45  ;;  %v1265_v55 = vadd.f32 %v1264_v18, %v959_v45 }
 0x191   : > { %v1044_v56 = vmax.f32 %v1043_v21, %v958_v46  ;;  %v1228_v57 = vadd.f32 %v1227_v22, %v958_v46  ;;  %v1118_v25 = vmax.f32 %v1117_v23, %v960_v47  ;;  %v1302_v58 = vadd.f32 %v1301_v24, %v960_v47  ;;  %v641_v59 = vpop.f32.mrb[56].mxu0  ;;  %v834_v60 = vpop.f32.mrb[56].mxu1 }
 0x192   : > { %v1008_v61 = vmax.f32 %v1007_v52, %v961_v48  ;;  %v1192_v62 = vadd.f32 %v1191_v53, %v961_v48  ;;  %v1082_v63 = vmax.f32 %v1081_v54, %v963_v49  ;;  %v1266_v0 = vadd.f32 %v1265_v55, %v963_v49  ;;  %v643_v1 = vpop.f32.mrb[57].mxu0  ;;  %v836_v2 = vpop.f32.mrb[57].mxu1 }
 0x193   : > { %v1045_v3 = vmax.f32 %v1044_v56, %v962_v50  ;;  %v1229_v4 = vadd.f32 %v1228_v57, %v962_v50  ;;  %v1119_v5 = vmax.f32 %v1118_v25, %v964_v51  ;;  %v1303_v6 = vadd.f32 %v1302_v58, %v964_v51  ;;  %v645_v7 = vpop.f32.mrb[58].mxu0  ;;  %v838_v8 = vpop.f32.mrb[58].mxu1 }
 0x194   : > { %v642_v9 = vadd.f32 %v641_v59, %v1902_v32  ;;  %v835_v10 = vadd.f32 %v834_v60, %v1904_v33  ;;  %v644_v11 = vadd.f32 %v643_v1, %v1906_v34  ;;  %v837_v12 = vadd.f32 %v836_v2, %v1908_v35  ;;  %v647_v13 = vpop.f32.mrb[59].mxu0  ;;  %v840_v14 = vpop.f32.mrb[59].mxu1 }
 0x195   : > { %v646_v15 = vadd.f32 %v645_v7, %v1902_v32  ;;  %v839_v16 = vadd.f32 %v838_v8, %v1904_v33  ;;  %v648_v17 = vadd.f32 %v647_v13, %v1906_v34  ;;  %v841_v18 = vadd.f32 %v840_v14, %v1908_v35 }
 0x196   : > { %v965_v19 = vmax.f32 %v642_v9, 0.0  ;;  %v967_v20 = vmax.f32 %v835_v10, 0.0  ;;  %v966_v21 = vmax.f32 %v644_v11, 0.0  ;;  %v968_v22 = vmax.f32 %v837_v12, 0.0 }
 0x197   : > { %v969_v23 = vmax.f32 %v646_v15, 0.0  ;;  %v971_v24 = vmax.f32 %v839_v16, 0.0  ;;  %v970_v27 = vmax.f32 %v648_v17, 0.0  ;;  %v972_v28 = vmax.f32 %v841_v18, 0.0 }
 0x198   : > { %v1009_v29 = vmax.f32 %v1008_v61, %v965_v19  ;;  %v1193_v30 = vadd.f32 %v1192_v62, %v965_v19  ;;  %v1083_v31 = vmax.f32 %v1082_v63, %v967_v20  ;;  %v1267_v36 = vadd.f32 %v1266_v0, %v967_v20 }
 0x199   : > { %v1046_v37 = vmax.f32 %v1045_v3, %v966_v21  ;;  %v1230_v38 = vadd.f32 %v1229_v4, %v966_v21  ;;  %v1120_v39 = vmax.f32 %v1119_v5, %v968_v22  ;;  %v1304_v40 = vadd.f32 %v1303_v6, %v968_v22  ;;  %v651_v41 = vpop.f32.mrb[60].mxu0  ;;  %v844_v42 = vpop.f32.mrb[60].mxu1 }
 0x19a   : > { %v1010_v43 = vmax.f32 %v1009_v29, %v969_v23  ;;  %v1194_v45 = vadd.f32 %v1193_v30, %v969_v23  ;;  %v1084_v46 = vmax.f32 %v1083_v31, %v971_v24  ;;  %v1268_v47 = vadd.f32 %v1267_v36, %v971_v24  ;;  %v653_v48 = vpop.f32.mrb[61].mxu0  ;;  %v846_v49 = vpop.f32.mrb[61].mxu1 }
 0x19b   : > { %v1047_v50 = vmax.f32 %v1046_v37, %v970_v27  ;;  %v1231_v51 = vadd.f32 %v1230_v38, %v970_v27  ;;  %v1121_v52 = vmax.f32 %v1120_v39, %v972_v28  ;;  %v1305_v53 = vadd.f32 %v1304_v40, %v972_v28  ;;  %v655_v54 = vpop.f32.mrb[62].mxu0  ;;  %v848_v55 = vpop.f32.mrb[62].mxu1 }
 0x19c   : > { %v652_v56 = vadd.f32 %v651_v41, %v1902_v32  ;;  %v845_v57 = vadd.f32 %v844_v42, %v1904_v33  ;;  %v654_v25 = vadd.f32 %v653_v48, %v1906_v34  ;;  %v847_v58 = vadd.f32 %v846_v49, %v1908_v35  ;;  %v657_v59 = vpop.f32.mrb[63].mxu0  ;;  %v850_v60 = vpop.f32.mrb[63].mxu1 }
 0x19d   : > { %v656_v61 = vadd.f32 %v655_v54, %v1902_v32  ;;  %v849_v62 = vadd.f32 %v848_v55, %v1904_v33  ;;  %v658_v63 = vadd.f32 %v657_v59, %v1906_v34  ;;  %v1687_v22 = vmov 0.0  }
 0x19e   : > { %v973_v0 = vmax.f32 %v652_v56, 0.0  ;;  %v975_v1 = vmax.f32 %v845_v57, 0.0  ;;  %v974_v2 = vmax.f32 %v654_v25, 0.0  ;;  %v976_v3 = vmax.f32 %v847_v58, 0.0  ;;  %235 = vst.msk [vmem:[#allocation3] sm:$0xf] %vm1927_vm1, %v1687_v22 }
 0x19f   : > { %v977_v4 = vmax.f32 %v656_v61, 0.0  ;;  %v979_v5 = vmax.f32 %v849_v62, 0.0  ;;  %v978_v6 = vmax.f32 %v658_v63, 0.0  ;;  %v851_v27 = vadd.f32 %v850_v60, %v1908_v35 }
 0x1a0   : > { %v1011_v7 = vmax.f32 %v1010_v43, %v973_v0  ;;  %v1195_v8 = vadd.f32 %v1194_v45, %v973_v0  ;;  %v1085_v9 = vmax.f32 %v1084_v46, %v975_v1  ;;  %v1269_v10 = vadd.f32 %v1268_v47, %v975_v1 }
 0x1a1   : > { %v1048_v11 = vmax.f32 %v1047_v50, %v974_v2  ;;  %v1232_v12 = vadd.f32 %v1231_v51, %v974_v2  ;;  %v1122_v13 = vmax.f32 %v1121_v52, %v976_v3  ;;  %v1306_v14 = vadd.f32 %v1305_v53, %v976_v3 }
 0x1a2   : > { %v1012_v32 = vmax.f32 %v1011_v7, %v977_v4  ;;  %v1196_v15 = vadd.f32 %v1195_v8, %v977_v4  ;;  %v1086_v33 = vmax.f32 %v1085_v9, %v979_v5  ;;  %v1270_v16 = vadd.f32 %v1269_v10, %v979_v5 }
 0x1a3   : > { %v1049_v34 = vmax.f32 %v1048_v11, %v978_v6  ;;  %v1233_v17 = vadd.f32 %v1232_v12, %v978_v6  ;;  %v1688_v37 = vmov 1966171168   ;;  %v980_v40 = vmax.f32 %v851_v27, 0.0 }
 0x1a4   : > { %v1013_v18 = vrot.slane %v1012_v32, 4  ;;  %v1197_v19 = vrot.slane %v1196_v15, 4  ;;  %v1087_v20 = vrot.slane %v1086_v33, 4  ;;  %v1271_v21 = vrot.slane %v1270_v16, 4 }
 0x1a5   : > { %v1050_v23 = vrot.slane %v1049_v34, 4  ;;  %v1234_v24 = vrot.slane %v1233_v17, 4  ;;  %v1137_v38 = vunpack.c.l.s4 %v1688_v37  ;;  %v1123_v48 = vmax.f32 %v1122_v13, %v980_v40 }
 0x1a6   : > { %v1014_v28 = vmax.f32 %v1012_v32, %v1013_v18  ;;  %v1198_v29 = vadd.f32 %v1197_v19, %v1196_v15  ;;  %v1088_v30 = vmax.f32 %v1086_v33, %v1087_v20  ;;  %v1272_v31 = vadd.f32 %v1271_v21, %v1270_v16 }
 0x1a7   : > { %v1051_v36 = vmax.f32 %v1049_v34, %v1050_v23  ;;  %v1235_v39 = vadd.f32 %v1234_v24, %v1233_v17  ;;  %v1307_v49 = vadd.f32 %v1306_v14, %v980_v40  ;;  %v1124_v55 = vrot.slane %v1123_v48, 4  ;;  %v981_v23 = vld [vmem:[#allocation2] sm:$0xf]  ;;  %v1165_v24 = vld [vmem:[#allocation3] sm:$0xf] }
 0x1a8   : > { %v1015_v41 = vrot.slane %v1014_v28, 2  ;;  %v1199_v42 = vrot.slane %v1198_v29, 2  ;;  %v1089_v43 = vrot.slane %v1088_v30, 2  ;;  %v1273_v45 = vrot.slane %v1272_v31, 2 }
 0x1a9   : > { %v1052_v46 = vrot.slane %v1051_v36, 2  ;;  %v1236_v47 = vrot.slane %v1235_v39, 2  ;;  %v1308_v56 = vrot.slane %v1307_v49, 4  ;;  %v1138_v58 = vunpack.c.0.s8 %v1137_v38 }
 0x1aa   : > { %v1016_v50 = vmax.f32 %v1014_v28, %v1015_v41  ;;  %v1200_v51 = vadd.f32 %v1199_v42, %v1198_v29  ;;  %v1090_v35 = vmax.f32 %v1088_v30, %v1089_v43  ;;  %v1274_v52 = vadd.f32 %v1273_v45, %v1272_v31 }
 0x1ab   : > { %v1053_v53 = vmax.f32 %v1051_v36, %v1052_v46  ;;  %v1237_v54 = vadd.f32 %v1236_v47, %v1235_v39  ;;  %v1125_v61 = vmax.f32 %v1123_v48, %v1124_v55  ;;  %v1309_v62 = vadd.f32 %v1308_v56, %v1307_v49 }
 0x1ac   : > { %v1017_v57 = vrot.slane %v1016_v50, 1  ;;  %v1201_v25 = vrot.slane %v1200_v51, 1  ;;  %v1091_v1 = vrot.slane %v1090_v35, 1  ;;  %v1275_v2 = vrot.slane %v1274_v52, 1 }
 0x1ad   : > { %v1054_v59 = vrot.slane %v1053_v53, 1  ;;  %v1238_v60 = vrot.slane %v1237_v54, 1  ;;  %v1126_v5 = vrot.slane %v1125_v61, 2  ;;  %v1310_v6 = vrot.slane %v1309_v62, 2 }
 0x1ae   : > { %v1018_v63 = vmax.f32 %v1016_v50, %v1017_v57  ;;  %v1202_v0 = vadd.f32 %v1201_v25, %v1200_v51  ;;  %v1141_v11 = vsub.s32 %v1138_v58, %v1896_v26  ;;  %v1092_v12 = vmax.f32 %v1090_v35, %v1091_v1 }
 0x1af   : > { %v1055_v3 = vmax.f32 %v1053_v53, %v1054_v59  ;;  %v1239_v4 = vadd.f32 %v1238_v60, %v1237_v54  ;;  %v1127_v9 = vmax.f32 %v1125_v61, %v1126_v5  ;;  %v1311_v10 = vadd.f32 %v1310_v6, %v1309_v62 }
 0x1b0   : > { %v1276_v13 = vadd.f32 %v1275_v2, %v1274_v52 }
 0x1b1   : > { %v1134_v7 = vcombine.low %v1018_v63, %v1055_v3  ;;  %v1318_v8 = vcombine.low %v1202_v0, %v1239_v4  ;;  %v1128_v14 = vrot.slane %v1127_v9, 1  ;;  %v1312_v32 = vrot.slane %v1311_v10, 1 }
 0x1b3   : > { %v1129_v15 = vmax.f32 %v1127_v9, %v1128_v14  ;;  %v1313_v33 = vadd.f32 %v1312_v32, %v1311_v10  ;;  %v1142_v16 = vrot.slane %v1134_v7, %v1141_v11  ;;  %v1326_v34 = vrot.slane %v1318_v8, %v1141_v11 }
 0x1b5   : > { %v1135_v17 = vcombine.low %v1092_v12, %v1129_v15  ;;  %v1319_v18 = vcombine.low %v1276_v13, %v1313_v33 }
 0x1b7   : > { %v1149_v19 = vrot.slane %v1135_v17, %v1141_v11  ;;  %v1333_v20 = vrot.slane %v1319_v18, %v1141_v11 }
 0x1b9   : > { %v1150_v21 = vcombine.low %v1142_v16, %v1149_v19  ;;  %v1334_v22 = vcombine.low %v1326_v34, %v1333_v20 }
 0x1bb   : > { %v1157_v27 = vrot.slane %v1150_v21, %v1141_v11  ;;  %v1341_v28 = vrot.slane %v1334_v22, %v1141_v11 }
 0x1bd   : > { %v1159_v26 = vmax.f32 %v981_v23, %v1157_v27  ;;  %v1343_v29 = vadd.f32 %v1341_v28, %v1165_v24 }
 0x1bf   : > { %1164 = vst.msk [vmem:[#allocation2] sm:$0xf] %vm1927_vm1, %v1159_v26  ;;  %1344 = vst.msk [vmem:[#allocation3] sm:$0xf] %vm1927_vm1, %v1343_v29 }
 0x1c6   : > { %v1348_v30 = vld [vmem:[#allocation2] sm:$0xf]  ;;  %v1350_v31 = vld [vmem:[#allocation3] sm:$0xf] }
 0x1c7   : > { %1349 = vst.msk [vmem:[%s224_s30] sm:$0xf] %vm1927_vm1, %v1348_v30  ;;  %v1351_v36 = vmul.f32 0.00390625, %v1350_v31 }
 0x1c9   : > { %1352 = vst.msk [vmem:[%s224_s30 + $0x4] sm:$0xf] %vm1927_vm1, %v1351_v36 }
 0x1ca PF: > { %s15_s14 = sadd.s32 1, %s1679_s14   ;;  %s2083_s12 = smov %s1675_s13 }
 0x1cb   : > { %p12_p6 = scmp.ge.s32.totalorder %s15_s14, 4   ;;  %s2084_s13 = smov %s2086_s16 }
 0x1cd   :  { %14 = sbr.rel (!%p12_p6) target bundleno = 3 (0x3), region = 79 }
 0x1d4   :  { %1372 = vsyncpa [#allocation5], 1 }
 0x1d5   :  { %1374 = vsyncpa [#allocation5 + $0x1], 1 }
 0x1d6   :  { %1375 = vsyncpa [#allocation7], 1 }

// kernel: multitask_forward.3
= control target key start
LH: loop header
LB: loop body
LE: loop exit
PB: predicated region body
PF: predicated region fallthrough
CT: control target
= control target key end

     0   :  { %12 = vsyncpa [#allocation3], 0  ;;  %s10075_s0 = inlined_call_operand.vmem [shape: f32[2,1024], index: 0, kind: input, shape index: {}]   ;;  %s10076_s1 = inlined_call_operand.hbm [shape: bf16[1024,1536], index: 1, kind: input, shape index: {}]   ;;  %s10077_s2 = inlined_call_operand.hbm [shape: f32[1,1536], index: 2, kind: input, shape index: {}]   ;;  %s10078_s3 = inlined_call_operand.hbm [shape: f32[1,1536], index: 3, kind: input, shape index: {}]   ;;  %s10079_s4 = inlined_call_operand.hbm [shape: f32[1,1536], index: 4, kind: input, shape index: {}]   ;;  %s10080_s5 = inlined_call_operand.vmem [shape: bf16[1536,8], index: 5, kind: input, shape index: {}]   ;;  %s10081_s6 = inlined_call_operand.hbm [shape: f32[1,8], index: 6, kind: input, shape index: {}]   ;;  %s10082_s7 = inlined_call_operand.vmem [shape: f32[2,8], index: 7, kind: output, shape index: {}]  }
   0x1   :  { %13 = vsyncpa [#allocation5], 0 }
   0x2   :  { %14 = vsyncpa [#allocation8], 0  ;;  %s9467_s24 = smov [#allocation4]   ;;  %s9468_s26 = smov [#allocation7]  }
   0x3   :  { %s35_s25 = sshll.u32 %s9467_s24, 4  ;;  %s55_s27 = sshll.u32 %s9468_s26, 4  ;;  %s36_s25 = int_to_ptr.vmem [resolvable:$true] %s35_s25  ;;  %s56_s27 = int_to_ptr.vmem [resolvable:$true] %s55_s27 }
   0x4   :  { %s9351_s30 = scalar_lea.hbm %s10077_s2, 192 }
   0x5   :  { %p9352_p0 = scmp.ne.s32.totalorder %s10077_s2, %s9351_s30  ;;  %p9355_p1 = scmp.lt.u32.totalorder %s9351_s30, %s10077_s2 }
   0x7   :  { %p9357_p2 = pnand %p9355_p1, %p9352_p0 }
   0x9   :  { %9360 = shalt.err (!%p9357_p2)
}
   0xa   :  { %s9361_s12 = scalar_lea.vmem %s36_s25, 192  ;;  %p9366_p4 = scmp.lt.s32.totalorder %s36_s25, %s36_s25 }
   0xb   :  { %p9362_p3 = scmp.ne.s32.totalorder %s36_s25, %s9361_s12  ;;  %p9367_p5 = scmp.lt.s32.totalorder %s9361_s12, %s9361_s12 }
   0xd   :  { %p9368_p6 = por %p9367_p5, %p9366_p4 }
   0xf   :  { %p9369_p7 = pnand %p9368_p6, %p9362_p3 }
  0x11   :  { %9372 = shalt.err (!%p9369_p7)
}
  0x12   :  { %38 = dma.hbm_to_vmem [thread:$0]  %s10077_s2, 192, %s36_s25, [#allocation5]  }
  0x13   :  { %s9373_s17 = scalar_lea.hbm %s10079_s4, 192 }
  0x14   :  { %p9374_p8 = scmp.ne.s32.totalorder %s10079_s4, %s9373_s17  ;;  %p9377_p9 = scmp.lt.u32.totalorder %s9373_s17, %s10079_s4 }
  0x16   :  { %p9379_p10 = pnand %p9377_p9, %p9374_p8 }
  0x18   :  { %9382 = shalt.err (!%p9379_p10)
}
  0x19   :  { %s9383_s22 = scalar_lea.vmem %s56_s27, 192  ;;  %p9388_p12 = scmp.lt.s32.totalorder %s56_s27, %s56_s27 }
  0x1a   :  { %p9384_p11 = scmp.ne.s32.totalorder %s56_s27, %s9383_s22  ;;  %p9389_p13 = scmp.lt.s32.totalorder %s9383_s22, %s9383_s22 }
  0x1c   :  { %p9390_p0 = por %p9389_p13, %p9388_p12 }
  0x1e   :  { %p9391_p1 = pnand %p9390_p0, %p9384_p11 }
  0x20   :  { %9394 = shalt.err (!%p9391_p1)
}
  0x21   :  { %58 = dma.hbm_to_vmem [thread:$0]  %s10079_s4, 192, %s56_s27, [#allocation8]  }
  0x22   :  { %s9469_s24 = smov [#allocation2]   ;;  %s9395_s29 = scalar_lea.hbm %s10076_s1, 98304 }
  0x23   :  { %s22_s25 = sshll.u32 %s9469_s24, 4  ;;  %p9396_p2 = scmp.ne.s32.totalorder %s10076_s1, %s9395_s29  ;;  %s23_s25 = int_to_ptr.vmem [resolvable:$true] %s22_s25 }
  0x24   :  { %p9399_p3 = scmp.lt.u32.totalorder %s9395_s29, %s10076_s1 }
  0x26   :  { %p9401_p4 = pnand %p9399_p3, %p9396_p2 }
  0x28   :  { %9404 = shalt.err (!%p9401_p4)
}
  0x29   :  { %s9405_s11 = scalar_lea.vmem %s23_s25, 98304  ;;  %p9410_p6 = scmp.lt.s32.totalorder %s23_s25, %s23_s25 }
  0x2a   :  { %p9406_p5 = scmp.ne.s32.totalorder %s23_s25, %s9405_s11  ;;  %p9411_p7 = scmp.lt.s32.totalorder %s9405_s11, %s9405_s11 }
  0x2c   :  { %p9412_p8 = por %p9411_p7, %p9410_p6 }
  0x2e   :  { %p9413_p9 = pnand %p9412_p8, %p9406_p5 }
  0x30   :  { %9416 = shalt.err (!%p9413_p9)
}
  0x31   :  { %s9470_s4 = smov 768   ;;  %s9471_s27 = smov 48  }
  0x32   :  { %28 = dma.hbm_to_vmem [thread:$0]  %s10076_s1, 98304, %s23_s25, [#allocation3], %s9470_s4, %s9470_s4, %s9471_s27  }
  0x33   :  { %s9472_s14 = smov [#allocation6]   ;;  %s9473_s16 = smov [#allocation9]  }
  0x34   :  { %s45_s15 = sshll.u32 %s9472_s14, 4  ;;  %s67_s17 = sshll.u32 %s9473_s16, 4  ;;  %s46_s15 = int_to_ptr.vmem [resolvable:$true] %s45_s15  ;;  %s68_s17 = int_to_ptr.vmem [resolvable:$true] %s67_s17 }
  0x35   :  { %s9417_s20 = scalar_lea.hbm %s10078_s3, 192 }
  0x36   :  { %p9418_p10 = scmp.ne.s32.totalorder %s10078_s3, %s9417_s20  ;;  %p9421_p11 = scmp.lt.u32.totalorder %s9417_s20, %s10078_s3 }
  0x38   :  { %p9423_p12 = pnand %p9421_p11, %p9418_p10 }
  0x3a   :  { %9426 = shalt.err (!%p9423_p12)
}
  0x3b   :  { %s9427_s1 = scalar_lea.vmem %s46_s15, 192  ;;  %p9432_p0 = scmp.lt.s32.totalorder %s46_s15, %s46_s15 }
  0x3c   :  { %p9428_p13 = scmp.ne.s32.totalorder %s46_s15, %s9427_s1  ;;  %p9433_p1 = scmp.lt.s32.totalorder %s9427_s1, %s9427_s1 }
  0x3e   :  { %p9434_p2 = por %p9433_p1, %p9432_p0 }
  0x40   :  { %p9435_p3 = pnand %p9434_p2, %p9428_p13 }
  0x42   :  { %9438 = shalt.err (!%p9435_p3)
}
  0x43   :  { %48 = dma.hbm_to_vmem [thread:$0]  %s10078_s3, 192, %s46_s15, [#allocation5]  }
  0x44   :  { %s9439_s29 = scalar_lea.hbm %s10081_s6, 16 }
  0x45   :  { %p9440_p4 = scmp.ne.s32.totalorder %s10081_s6, %s9439_s29  ;;  %p9443_p5 = scmp.lt.u32.totalorder %s9439_s29, %s10081_s6 }
  0x47   :  { %p9445_p6 = pnand %p9443_p5, %p9440_p4 }
  0x49   :  { %9448 = shalt.err (!%p9445_p6)
}
  0x4a   :  { %s9449_s11 = scalar_lea.vmem %s68_s17, 16  ;;  %s9453_s4 = scalar_lea.vmem %s68_s17, 32 }
  0x4b   :  { %p9450_p7 = scmp.ne.s32.totalorder %s68_s17, %s9449_s11  ;;  %p9454_p8 = scmp.lt.s32.totalorder %s68_s17, %s68_s17 }
  0x4c   :  { %p9455_p9 = scmp.lt.s32.totalorder %s9453_s4, %s9449_s11 }
  0x4e   :  { %p9456_p10 = por %p9455_p9, %p9454_p8 }
  0x50   :  { %p9457_p11 = pnand %p9456_p10, %p9450_p7 }
  0x52   :  { %9460 = shalt.err (!%p9457_p11)
}
  0x53   :  { %70 = dma.hbm_to_vmem [thread:$0]  %s10081_s6, 16, %s68_s17, [#allocation8]  }
  0x54   :  { %9461 = dma.done.wait [#allocation3], 98304  }
  0x55   :  { %9462 = vsyncadd [#allocation3], 4294868992 }
  0x56   :  { %9463 = dma.done.wait [#allocation5], 384  }
  0x57   :  { %9464 = vsyncadd [#allocation5], 4294966912 }
  0x58   :  { %9465 = dma.done.wait [#allocation8], 208  }
  0x59   :  { %9466 = vsyncadd [#allocation8], 4294967088  ;;  %v8097_v0 = vld [vmem:[#allocation2 + $0x4] ss:$48 sps:$4 sm:$0xff]   ;;  %v8099_v1 = vld [vmem:[#allocation2 + $0xc] ss:$48 sps:$4 sm:$0xff]   ;;  %v95_v38 = vlaneseq }
  0x5a   :  { %4813 = vmatprep.subr.bf16.mxu0 %v8097_v0  ;;  %v8101_v2 = vld [vmem:[#allocation2] ss:$48 sps:$4 sm:$0xff]   ;;  %v8102_v3 = vld [vmem:[#allocation2 + $0x8] ss:$48 sps:$4 sm:$0xff]   ;;  %4977 = vmatprep.subr.bf16.mxu1 %v8099_v1  ;;  %v8103_v4 = vld [vmem:[#allocation2 + $0x64] ss:$48 sps:$4 sm:$0xff]  }
  0x5b   :  { %4814 = vmatpush1.bf16.msra.mxu0 %v8101_v2  ;;  %4978 = vmatpush1.bf16.msra.mxu1 %v8102_v3  ;;  %v8105_v5 = vld [vmem:[#allocation2 + $0x6c] ss:$48 sps:$4 sm:$0xff]   ;;  %v8107_v6 = vld [vmem:[#allocation2 + $0x60] ss:$48 sps:$4 sm:$0xff]   ;;  %v8108_v7 = vld [vmem:[#allocation2 + $0x68] ss:$48 sps:$4 sm:$0xff]  }
  0x5c   :  { %4815 = vmatprep.subr.bf16.mxu0 %v8103_v4  ;;  %4979 = vmatprep.subr.bf16.mxu1 %v8105_v5  ;;  %v8109_v8 = vld [vmem:[#allocation2 + $0xc4] ss:$48 sps:$4 sm:$0xff]   ;;  %v8111_v9 = vld [vmem:[#allocation2 + $0xcc] ss:$48 sps:$4 sm:$0xff]   ;;  %v8113_v10 = vld [vmem:[#allocation2 + $0xc0] ss:$48 sps:$4 sm:$0xff]  }
  0x5d   :  { %v8114_v11 = vld [vmem:[#allocation2 + $0xc8] ss:$48 sps:$4 sm:$0xff]   ;;  %v8115_v12 = vld [vmem:[#allocation2 + $0x124] ss:$48 sps:$4 sm:$0xff]   ;;  %v8117_v13 = vld [vmem:[#allocation2 + $0x12c] ss:$48 sps:$4 sm:$0xff]  }
  0x5e   :  { %v8119_v14 = vld [vmem:[#allocation2 + $0x120] ss:$48 sps:$4 sm:$0xff]   ;;  %v8120_v15 = vld [vmem:[#allocation2 + $0x128] ss:$48 sps:$4 sm:$0xff]   ;;  %v8121_v16 = vld [vmem:[#allocation2 + $0x184] ss:$48 sps:$4 sm:$0xff]  }
  0x5f   :  { %4816 = vmatpush1.bf16.msra.mxu0 %v8107_v6  ;;  %4980 = vmatpush1.bf16.msra.mxu1 %v8108_v7  ;;  %v8123_v17 = vld [vmem:[#allocation2 + $0x18c] ss:$48 sps:$4 sm:$0xff]   ;;  %v8125_v18 = vld [vmem:[#allocation2 + $0x180] ss:$48 sps:$4 sm:$0xff]   ;;  %v8126_v19 = vld [vmem:[#allocation2 + $0x188] ss:$48 sps:$4 sm:$0xff]  }
  0x60   :  { %4817 = vmatprep.subr.bf16.mxu0 %v8109_v8  ;;  %4981 = vmatprep.subr.bf16.mxu1 %v8111_v9  ;;  %v8127_v20 = vld [vmem:[#allocation2 + $0x1e4] ss:$48 sps:$4 sm:$0xff]   ;;  %v8129_v21 = vld [vmem:[#allocation2 + $0x1ec] ss:$48 sps:$4 sm:$0xff]   ;;  %v8131_v22 = vld [vmem:[#allocation2 + $0x1e0] ss:$48 sps:$4 sm:$0xff]  }
  0x61   :  { %v8132_v23 = vld [vmem:[#allocation2 + $0x1e8] ss:$48 sps:$4 sm:$0xff]   ;;  %v8133_v24 = vld [vmem:[#allocation2 + $0x244] ss:$48 sps:$4 sm:$0xff]   ;;  %v8135_v25 = vld [vmem:[#allocation2 + $0x24c] ss:$48 sps:$4 sm:$0xff]  }
  0x62   :  { %v8137_v26 = vld [vmem:[#allocation2 + $0x240] ss:$48 sps:$4 sm:$0xff]   ;;  %v8138_v27 = vld [vmem:[#allocation2 + $0x248] ss:$48 sps:$4 sm:$0xff]   ;;  %v8139_v28 = vld [vmem:[#allocation2 + $0x2a4] ss:$48 sps:$4 sm:$0xff]  }
  0x63   :  { %4818 = vmatpush1.bf16.msra.mxu0 %v8113_v10  ;;  %4982 = vmatpush1.bf16.msra.mxu1 %v8114_v11  ;;  %v8141_v29 = vld [vmem:[#allocation2 + $0x2ac] ss:$48 sps:$4 sm:$0xff]   ;;  %v8143_v30 = vld [vmem:[#allocation2 + $0x2a0] ss:$48 sps:$4 sm:$0xff]   ;;  %v8144_v31 = vld [vmem:[#allocation2 + $0x2a8] ss:$48 sps:$4 sm:$0xff]  }
  0x64   :  { %4819 = vmatprep.subr.bf16.mxu0 %v8115_v12  ;;  %4983 = vmatprep.subr.bf16.mxu1 %v8117_v13  ;;  %v8145_v32 = vld [vmem:[#allocation2 + $0x304] ss:$48 sps:$4 sm:$0xff]   ;;  %v8147_v33 = vld [vmem:[#allocation2 + $0x30c] ss:$48 sps:$4 sm:$0xff]   ;;  %v8149_v34 = vld [vmem:[#allocation2 + $0x300] ss:$48 sps:$4 sm:$0xff]  }
  0x65   :  { %v8150_v35 = vld [vmem:[#allocation2 + $0x308] ss:$48 sps:$4 sm:$0xff]   ;;  %v9474_v36 = vmov 1983009808   ;;  %v8151_v39 = vld [vmem:[#allocation2 + $0x364] ss:$48 sps:$4 sm:$0xff]  }
  0x66   :  { %v93_v37 = vunpack.c.l.s4 %v9474_v36  ;;  %v8153_v40 = vld [vmem:[#allocation2 + $0x36c] ss:$48 sps:$4 sm:$0xff]   ;;  %v8155_v41 = vld [vmem:[#allocation2 + $0x360] ss:$48 sps:$4 sm:$0xff]   ;;  %v9576_v43 = vshrl.u32 %v95_v38, 7  ;;  %vm6998_vm1 = vcmask 58368  }
  0x67   :  { %4820 = vmatpush1.bf16.msra.mxu0 %v8119_v14  ;;  %4984 = vmatpush1.bf16.msra.mxu1 %v8120_v15  ;;  %v8156_v44 = vld [vmem:[#allocation2 + $0x368] ss:$48 sps:$4 sm:$0xff]   ;;  %v8157_v45 = vld [vmem:[#allocation2 + $0x3c4] ss:$48 sps:$4 sm:$0xff]   ;;  %v8159_v46 = vld [vmem:[#allocation2 + $0x3cc] ss:$48 sps:$4 sm:$0xff]  }
  0x68   :  { %4821 = vmatprep.subr.bf16.mxu0 %v8121_v16  ;;  %4985 = vmatprep.subr.bf16.mxu1 %v8123_v17  ;;  %v94_v42 = vunpack.c.0.s8 %v93_v37  ;;  %v8161_v47 = vld [vmem:[#allocation2 + $0x3c0] ss:$48 sps:$4 sm:$0xff]   ;;  %v8162_v48 = vld [vmem:[#allocation2 + $0x3c8] ss:$48 sps:$4 sm:$0xff]   ;;  %v8163_v50 = vld [vmem:[#allocation2 + $0x424] ss:$48 sps:$4 sm:$0xff]  }
  0x69   :  { %v8165_v51 = vld [vmem:[#allocation2 + $0x42c] ss:$48 sps:$4 sm:$0xff]   ;;  %v87_v52 = vld [vmem:[%s10075_s0] sm:$0xff]  ;;  %v8168_v55 = vld [vmem:[#allocation2 + $0x428] ss:$48 sps:$4 sm:$0xff]  }
  0x6a   :  { %v9579_v49 = vsub.s32 %v94_v42, %v9576_v43  ;;  %v8167_v53 = vld [vmem:[#allocation2 + $0x420] ss:$48 sps:$4 sm:$0xff]   ;;  %v8169_v56 = vld [vmem:[#allocation2 + $0x484] ss:$48 sps:$4 sm:$0xff]   ;;  %v8171_v57 = vld [vmem:[#allocation2 + $0x48c] ss:$48 sps:$4 sm:$0xff]   ;;  %v91_v4 = vcombine.high %v87_v52, %v87_v52 }
  0x6b   :  { %4822 = vmatpush1.bf16.msra.mxu0 %v8125_v18  ;;  %4986 = vmatpush1.bf16.msra.mxu1 %v8126_v19  ;;  %v8173_v59 = vld [vmem:[#allocation2 + $0x480] ss:$48 sps:$4 sm:$0xff]   ;;  %v8174_v61 = vld [vmem:[#allocation2 + $0x488] ss:$48 sps:$4 sm:$0xff]   ;;  %v8175_v62 = vld [vmem:[#allocation2 + $0x4e4] ss:$48 sps:$4 sm:$0xff]  }
  0x6c   :  { %4823 = vmatprep.subr.bf16.mxu0 %v8127_v20  ;;  %4987 = vmatprep.subr.bf16.mxu1 %v8129_v21  ;;  %v98_v54 = vrot.slane %v87_v52, %v9579_v49  ;;  %v8177_v63 = vld [vmem:[#allocation2 + $0x4ec] ss:$48 sps:$4 sm:$0xff]   ;;  %v8179_v0 = vld [vmem:[#allocation2 + $0x4e0] ss:$48 sps:$4 sm:$0xff]   ;;  %v8180_v1 = vld [vmem:[#allocation2 + $0x4e8] ss:$48 sps:$4 sm:$0xff]   ;;  %v9590_v9 = vrot.slane %v91_v4, %v9579_v49 }
  0x6d   :  { %v8181_v2 = vld [vmem:[#allocation2 + $0x544] ss:$48 sps:$4 sm:$0xff]   ;;  %v8183_v3 = vld [vmem:[#allocation2 + $0x54c] ss:$48 sps:$4 sm:$0xff]   ;;  %v8185_v5 = vld [vmem:[#allocation2 + $0x540] ss:$48 sps:$4 sm:$0xff]  }
  0x6e   :  { %v106_v58 = vcombine.high %v98_v54, %v98_v54  ;;  %v8186_v6 = vld [vmem:[#allocation2 + $0x548] ss:$48 sps:$4 sm:$0xff]   ;;  %v8187_v7 = vld [vmem:[#allocation2 + $0x5a4] ss:$48 sps:$4 sm:$0xff]   ;;  %v8189_v8 = vld [vmem:[#allocation2 + $0x5ac] ss:$48 sps:$4 sm:$0xff]   ;;  %v107_v14 = vcombine.high %v9590_v9, %v9590_v9  ;;  %v9594_v16 = vpack.c.bf16 %v98_v54, %v98_v54 }
  0x6f   :  { %4824 = vmatpush1.bf16.msra.mxu0 %v8131_v22  ;;  %4988 = vmatpush1.bf16.msra.mxu1 %v8132_v23  ;;  %v8191_v10 = vld [vmem:[#allocation2 + $0x5a0] ss:$48 sps:$4 sm:$0xff]   ;;  %v8192_v11 = vld [vmem:[#allocation2 + $0x5a8] ss:$48 sps:$4 sm:$0xff]   ;;  %v8195_v12 = vld [vmem:[#allocation2 + $0x604] ss:$48 sps:$4 sm:$0xff]  }
  0x70   :  { %4825 = vmatprep.subr.bf16.mxu0 %v8133_v24  ;;  %4989 = vmatprep.subr.bf16.mxu1 %v8135_v25  ;;  %v9585_v60 = vpack.c.bf16 %v106_v58, %v106_v58  ;;  %v8198_v13 = vld [vmem:[#allocation2 + $0x60c] ss:$48 sps:$4 sm:$0xff]   ;;  %v8193_v15 = vld [vmem:[#allocation2 + $0x600] ss:$48 sps:$4 sm:$0xff]   ;;  %v8196_v17 = vld [vmem:[#allocation2 + $0x608] ss:$48 sps:$4 sm:$0xff]   ;;  %v9596_v20 = vpack.c.bf16 %v107_v14, %v107_v14 }
  0x71   :  { %v8201_v18 = vld [vmem:[#allocation2 + $0x664] ss:$48 sps:$4 sm:$0xff]   ;;  %v8204_v19 = vld [vmem:[#allocation2 + $0x66c] ss:$48 sps:$4 sm:$0xff]   ;;  %v8199_v21 = vld [vmem:[#allocation2 + $0x660] ss:$48 sps:$4 sm:$0xff]  }
  0x72   :  { %4845 = vmatprep.mubr.bf16.mxu0 %v9585_v60  ;;  %5009 = vmatprep.mubr.bf16.mxu1 %v9585_v60  ;;  %v8202_v22 = vld [vmem:[#allocation2 + $0x668] ss:$48 sps:$4 sm:$0xff]   ;;  %v8207_v23 = vld [vmem:[#allocation2 + $0x6c4] ss:$48 sps:$4 sm:$0xff]   ;;  %v8210_v24 = vld [vmem:[#allocation2 + $0x6cc] ss:$48 sps:$4 sm:$0xff]  }
  0x73   :  { %4826 = vmatpush1.bf16.msra.mxu0 %v8137_v26  ;;  %4990 = vmatpush1.bf16.msra.mxu1 %v8138_v27  ;;  %v8205_v25 = vld [vmem:[#allocation2 + $0x6c0] ss:$48 sps:$4 sm:$0xff]   ;;  %v8208_v26 = vld [vmem:[#allocation2 + $0x6c8] ss:$48 sps:$4 sm:$0xff]   ;;  %v8213_v27 = vld [vmem:[#allocation2 + $0x724] ss:$48 sps:$4 sm:$0xff]  }
  0x74   :  { %4827 = vmatprep.subr.bf16.mxu0 %v8139_v28  ;;  %4991 = vmatprep.subr.bf16.mxu1 %v8141_v29  ;;  %v8216_v28 = vld [vmem:[#allocation2 + $0x72c] ss:$48 sps:$4 sm:$0xff]   ;;  %v8211_v29 = vld [vmem:[#allocation2 + $0x720] ss:$48 sps:$4 sm:$0xff]   ;;  %v8249_v54 = vld [vmem:[#allocation2 + $0x964] ss:$48 sps:$4 sm:$0xff]  }
  0x75   :  { %v8228_v36 = vld [vmem:[#allocation2 + $0x7ec] ss:$48 sps:$4 sm:$0xff]   ;;  %v8223_v37 = vld [vmem:[#allocation2 + $0x7e0] ss:$48 sps:$4 sm:$0xff]   ;;  %v8255_v58 = vld [vmem:[#allocation2 + $0x9c4] ss:$48 sps:$4 sm:$0xff]  }
  0x76   :  { %v8229_v42 = vld [vmem:[#allocation2 + $0x840] ss:$48 sps:$4 sm:$0xff]   ;;  %v8270_v4 = vld [vmem:[#allocation2 + $0xa8c] ss:$48 sps:$4 sm:$0xff]  }
  0x77   :  { %4828 = vmatpush1.bf16.msra.mxu0 %v8143_v30  ;;  %4992 = vmatpush1.bf16.msra.mxu1 %v8144_v31  ;;  %v8214_v30 = vld [vmem:[#allocation2 + $0x728] ss:$48 sps:$4 sm:$0xff]   ;;  %v8219_v31 = vld [vmem:[#allocation2 + $0x784] ss:$48 sps:$4 sm:$0xff]   ;;  %v8241_v52 = vld [vmem:[#allocation2 + $0x900] ss:$48 sps:$4 sm:$0xff]  }
  0x78   :  { %4829 = vmatprep.subr.bf16.mxu0 %v8145_v32  ;;  %4993 = vmatprep.subr.bf16.mxu1 %v8147_v33  ;;  %v8222_v32 = vld [vmem:[#allocation2 + $0x78c] ss:$48 sps:$4 sm:$0xff]   ;;  %v8217_v33 = vld [vmem:[#allocation2 + $0x780] ss:$48 sps:$4 sm:$0xff]  }
  0x79   :  { %v8277_v14 = vld [vmem:[#allocation2 + $0xb40] ss:$48 sps:$4 sm:$0xff]  }
  0x7b   :  { %4830 = vmatpush1.bf16.msra.mxu0 %v8149_v34  ;;  %4994 = vmatpush1.bf16.msra.mxu1 %v8150_v35  ;;  %v8220_v34 = vld [vmem:[#allocation2 + $0x788] ss:$48 sps:$4 sm:$0xff]   ;;  %v8225_v35 = vld [vmem:[#allocation2 + $0x7e4] ss:$48 sps:$4 sm:$0xff]  }
  0x7c   :  { %4831 = vmatprep.subr.bf16.mxu0 %v8151_v39  ;;  %4995 = vmatprep.subr.bf16.mxu1 %v8153_v40  ;;  %v8226_v39 = vld [vmem:[#allocation2 + $0x7e8] ss:$48 sps:$4 sm:$0xff]   ;;  %v8231_v40 = vld [vmem:[#allocation2 + $0x844] ss:$48 sps:$4 sm:$0xff]  }
  0x7f   :  { %4832 = vmatpush1.bf16.msra.mxu0 %v8155_v41  ;;  %4996 = vmatpush1.bf16.msra.mxu1 %v8156_v44  ;;  %v8234_v41 = vld [vmem:[#allocation2 + $0x84c] ss:$48 sps:$4 sm:$0xff]   ;;  %v8232_v44 = vld [vmem:[#allocation2 + $0x848] ss:$48 sps:$4 sm:$0xff]  }
  0x80   :  { %4833 = vmatprep.subr.bf16.mxu0 %v8157_v45  ;;  %4997 = vmatprep.subr.bf16.mxu1 %v8159_v46  ;;  %v8237_v45 = vld [vmem:[#allocation2 + $0x8a4] ss:$48 sps:$4 sm:$0xff]   ;;  %v8240_v46 = vld [vmem:[#allocation2 + $0x8ac] ss:$48 sps:$4 sm:$0xff]  }
  0x83   :  { %4834 = vmatpush1.bf16.msra.mxu0 %v8161_v47  ;;  %4998 = vmatpush1.bf16.msra.mxu1 %v8162_v48  ;;  %v8235_v47 = vld [vmem:[#allocation2 + $0x8a0] ss:$48 sps:$4 sm:$0xff]   ;;  %v8238_v48 = vld [vmem:[#allocation2 + $0x8a8] ss:$48 sps:$4 sm:$0xff]  }
  0x84   :  { %4835 = vmatprep.subr.bf16.mxu0 %v8163_v50  ;;  %4999 = vmatprep.subr.bf16.mxu1 %v8165_v51  ;;  %v8243_v50 = vld [vmem:[#allocation2 + $0x904] ss:$48 sps:$4 sm:$0xff]   ;;  %v8246_v51 = vld [vmem:[#allocation2 + $0x90c] ss:$48 sps:$4 sm:$0xff]  }
  0x87   :  { %4836 = vmatpush1.bf16.msra.mxu0 %v8167_v53  ;;  %5000 = vmatpush1.bf16.msra.mxu1 %v8168_v55  ;;  %v8244_v53 = vld [vmem:[#allocation2 + $0x908] ss:$48 sps:$4 sm:$0xff]   ;;  %v8252_v55 = vld [vmem:[#allocation2 + $0x96c] ss:$48 sps:$4 sm:$0xff]  }
  0x88   :  { %4837 = vmatprep.subr.bf16.mxu0 %v8169_v56  ;;  %5001 = vmatprep.subr.bf16.mxu1 %v8171_v57  ;;  %v8247_v56 = vld [vmem:[#allocation2 + $0x960] ss:$48 sps:$4 sm:$0xff]   ;;  %v8250_v57 = vld [vmem:[#allocation2 + $0x968] ss:$48 sps:$4 sm:$0xff]  }
  0x8b   :  { %4838 = vmatpush1.bf16.msra.mxu0 %v8173_v59  ;;  %5002 = vmatpush1.bf16.msra.mxu1 %v8174_v61  ;;  %v8258_v59 = vld [vmem:[#allocation2 + $0x9cc] ss:$48 sps:$4 sm:$0xff]   ;;  %v8253_v61 = vld [vmem:[#allocation2 + $0x9c0] ss:$48 sps:$4 sm:$0xff]  }
  0x8c   :  { %4839 = vmatprep.subr.bf16.mxu0 %v8175_v62  ;;  %5003 = vmatprep.subr.bf16.mxu1 %v8177_v63  ;;  %v8256_v62 = vld [vmem:[#allocation2 + $0x9c8] ss:$48 sps:$4 sm:$0xff]   ;;  %v8261_v63 = vld [vmem:[#allocation2 + $0xa24] ss:$48 sps:$4 sm:$0xff]  }
  0x8f   :  { %4840 = vmatpush1.bf16.msra.mxu0 %v8179_v0  ;;  %5004 = vmatpush1.bf16.msra.mxu1 %v8180_v1  ;;  %v8264_v0 = vld [vmem:[#allocation2 + $0xa2c] ss:$48 sps:$4 sm:$0xff]   ;;  %v8259_v1 = vld [vmem:[#allocation2 + $0xa20] ss:$48 sps:$4 sm:$0xff]  }
  0x90   :  { %4841 = vmatprep.subr.bf16.mxu0 %v8181_v2  ;;  %5005 = vmatprep.subr.bf16.mxu1 %v8183_v3  ;;  %v8262_v2 = vld [vmem:[#allocation2 + $0xa28] ss:$48 sps:$4 sm:$0xff]   ;;  %v8267_v3 = vld [vmem:[#allocation2 + $0xa84] ss:$48 sps:$4 sm:$0xff]  }
  0x93   :  { %4842 = vmatpush1.bf16.msra.mxu0 %v8185_v5  ;;  %5006 = vmatpush1.bf16.msra.mxu1 %v8186_v6  ;;  %v8265_v5 = vld [vmem:[#allocation2 + $0xa80] ss:$48 sps:$4 sm:$0xff]   ;;  %v8268_v6 = vld [vmem:[#allocation2 + $0xa88] ss:$48 sps:$4 sm:$0xff]  }
  0x94   :  { %4843 = vmatprep.subr.bf16.mxu0 %v8187_v7  ;;  %5007 = vmatprep.subr.bf16.mxu1 %v8189_v8  ;;  %v8273_v7 = vld [vmem:[#allocation2 + $0xae4] ss:$48 sps:$4 sm:$0xff]   ;;  %v8276_v8 = vld [vmem:[#allocation2 + $0xaec] ss:$48 sps:$4 sm:$0xff]  }
  0x97   :  { %4844 = vmatpush1.bf16.msra.mxu0 %v8191_v10  ;;  %5008 = vmatpush1.bf16.msra.mxu1 %v8192_v11  ;;  %v8271_v10 = vld [vmem:[#allocation2 + $0xae0] ss:$48 sps:$4 sm:$0xff]   ;;  %v8274_v11 = vld [vmem:[#allocation2 + $0xae8] ss:$48 sps:$4 sm:$0xff]  }
  0x98   :  { %4854 = vmatprep.subr.bf16.mxu0 %v8195_v12  ;;  %5018 = vmatprep.subr.bf16.mxu1 %v8198_v13  ;;  %v8279_v12 = vld [vmem:[#allocation2 + $0xb44] ss:$48 sps:$4 sm:$0xff]   ;;  %v8282_v13 = vld [vmem:[#allocation2 + $0xb4c] ss:$48 sps:$4 sm:$0xff]  }
  0x9a   :  { %4846 = vmatmul.mubr.bf16.vlgmr.msra.gmra.mrb[0].mxu0 %v9594_v16  ;;  %5010 = vmatmul.mubr.bf16.vlgmr.msra.gmra.mrb[0].mxu1 %v9594_v16 }
  0x9b   :  { %4855 = vmatpush1.bf16.msra.mxu0 %v8193_v15  ;;  %5019 = vmatpush1.bf16.msra.mxu1 %v8196_v17  ;;  %v8280_v15 = vld [vmem:[#allocation2 + $0xb48] ss:$48 sps:$4 sm:$0xff]   ;;  %v8285_v17 = vld [vmem:[#allocation2 + $0xba4] ss:$48 sps:$4 sm:$0xff]  }
  0x9c   :  { %4856 = vmatprep.subr.bf16.mxu0 %v8201_v18  ;;  %5020 = vmatprep.subr.bf16.mxu1 %v8204_v19  ;;  %v8288_v18 = vld [vmem:[#allocation2 + $0xbac] ss:$48 sps:$4 sm:$0xff]   ;;  %v8283_v19 = vld [vmem:[#allocation2 + $0xba0] ss:$48 sps:$4 sm:$0xff]  }
  0x9d   :  { %4886 = vmatprep.mubr.bf16.mxu0 %v9596_v20  ;;  %5050 = vmatprep.mubr.bf16.mxu1 %v9596_v20 }
  0x9f   :  { %4857 = vmatpush1.bf16.msra.mxu0 %v8199_v21  ;;  %5021 = vmatpush1.bf16.msra.mxu1 %v8202_v22  ;;  %v8286_v21 = vld [vmem:[#allocation2 + $0xba8] ss:$48 sps:$4 sm:$0xff]   ;;  %v8292_v22 = vld [vmem:[#allocation2 + $0xc04] ss:$48 sps:$4 sm:$0xff]  }
  0xa0   :  { %4858 = vmatprep.subr.bf16.mxu0 %v8207_v23  ;;  %5022 = vmatprep.subr.bf16.mxu1 %v8210_v24  ;;  %v8295_v23 = vld [vmem:[#allocation2 + $0xc0c] ss:$48 sps:$4 sm:$0xff]   ;;  %v8290_v24 = vld [vmem:[#allocation2 + $0xc00] ss:$48 sps:$4 sm:$0xff]  }
  0xa3   :  { %4859 = vmatpush1.bf16.msra.mxu0 %v8205_v25  ;;  %5023 = vmatpush1.bf16.msra.mxu1 %v8208_v26  ;;  %v9604_v25 = vpack.c.bf16 %v9590_v9, %v9590_v9  ;;  %v8293_v26 = vld [vmem:[#allocation2 + $0xc08] ss:$48 sps:$4 sm:$0xff]  }
  0xa4   :  { %4860 = vmatprep.subr.bf16.mxu0 %v8213_v27  ;;  %5024 = vmatprep.subr.bf16.mxu1 %v8216_v28  ;;  %v9609_v27 = vld [vmem:[%s10075_s0 + $0x8] sm:$0xff]  ;;  %v8298_v28 = vld [vmem:[#allocation2 + $0xc64] ss:$48 sps:$4 sm:$0xff]  }
  0xa7   :  { %4861 = vmatpush1.bf16.msra.mxu0 %v8211_v29  ;;  %5025 = vmatpush1.bf16.msra.mxu1 %v8214_v30  ;;  %v8301_v29 = vld [vmem:[#allocation2 + $0xc6c] ss:$48 sps:$4 sm:$0xff]   ;;  %v9613_v30 = vrot.slane %v9609_v27, %v9579_v49 }
  0xa8   :  { %4862 = vmatprep.subr.bf16.mxu0 %v8219_v31  ;;  %5026 = vmatprep.subr.bf16.mxu1 %v8222_v32  ;;  %v8296_v31 = vld [vmem:[#allocation2 + $0xc60] ss:$48 sps:$4 sm:$0xff]   ;;  %v8299_v32 = vld [vmem:[#allocation2 + $0xc68] ss:$48 sps:$4 sm:$0xff]  }
  0xa9   :  { %v123_v9 = vcombine.high %v9613_v30, %v9613_v30 }
  0xab   :  { %4863 = vmatpush1.bf16.msra.mxu0 %v8217_v33  ;;  %5027 = vmatpush1.bf16.msra.mxu1 %v8220_v34  ;;  %v8304_v33 = vld [vmem:[#allocation2 + $0xcc4] ss:$48 sps:$4 sm:$0xff]   ;;  %v8307_v34 = vld [vmem:[#allocation2 + $0xccc] ss:$48 sps:$4 sm:$0xff]  }
  0xac   :  { %4864 = vmatprep.subr.bf16.mxu0 %v8225_v35  ;;  %5028 = vmatprep.subr.bf16.mxu1 %v8228_v36  ;;  %v9619_v35 = vpack.c.bf16 %v123_v9, %v123_v9  ;;  %v8302_v36 = vld [vmem:[#allocation2 + $0xcc0] ss:$48 sps:$4 sm:$0xff]  }
  0xad   :  { %v8374_v9 = vld [vmem:[#allocation2 + $0x1140] ss:$48 sps:$4 sm:$0xff]  }
  0xaf   :  { %4865 = vmatpush1.bf16.msra.mxu0 %v8223_v37  ;;  %5029 = vmatpush1.bf16.msra.mxu1 %v8226_v39  ;;  %v8305_v37 = vld [vmem:[#allocation2 + $0xcc8] ss:$48 sps:$4 sm:$0xff]   ;;  %v8310_v39 = vld [vmem:[#allocation2 + $0xd24] ss:$48 sps:$4 sm:$0xff]  }
  0xb0   :  { %4866 = vmatprep.subr.bf16.mxu0 %v8231_v40  ;;  %5030 = vmatprep.subr.bf16.mxu1 %v8234_v41  ;;  %v8313_v40 = vld [vmem:[#allocation2 + $0xd2c] ss:$48 sps:$4 sm:$0xff]   ;;  %v8308_v41 = vld [vmem:[#allocation2 + $0xd20] ss:$48 sps:$4 sm:$0xff]  }
  0xb3   :  { %4867 = vmatpush1.bf16.msra.mxu0 %v8229_v42  ;;  %5031 = vmatpush1.bf16.msra.mxu1 %v8232_v44  ;;  %v8311_v42 = vld [vmem:[#allocation2 + $0xd28] ss:$48 sps:$4 sm:$0xff]   ;;  %v8316_v44 = vld [vmem:[#allocation2 + $0xd84] ss:$48 sps:$4 sm:$0xff]  }
  0xb4   :  { %4868 = vmatprep.subr.bf16.mxu0 %v8237_v45  ;;  %5032 = vmatprep.subr.bf16.mxu1 %v8240_v46  ;;  %v8319_v45 = vld [vmem:[#allocation2 + $0xd8c] ss:$48 sps:$4 sm:$0xff]   ;;  %v8314_v46 = vld [vmem:[#allocation2 + $0xd80] ss:$48 sps:$4 sm:$0xff]  }
  0xb7   :  { %4869 = vmatpush1.bf16.msra.mxu0 %v8235_v47  ;;  %5033 = vmatpush1.bf16.msra.mxu1 %v8238_v48  ;;  %v8317_v47 = vld [vmem:[#allocation2 + $0xd88] ss:$48 sps:$4 sm:$0xff]   ;;  %v8322_v48 = vld [vmem:[#allocation2 + $0xde4] ss:$48 sps:$4 sm:$0xff]  }
  0xb8   :  { %4870 = vmatprep.subr.bf16.mxu0 %v8243_v50  ;;  %5034 = vmatprep.subr.bf16.mxu1 %v8246_v51  ;;  %v8325_v50 = vld [vmem:[#allocation2 + $0xdec] ss:$48 sps:$4 sm:$0xff]   ;;  %v8320_v51 = vld [vmem:[#allocation2 + $0xde0] ss:$48 sps:$4 sm:$0xff]  }
  0xbb   :  { %4871 = vmatpush1.bf16.msra.mxu0 %v8241_v52  ;;  %5035 = vmatpush1.bf16.msra.mxu1 %v8244_v53  ;;  %v8323_v52 = vld [vmem:[#allocation2 + $0xde8] ss:$48 sps:$4 sm:$0xff]   ;;  %v8328_v53 = vld [vmem:[#allocation2 + $0xe44] ss:$48 sps:$4 sm:$0xff]  }
  0xbc   :  { %4872 = vmatprep.subr.bf16.mxu0 %v8249_v54  ;;  %5036 = vmatprep.subr.bf16.mxu1 %v8252_v55  ;;  %v8331_v54 = vld [vmem:[#allocation2 + $0xe4c] ss:$48 sps:$4 sm:$0xff]   ;;  %v8326_v55 = vld [vmem:[#allocation2 + $0xe40] ss:$48 sps:$4 sm:$0xff]  }
  0xbf   :  { %4873 = vmatpush1.bf16.msra.mxu0 %v8247_v56  ;;  %5037 = vmatpush1.bf16.msra.mxu1 %v8250_v57  ;;  %v8329_v56 = vld [vmem:[#allocation2 + $0xe48] ss:$48 sps:$4 sm:$0xff]   ;;  %v8334_v57 = vld [vmem:[#allocation2 + $0xea4] ss:$48 sps:$4 sm:$0xff]  }
  0xc0   :  { %4874 = vmatprep.subr.bf16.mxu0 %v8255_v58  ;;  %5038 = vmatprep.subr.bf16.mxu1 %v8258_v59  ;;  %v8337_v58 = vld [vmem:[#allocation2 + $0xeac] ss:$48 sps:$4 sm:$0xff]   ;;  %v8332_v59 = vld [vmem:[#allocation2 + $0xea0] ss:$48 sps:$4 sm:$0xff]  }
  0xc3   :  { %4875 = vmatpush1.bf16.msra.mxu0 %v8253_v61  ;;  %5039 = vmatpush1.bf16.msra.mxu1 %v8256_v62  ;;  %v8335_v61 = vld [vmem:[#allocation2 + $0xea8] ss:$48 sps:$4 sm:$0xff]   ;;  %v8340_v62 = vld [vmem:[#allocation2 + $0xf04] ss:$48 sps:$4 sm:$0xff]  }
  0xc4   :  { %4876 = vmatprep.subr.bf16.mxu0 %v8261_v63  ;;  %5040 = vmatprep.subr.bf16.mxu1 %v8264_v0  ;;  %v8343_v63 = vld [vmem:[#allocation2 + $0xf0c] ss:$48 sps:$4 sm:$0xff]   ;;  %v8338_v0 = vld [vmem:[#allocation2 + $0xf00] ss:$48 sps:$4 sm:$0xff]  }
  0xc7   :  { %4877 = vmatpush1.bf16.msra.mxu0 %v8259_v1  ;;  %5041 = vmatpush1.bf16.msra.mxu1 %v8262_v2  ;;  %v8341_v1 = vld [vmem:[#allocation2 + $0xf08] ss:$48 sps:$4 sm:$0xff]   ;;  %v8346_v2 = vld [vmem:[#allocation2 + $0xf64] ss:$48 sps:$4 sm:$0xff]  }
  0xc8   :  { %4878 = vmatprep.subr.bf16.mxu0 %v8267_v3  ;;  %5042 = vmatprep.subr.bf16.mxu1 %v8270_v4  ;;  %v8349_v3 = vld [vmem:[#allocation2 + $0xf6c] ss:$48 sps:$4 sm:$0xff]   ;;  %v8344_v4 = vld [vmem:[#allocation2 + $0xf60] ss:$48 sps:$4 sm:$0xff]  }
  0xcb   :  { %4879 = vmatpush1.bf16.msra.mxu0 %v8265_v5  ;;  %5043 = vmatpush1.bf16.msra.mxu1 %v8268_v6  ;;  %v8347_v5 = vld [vmem:[#allocation2 + $0xf68] ss:$48 sps:$4 sm:$0xff]   ;;  %v8352_v6 = vld [vmem:[#allocation2 + $0xfc4] ss:$48 sps:$4 sm:$0xff]  }
  0xcc   :  { %4880 = vmatprep.subr.bf16.mxu0 %v8273_v7  ;;  %5044 = vmatprep.subr.bf16.mxu1 %v8276_v8  ;;  %v8355_v7 = vld [vmem:[#allocation2 + $0xfcc] ss:$48 sps:$4 sm:$0xff]   ;;  %v8350_v8 = vld [vmem:[#allocation2 + $0xfc0] ss:$48 sps:$4 sm:$0xff]  }
  0xcf   :  { %4881 = vmatpush1.bf16.msra.mxu0 %v8271_v10  ;;  %5045 = vmatpush1.bf16.msra.mxu1 %v8274_v11  ;;  %v8353_v10 = vld [vmem:[#allocation2 + $0xfc8] ss:$48 sps:$4 sm:$0xff]   ;;  %v8358_v11 = vld [vmem:[#allocation2 + $0x1024] ss:$48 sps:$4 sm:$0xff]  }
  0xd0   :  { %4882 = vmatprep.subr.bf16.mxu0 %v8279_v12  ;;  %5046 = vmatprep.subr.bf16.mxu1 %v8282_v13  ;;  %v8361_v12 = vld [vmem:[#allocation2 + $0x102c] ss:$48 sps:$4 sm:$0xff]   ;;  %v8356_v13 = vld [vmem:[#allocation2 + $0x1020] ss:$48 sps:$4 sm:$0xff]  }
  0xd3   :  { %4883 = vmatpush1.bf16.msra.mxu0 %v8277_v14  ;;  %5047 = vmatpush1.bf16.msra.mxu1 %v8280_v15  ;;  %v8359_v14 = vld [vmem:[#allocation2 + $0x1028] ss:$48 sps:$4 sm:$0xff]   ;;  %v8364_v15 = vld [vmem:[#allocation2 + $0x1084] ss:$48 sps:$4 sm:$0xff]  }
  0xd4   :  { %4884 = vmatprep.subr.bf16.mxu0 %v8285_v17  ;;  %5048 = vmatprep.subr.bf16.mxu1 %v8288_v18  ;;  %v8367_v17 = vld [vmem:[#allocation2 + $0x108c] ss:$48 sps:$4 sm:$0xff]   ;;  %v8362_v18 = vld [vmem:[#allocation2 + $0x1080] ss:$48 sps:$4 sm:$0xff]  }
  0xd7   :  { %4885 = vmatpush1.bf16.msra.mxu0 %v8283_v19  ;;  %5049 = vmatpush1.bf16.msra.mxu1 %v8286_v21  ;;  %v8365_v19 = vld [vmem:[#allocation2 + $0x1088] ss:$48 sps:$4 sm:$0xff]   ;;  %v8370_v21 = vld [vmem:[#allocation2 + $0x10e4] ss:$48 sps:$4 sm:$0xff]  }
  0xd8   :  { %4895 = vmatprep.subr.bf16.mxu0 %v8292_v22  ;;  %5059 = vmatprep.subr.bf16.mxu1 %v8295_v23  ;;  %v8373_v22 = vld [vmem:[#allocation2 + $0x10ec] ss:$48 sps:$4 sm:$0xff]   ;;  %v8368_v23 = vld [vmem:[#allocation2 + $0x10e0] ss:$48 sps:$4 sm:$0xff]  }
  0xda   :  { %4887 = vmatmul.mubr.bf16.vlgmr.msra.gmra.mrb[0].mxu0 %v9604_v25  ;;  %5051 = vmatmul.mubr.bf16.vlgmr.msra.gmra.mrb[0].mxu1 %v9604_v25 }
  0xdb   :  { %4896 = vmatpush1.bf16.msra.mxu0 %v8290_v24  ;;  %5060 = vmatpush1.bf16.msra.mxu1 %v8293_v26  ;;  %v8371_v24 = vld [vmem:[#allocation2 + $0x10e8] ss:$48 sps:$4 sm:$0xff]   ;;  %v8376_v26 = vld [vmem:[#allocation2 + $0x1144] ss:$48 sps:$4 sm:$0xff]  }
  0xdc   :  { %4897 = vmatprep.subr.bf16.mxu0 %v8298_v28  ;;  %5061 = vmatprep.subr.bf16.mxu1 %v8301_v29  ;;  %v8379_v28 = vld [vmem:[#allocation2 + $0x114c] ss:$48 sps:$4 sm:$0xff]   ;;  %v108_v29 = vcombine.high %v9609_v27, %v9609_v27 }
  0xdd   :  { %4927 = vmatprep.mubr.bf16.mxu0 %v9619_v35  ;;  %5091 = vmatprep.mubr.bf16.mxu1 %v9619_v35 }
  0xdf   :  { %4898 = vmatpush1.bf16.msra.mxu0 %v8296_v31  ;;  %5062 = vmatpush1.bf16.msra.mxu1 %v8299_v32  ;;  %v8377_v31 = vld [vmem:[#allocation2 + $0x1148] ss:$48 sps:$4 sm:$0xff]   ;;  %v8382_v32 = vld [vmem:[#allocation2 + $0x11a4] ss:$48 sps:$4 sm:$0xff]  }
  0xe0   :  { %4899 = vmatprep.subr.bf16.mxu0 %v8304_v33  ;;  %5063 = vmatprep.subr.bf16.mxu1 %v8307_v34  ;;  %v8385_v33 = vld [vmem:[#allocation2 + $0x11ac] ss:$48 sps:$4 sm:$0xff]   ;;  %v9626_v34 = vrot.slane %v108_v29, %v9579_v49  ;;  %v8389_v49 = vld [vmem:[#allocation2 + $0x1208] ss:$48 sps:$4 sm:$0xff]   ;;  %v8452_v29 = vld [vmem:[#allocation2 + $0x1620] ss:$48 sps:$4 sm:$0xff]  }
  0xe2   :  { %v124_v27 = vcombine.high %v9626_v34, %v9626_v34 }
  0xe3   :  { %4900 = vmatpush1.bf16.msra.mxu0 %v8302_v36  ;;  %5064 = vmatpush1.bf16.msra.mxu1 %v8305_v37  ;;  %v8380_v36 = vld [vmem:[#allocation2 + $0x11a0] ss:$48 sps:$4 sm:$0xff]   ;;  %v8383_v37 = vld [vmem:[#allocation2 + $0x11a8] ss:$48 sps:$4 sm:$0xff]  }
  0xe4   :  { %4901 = vmatprep.subr.bf16.mxu0 %v8310_v39  ;;  %5065 = vmatprep.subr.bf16.mxu1 %v8313_v40  ;;  %v8388_v39 = vld [vmem:[#allocation2 + $0x1204] ss:$48 sps:$4 sm:$0xff]   ;;  %v8391_v40 = vld [vmem:[#allocation2 + $0x120c] ss:$48 sps:$4 sm:$0xff]  }
  0xe7   :  { %4902 = vmatpush1.bf16.msra.mxu0 %v8308_v41  ;;  %5066 = vmatpush1.bf16.msra.mxu1 %v8311_v42  ;;  %v9632_v41 = vpack.c.bf16 %v9613_v30, %v9613_v30  ;;  %v8386_v42 = vld [vmem:[#allocation2 + $0x1200] ss:$48 sps:$4 sm:$0xff]   ;;  %v8400_v30 = vld [vmem:[#allocation2 + $0x12c4] ss:$48 sps:$4 sm:$0xff]  }
  0xe8   :  { %4903 = vmatprep.subr.bf16.mxu0 %v8316_v44  ;;  %5067 = vmatprep.subr.bf16.mxu1 %v8319_v45  ;;  %v8394_v44 = vld [vmem:[#allocation2 + $0x1264] ss:$48 sps:$4 sm:$0xff]   ;;  %v8397_v45 = vld [vmem:[#allocation2 + $0x126c] ss:$48 sps:$4 sm:$0xff]  }
  0xeb   :  { %4904 = vmatpush1.bf16.msra.mxu0 %v8314_v46  ;;  %5068 = vmatpush1.bf16.msra.mxu1 %v8317_v47  ;;  %v9634_v46 = vpack.c.bf16 %v124_v27, %v124_v27  ;;  %v8392_v47 = vld [vmem:[#allocation2 + $0x1260] ss:$48 sps:$4 sm:$0xff]   ;;  %v8467_v27 = vld [vmem:[#allocation2 + $0x16e8] ss:$48 sps:$4 sm:$0xff]  }
  0xec   :  { %4905 = vmatprep.subr.bf16.mxu0 %v8322_v48  ;;  %5069 = vmatprep.subr.bf16.mxu1 %v8325_v50  ;;  %v8395_v48 = vld [vmem:[#allocation2 + $0x1268] ss:$48 sps:$4 sm:$0xff]   ;;  %v8403_v50 = vld [vmem:[#allocation2 + $0x12cc] ss:$48 sps:$4 sm:$0xff]  }
  0xef   :  { %4906 = vmatpush1.bf16.msra.mxu0 %v8320_v51  ;;  %5070 = vmatpush1.bf16.msra.mxu1 %v8323_v52  ;;  %v8398_v51 = vld [vmem:[#allocation2 + $0x12c0] ss:$48 sps:$4 sm:$0xff]   ;;  %v8401_v52 = vld [vmem:[#allocation2 + $0x12c8] ss:$48 sps:$4 sm:$0xff]  }
  0xf0   :  { %4907 = vmatprep.subr.bf16.mxu0 %v8328_v53  ;;  %5071 = vmatprep.subr.bf16.mxu1 %v8331_v54  ;;  %v8406_v53 = vld [vmem:[#allocation2 + $0x1324] ss:$48 sps:$4 sm:$0xff]   ;;  %v8409_v54 = vld [vmem:[#allocation2 + $0x132c] ss:$48 sps:$4 sm:$0xff]  }
  0xf3   :  { %4908 = vmatpush1.bf16.msra.mxu0 %v8326_v55  ;;  %5072 = vmatpush1.bf16.msra.mxu1 %v8329_v56  ;;  %v8404_v55 = vld [vmem:[#allocation2 + $0x1320] ss:$48 sps:$4 sm:$0xff]   ;;  %v8407_v56 = vld [vmem:[#allocation2 + $0x1328] ss:$48 sps:$4 sm:$0xff]  }
  0xf4   :  { %4909 = vmatprep.subr.bf16.mxu0 %v8334_v57  ;;  %5073 = vmatprep.subr.bf16.mxu1 %v8337_v58  ;;  %v8412_v57 = vld [vmem:[#allocation2 + $0x1384] ss:$48 sps:$4 sm:$0xff]   ;;  %v8415_v58 = vld [vmem:[#allocation2 + $0x138c] ss:$48 sps:$4 sm:$0xff]  }
  0xf7   :  { %4910 = vmatpush1.bf16.msra.mxu0 %v8332_v59  ;;  %5074 = vmatpush1.bf16.msra.mxu1 %v8335_v61  ;;  %v8410_v59 = vld [vmem:[#allocation2 + $0x1380] ss:$48 sps:$4 sm:$0xff]   ;;  %v8413_v61 = vld [vmem:[#allocation2 + $0x1388] ss:$48 sps:$4 sm:$0xff]  }
  0xf8   :  { %4911 = vmatprep.subr.bf16.mxu0 %v8340_v62  ;;  %5075 = vmatprep.subr.bf16.mxu1 %v8343_v63  ;;  %v8418_v62 = vld [vmem:[#allocation2 + $0x13e4] ss:$48 sps:$4 sm:$0xff]   ;;  %v8421_v63 = vld [vmem:[#allocation2 + $0x13ec] ss:$48 sps:$4 sm:$0xff]  }
  0xfb   :  { %4912 = vmatpush1.bf16.msra.mxu0 %v8338_v0  ;;  %5076 = vmatpush1.bf16.msra.mxu1 %v8341_v1  ;;  %v8416_v0 = vld [vmem:[#allocation2 + $0x13e0] ss:$48 sps:$4 sm:$0xff]   ;;  %v8419_v1 = vld [vmem:[#allocation2 + $0x13e8] ss:$48 sps:$4 sm:$0xff]  }
  0xfc   :  { %4913 = vmatprep.subr.bf16.mxu0 %v8346_v2  ;;  %5077 = vmatprep.subr.bf16.mxu1 %v8349_v3  ;;  %v8424_v2 = vld [vmem:[#allocation2 + $0x1444] ss:$48 sps:$4 sm:$0xff]   ;;  %v8427_v3 = vld [vmem:[#allocation2 + $0x144c] ss:$48 sps:$4 sm:$0xff]  }
  0xff   :  { %4914 = vmatpush1.bf16.msra.mxu0 %v8344_v4  ;;  %5078 = vmatpush1.bf16.msra.mxu1 %v8347_v5  ;;  %v8422_v4 = vld [vmem:[#allocation2 + $0x1440] ss:$48 sps:$4 sm:$0xff]   ;;  %v8425_v5 = vld [vmem:[#allocation2 + $0x1448] ss:$48 sps:$4 sm:$0xff]  }
 0x100   :  { %4915 = vmatprep.subr.bf16.mxu0 %v8352_v6  ;;  %5079 = vmatprep.subr.bf16.mxu1 %v8355_v7  ;;  %v8430_v6 = vld [vmem:[#allocation2 + $0x14a4] ss:$48 sps:$4 sm:$0xff]   ;;  %v8433_v7 = vld [vmem:[#allocation2 + $0x14ac] ss:$48 sps:$4 sm:$0xff]  }
 0x103   :  { %4916 = vmatpush1.bf16.msra.mxu0 %v8350_v8  ;;  %5080 = vmatpush1.bf16.msra.mxu1 %v8353_v10  ;;  %v8428_v8 = vld [vmem:[#allocation2 + $0x14a0] ss:$48 sps:$4 sm:$0xff]   ;;  %v8431_v10 = vld [vmem:[#allocation2 + $0x14a8] ss:$48 sps:$4 sm:$0xff]  }
 0x104   :  { %4917 = vmatprep.subr.bf16.mxu0 %v8358_v11  ;;  %5081 = vmatprep.subr.bf16.mxu1 %v8361_v12  ;;  %v8436_v11 = vld [vmem:[#allocation2 + $0x1504] ss:$48 sps:$4 sm:$0xff]   ;;  %v8439_v12 = vld [vmem:[#allocation2 + $0x150c] ss:$48 sps:$4 sm:$0xff]  }
 0x107   :  { %4918 = vmatpush1.bf16.msra.mxu0 %v8356_v13  ;;  %5082 = vmatpush1.bf16.msra.mxu1 %v8359_v14  ;;  %v8434_v13 = vld [vmem:[#allocation2 + $0x1500] ss:$48 sps:$4 sm:$0xff]   ;;  %v8437_v14 = vld [vmem:[#allocation2 + $0x1508] ss:$48 sps:$4 sm:$0xff]  }
 0x108   :  { %4919 = vmatprep.subr.bf16.mxu0 %v8364_v15  ;;  %5083 = vmatprep.subr.bf16.mxu1 %v8367_v17  ;;  %v8442_v15 = vld [vmem:[#allocation2 + $0x1564] ss:$48 sps:$4 sm:$0xff]   ;;  %v8445_v17 = vld [vmem:[#allocation2 + $0x156c] ss:$48 sps:$4 sm:$0xff]  }
 0x10b   :  { %4920 = vmatpush1.bf16.msra.mxu0 %v8362_v18  ;;  %5084 = vmatpush1.bf16.msra.mxu1 %v8365_v19  ;;  %v8440_v18 = vld [vmem:[#allocation2 + $0x1560] ss:$48 sps:$4 sm:$0xff]   ;;  %v8443_v19 = vld [vmem:[#allocation2 + $0x1568] ss:$48 sps:$4 sm:$0xff]  }
 0x10c   :  { %4921 = vmatprep.subr.bf16.mxu0 %v8370_v21  ;;  %5085 = vmatprep.subr.bf16.mxu1 %v8373_v22  ;;  %v8448_v21 = vld [vmem:[#allocation2 + $0x15c4] ss:$48 sps:$4 sm:$0xff]   ;;  %v8451_v22 = vld [vmem:[#allocation2 + $0x15cc] ss:$48 sps:$4 sm:$0xff]  }
 0x10f   :  { %4922 = vmatpush1.bf16.msra.mxu0 %v8368_v23  ;;  %5086 = vmatpush1.bf16.msra.mxu1 %v8371_v24  ;;  %v8446_v23 = vld [vmem:[#allocation2 + $0x15c0] ss:$48 sps:$4 sm:$0xff]   ;;  %v8449_v24 = vld [vmem:[#allocation2 + $0x15c8] ss:$48 sps:$4 sm:$0xff]  }
 0x110   :  { %4923 = vmatprep.subr.bf16.mxu0 %v8376_v26  ;;  %5087 = vmatprep.subr.bf16.mxu1 %v8379_v28  ;;  %v8454_v26 = vld [vmem:[#allocation2 + $0x1624] ss:$48 sps:$4 sm:$0xff]   ;;  %v8457_v28 = vld [vmem:[#allocation2 + $0x162c] ss:$48 sps:$4 sm:$0xff]  }
 0x113   :  { %4924 = vmatpush1.bf16.msra.mxu0 %v8374_v9  ;;  %5088 = vmatpush1.bf16.msra.mxu1 %v8377_v31  ;;  %v8455_v9 = vld [vmem:[#allocation2 + $0x1628] ss:$48 sps:$4 sm:$0xff]   ;;  %v8460_v31 = vld [vmem:[#allocation2 + $0x1684] ss:$48 sps:$4 sm:$0xff]  }
 0x114   :  { %4925 = vmatprep.subr.bf16.mxu0 %v8382_v32  ;;  %5089 = vmatprep.subr.bf16.mxu1 %v8385_v33  ;;  %v8463_v32 = vld [vmem:[#allocation2 + $0x168c] ss:$48 sps:$4 sm:$0xff]   ;;  %v8458_v33 = vld [vmem:[#allocation2 + $0x1680] ss:$48 sps:$4 sm:$0xff]  }
 0x117   :  { %4926 = vmatpush1.bf16.msra.mxu0 %v8380_v36  ;;  %5090 = vmatpush1.bf16.msra.mxu1 %v8383_v37  ;;  %v8461_v36 = vld [vmem:[#allocation2 + $0x1688] ss:$48 sps:$4 sm:$0xff]   ;;  %v8466_v37 = vld [vmem:[#allocation2 + $0x16e4] ss:$48 sps:$4 sm:$0xff]  }
 0x118   :  { %4936 = vmatprep.subr.bf16.mxu0 %v8388_v39  ;;  %5100 = vmatprep.subr.bf16.mxu1 %v8391_v40  ;;  %v8469_v39 = vld [vmem:[#allocation2 + $0x16ec] ss:$48 sps:$4 sm:$0xff]   ;;  %v8464_v40 = vld [vmem:[#allocation2 + $0x16e0] ss:$48 sps:$4 sm:$0xff]  }
 0x11a   :  { %4928 = vmatmul.mubr.bf16.vlgmr.msra.gmra.mrb[0].mxu0 %v9632_v41  ;;  %5092 = vmatmul.mubr.bf16.vlgmr.msra.gmra.mrb[0].mxu1 %v9632_v41 }
 0x11b   :  { %4937 = vmatpush1.bf16.msra.mxu0 %v8386_v42  ;;  %5101 = vmatpush1.bf16.msra.mxu1 %v8389_v49  ;;  %v8472_v42 = vld [vmem:[#allocation2 + $0x1744] ss:$48 sps:$4 sm:$0xff]   ;;  %v8475_v49 = vld [vmem:[#allocation2 + $0x174c] ss:$48 sps:$4 sm:$0xff]  }
 0x11c   :  { %4938 = vmatprep.subr.bf16.mxu0 %v8394_v44  ;;  %5102 = vmatprep.subr.bf16.mxu1 %v8397_v45  ;;  %v8470_v44 = vld [vmem:[#allocation2 + $0x1740] ss:$48 sps:$4 sm:$0xff]   ;;  %v8473_v45 = vld [vmem:[#allocation2 + $0x1748] ss:$48 sps:$4 sm:$0xff]  }
 0x11d   :  { %4968 = vmatprep.mubr.bf16.mxu0 %v9634_v46  ;;  %5132 = vmatprep.mubr.bf16.mxu1 %v9634_v46 }
 0x11f   :  { %4939 = vmatpush1.bf16.msra.mxu0 %v8392_v47  ;;  %5103 = vmatpush1.bf16.msra.mxu1 %v8395_v48  ;;  %v8478_v47 = vld [vmem:[#allocation2 + $0x17a4] ss:$48 sps:$4 sm:$0xff]   ;;  %v8481_v48 = vld [vmem:[#allocation2 + $0x17ac] ss:$48 sps:$4 sm:$0xff]  }
 0x120   :  { %4940 = vmatprep.subr.bf16.mxu0 %v8400_v30  ;;  %5104 = vmatprep.subr.bf16.mxu1 %v8403_v50  ;;  %v8476_v30 = vld [vmem:[#allocation2 + $0x17a0] ss:$48 sps:$4 sm:$0xff]   ;;  %v8479_v50 = vld [vmem:[#allocation2 + $0x17a8] ss:$48 sps:$4 sm:$0xff]  }
 0x123   :  { %4941 = vmatpush1.bf16.msra.mxu0 %v8398_v51  ;;  %5105 = vmatpush1.bf16.msra.mxu1 %v8401_v52  ;;  %v8485_v51 = vld [vmem:[#allocation2 + $0x14] ss:$48 sps:$4 sm:$0xff]   ;;  %v8488_v52 = vld [vmem:[#allocation2 + $0x1c] ss:$48 sps:$4 sm:$0xff]  }
 0x124   :  { %4942 = vmatprep.subr.bf16.mxu0 %v8406_v53  ;;  %5106 = vmatprep.subr.bf16.mxu1 %v8409_v54  ;;  %v9642_v53 = vpack.c.bf16 %v9626_v34, %v9626_v34  ;;  %v8483_v54 = vld [vmem:[#allocation2 + $0x10] ss:$48 sps:$4 sm:$0xff]   ;;  %v8497_v34 = vld [vmem:[#allocation2 + $0xd4] ss:$48 sps:$4 sm:$0xff]  }
 0x127   :  { %4943 = vmatpush1.bf16.msra.mxu0 %v8404_v55  ;;  %5107 = vmatpush1.bf16.msra.mxu1 %v8407_v56  ;;  %v8486_v55 = vld [vmem:[#allocation2 + $0x18] ss:$48 sps:$4 sm:$0xff]   ;;  %v8491_v56 = vld [vmem:[#allocation2 + $0x74] ss:$48 sps:$4 sm:$0xff]  }
 0x128   :  { %4944 = vmatprep.subr.bf16.mxu0 %v8412_v57  ;;  %5108 = vmatprep.subr.bf16.mxu1 %v8415_v58  ;;  %v8494_v57 = vld [vmem:[#allocation2 + $0x7c] ss:$48 sps:$4 sm:$0xff]   ;;  %v8489_v58 = vld [vmem:[#allocation2 + $0x70] ss:$48 sps:$4 sm:$0xff]  }
 0x12b   :  { %4945 = vmatpush1.bf16.msra.mxu0 %v8410_v59  ;;  %5109 = vmatpush1.bf16.msra.mxu1 %v8413_v61  ;;  %v8492_v59 = vld [vmem:[#allocation2 + $0x78] ss:$48 sps:$4 sm:$0xff]   ;;  %v8500_v61 = vld [vmem:[#allocation2 + $0xdc] ss:$48 sps:$4 sm:$0xff]  }
 0x12c   :  { %4946 = vmatprep.subr.bf16.mxu0 %v8418_v62  ;;  %5110 = vmatprep.subr.bf16.mxu1 %v8421_v63  ;;  %v8495_v62 = vld [vmem:[#allocation2 + $0xd0] ss:$48 sps:$4 sm:$0xff]   ;;  %v8498_v63 = vld [vmem:[#allocation2 + $0xd8] ss:$48 sps:$4 sm:$0xff]  }
 0x12f   :  { %4947 = vmatpush1.bf16.msra.mxu0 %v8416_v0  ;;  %5111 = vmatpush1.bf16.msra.mxu1 %v8419_v1  ;;  %v8503_v0 = vld [vmem:[#allocation2 + $0x134] ss:$48 sps:$4 sm:$0xff]   ;;  %v8506_v1 = vld [vmem:[#allocation2 + $0x13c] ss:$48 sps:$4 sm:$0xff]  }
 0x130   :  { %4948 = vmatprep.subr.bf16.mxu0 %v8424_v2  ;;  %5112 = vmatprep.subr.bf16.mxu1 %v8427_v3  ;;  %v8501_v2 = vld [vmem:[#allocation2 + $0x130] ss:$48 sps:$4 sm:$0xff]   ;;  %v8504_v3 = vld [vmem:[#allocation2 + $0x138] ss:$48 sps:$4 sm:$0xff]  }
 0x133   :  { %4949 = vmatpush1.bf16.msra.mxu0 %v8422_v4  ;;  %5113 = vmatpush1.bf16.msra.mxu1 %v8425_v5  ;;  %v8509_v4 = vld [vmem:[#allocation2 + $0x194] ss:$48 sps:$4 sm:$0xff]   ;;  %v8512_v5 = vld [vmem:[#allocation2 + $0x19c] ss:$48 sps:$4 sm:$0xff]  }
 0x134   :  { %4950 = vmatprep.subr.bf16.mxu0 %v8430_v6  ;;  %5114 = vmatprep.subr.bf16.mxu1 %v8433_v7  ;;  %v8507_v6 = vld [vmem:[#allocation2 + $0x190] ss:$48 sps:$4 sm:$0xff]   ;;  %v8510_v7 = vld [vmem:[#allocation2 + $0x198] ss:$48 sps:$4 sm:$0xff]  }
 0x137   :  { %4951 = vmatpush1.bf16.msra.mxu0 %v8428_v8  ;;  %5115 = vmatpush1.bf16.msra.mxu1 %v8431_v10  ;;  %v8515_v8 = vld [vmem:[#allocation2 + $0x1f4] ss:$48 sps:$4 sm:$0xff]   ;;  %v8518_v10 = vld [vmem:[#allocation2 + $0x1fc] ss:$48 sps:$4 sm:$0xff]  }
 0x138   :  { %4952 = vmatprep.subr.bf16.mxu0 %v8436_v11  ;;  %5116 = vmatprep.subr.bf16.mxu1 %v8439_v12  ;;  %v8513_v11 = vld [vmem:[#allocation2 + $0x1f0] ss:$48 sps:$4 sm:$0xff]   ;;  %v8516_v12 = vld [vmem:[#allocation2 + $0x1f8] ss:$48 sps:$4 sm:$0xff]  }
 0x13b   :  { %4953 = vmatpush1.bf16.msra.mxu0 %v8434_v13  ;;  %5117 = vmatpush1.bf16.msra.mxu1 %v8437_v14  ;;  %v8521_v13 = vld [vmem:[#allocation2 + $0x254] ss:$48 sps:$4 sm:$0xff]   ;;  %v8524_v14 = vld [vmem:[#allocation2 + $0x25c] ss:$48 sps:$4 sm:$0xff]  }
 0x13c   :  { %4954 = vmatprep.subr.bf16.mxu0 %v8442_v15  ;;  %5118 = vmatprep.subr.bf16.mxu1 %v8445_v17  ;;  %v8519_v15 = vld [vmem:[#allocation2 + $0x250] ss:$48 sps:$4 sm:$0xff]   ;;  %v8522_v17 = vld [vmem:[#allocation2 + $0x258] ss:$48 sps:$4 sm:$0xff]  }
 0x13f   :  { %4955 = vmatpush1.bf16.msra.mxu0 %v8440_v18  ;;  %5119 = vmatpush1.bf16.msra.mxu1 %v8443_v19  ;;  %v8527_v18 = vld [vmem:[#allocation2 + $0x2b4] ss:$48 sps:$4 sm:$0xff]   ;;  %v8530_v19 = vld [vmem:[#allocation2 + $0x2bc] ss:$48 sps:$4 sm:$0xff]  }
 0x140   :  { %4956 = vmatprep.subr.bf16.mxu0 %v8448_v21  ;;  %5120 = vmatprep.subr.bf16.mxu1 %v8451_v22  ;;  %v8525_v21 = vld [vmem:[#allocation2 + $0x2b0] ss:$48 sps:$4 sm:$0xff]   ;;  %v8528_v22 = vld [vmem:[#allocation2 + $0x2b8] ss:$48 sps:$4 sm:$0xff]  }
 0x143   :  { %4957 = vmatpush1.bf16.msra.mxu0 %v8446_v23  ;;  %5121 = vmatpush1.bf16.msra.mxu1 %v8449_v24  ;;  %v8533_v23 = vld [vmem:[#allocation2 + $0x314] ss:$48 sps:$4 sm:$0xff]   ;;  %v8536_v24 = vld [vmem:[#allocation2 + $0x31c] ss:$48 sps:$4 sm:$0xff]  }
 0x144   :  { %4958 = vmatprep.subr.bf16.mxu0 %v8454_v26  ;;  %5122 = vmatprep.subr.bf16.mxu1 %v8457_v28  ;;  %v8531_v26 = vld [vmem:[#allocation2 + $0x310] ss:$48 sps:$4 sm:$0xff]   ;;  %v8534_v28 = vld [vmem:[#allocation2 + $0x318] ss:$48 sps:$4 sm:$0xff]  }
 0x147   :  { %4959 = vmatpush1.bf16.msra.mxu0 %v8452_v29  ;;  %5123 = vmatpush1.bf16.msra.mxu1 %v8455_v9  ;;  %v8539_v29 = vld [vmem:[#allocation2 + $0x374] ss:$48 sps:$4 sm:$0xff]   ;;  %v8542_v9 = vld [vmem:[#allocation2 + $0x37c] ss:$48 sps:$4 sm:$0xff]  }
 0x148   :  { %4960 = vmatprep.subr.bf16.mxu0 %v8460_v31  ;;  %5124 = vmatprep.subr.bf16.mxu1 %v8463_v32  ;;  %v8537_v31 = vld [vmem:[#allocation2 + $0x370] ss:$48 sps:$4 sm:$0xff]   ;;  %v8540_v32 = vld [vmem:[#allocation2 + $0x378] ss:$48 sps:$4 sm:$0xff]  }
 0x14b   :  { %4961 = vmatpush1.bf16.msra.mxu0 %v8458_v33  ;;  %5125 = vmatpush1.bf16.msra.mxu1 %v8461_v36  ;;  %v8545_v33 = vld [vmem:[#allocation2 + $0x3d4] ss:$48 sps:$4 sm:$0xff]   ;;  %v8548_v36 = vld [vmem:[#allocation2 + $0x3dc] ss:$48 sps:$4 sm:$0xff]  }
 0x14c   :  { %4962 = vmatprep.subr.bf16.mxu0 %v8466_v37  ;;  %5126 = vmatprep.subr.bf16.mxu1 %v8469_v39  ;;  %v8543_v37 = vld [vmem:[#allocation2 + $0x3d0] ss:$48 sps:$4 sm:$0xff]   ;;  %v8546_v39 = vld [vmem:[#allocation2 + $0x3d8] ss:$48 sps:$4 sm:$0xff]  }
 0x14f   :  { %4963 = vmatpush1.bf16.msra.mxu0 %v8464_v40  ;;  %5127 = vmatpush1.bf16.msra.mxu1 %v8467_v27  ;;  %v8551_v40 = vld [vmem:[#allocation2 + $0x434] ss:$48 sps:$4 sm:$0xff]   ;;  %v8554_v27 = vld [vmem:[#allocation2 + $0x43c] ss:$48 sps:$4 sm:$0xff]  }
 0x150   :  { %4964 = vmatprep.subr.bf16.mxu0 %v8472_v42  ;;  %5128 = vmatprep.subr.bf16.mxu1 %v8475_v49  ;;  %v8549_v42 = vld [vmem:[#allocation2 + $0x430] ss:$48 sps:$4 sm:$0xff]   ;;  %v8552_v49 = vld [vmem:[#allocation2 + $0x438] ss:$48 sps:$4 sm:$0xff]  }
 0x153   :  { %4965 = vmatpush1.bf16.msra.mxu0 %v8470_v44  ;;  %5129 = vmatpush1.bf16.msra.mxu1 %v8473_v45  ;;  %v8557_v44 = vld [vmem:[#allocation2 + $0x494] ss:$48 sps:$4 sm:$0xff]   ;;  %v8560_v45 = vld [vmem:[#allocation2 + $0x49c] ss:$48 sps:$4 sm:$0xff]  }
 0x154   :  { %4966 = vmatprep.subr.bf16.mxu0 %v8478_v47  ;;  %5130 = vmatprep.subr.bf16.mxu1 %v8481_v48  ;;  %v8555_v47 = vld [vmem:[#allocation2 + $0x490] ss:$48 sps:$4 sm:$0xff]   ;;  %v8558_v48 = vld [vmem:[#allocation2 + $0x498] ss:$48 sps:$4 sm:$0xff]  }
 0x157   :  { %4967 = vmatpush1.bf16.msra.mxu0 %v8476_v30  ;;  %5131 = vmatpush1.bf16.msra.mxu1 %v8479_v50  ;;  %v8563_v30 = vld [vmem:[#allocation2 + $0x4f4] ss:$48 sps:$4 sm:$0xff]   ;;  %v8566_v50 = vld [vmem:[#allocation2 + $0x4fc] ss:$48 sps:$4 sm:$0xff]  }
 0x158   :  { %5141 = vmatprep.subr.bf16.mxu0 %v8485_v51  ;;  %5305 = vmatprep.subr.bf16.mxu1 %v8488_v52  ;;  %v8561_v51 = vld [vmem:[#allocation2 + $0x4f0] ss:$48 sps:$4 sm:$0xff]   ;;  %v8564_v52 = vld [vmem:[#allocation2 + $0x4f8] ss:$48 sps:$4 sm:$0xff]  }
 0x15a   :  { %4969 = vmatmul.mubr.bf16.vlgmr.msra.gmra.mrb[0].mxu0 %v9642_v53  ;;  %5133 = vmatmul.mubr.bf16.vlgmr.msra.gmra.mrb[0].mxu1 %v9642_v53 }
 0x15b   :  { %5142 = vmatpush1.bf16.msra.mxu0 %v8483_v54  ;;  %5306 = vmatpush1.bf16.msra.mxu1 %v8486_v55  ;;  %v8569_v54 = vld [vmem:[#allocation2 + $0x554] ss:$48 sps:$4 sm:$0xff]   ;;  %v8572_v55 = vld [vmem:[#allocation2 + $0x55c] ss:$48 sps:$4 sm:$0xff]  }
 0x15c   :  { %5143 = vmatprep.subr.bf16.mxu0 %v8491_v56  ;;  %5307 = vmatprep.subr.bf16.mxu1 %v8494_v57  ;;  %v8567_v56 = vld [vmem:[#allocation2 + $0x550] ss:$48 sps:$4 sm:$0xff]   ;;  %v8570_v57 = vld [vmem:[#allocation2 + $0x558] ss:$48 sps:$4 sm:$0xff]  }
 0x15d   :  { %5173 = vmatprep.mubr.bf16.mxu0 %v9585_v60  ;;  %5337 = vmatprep.mubr.bf16.mxu1 %v9585_v60 }
 0x15f   :  { %5144 = vmatpush1.bf16.msra.mxu0 %v8489_v58  ;;  %5308 = vmatpush1.bf16.msra.mxu1 %v8492_v59  ;;  %v8575_v58 = vld [vmem:[#allocation2 + $0x5b4] ss:$48 sps:$4 sm:$0xff]   ;;  %v8578_v59 = vld [vmem:[#allocation2 + $0x5bc] ss:$48 sps:$4 sm:$0xff]  }
 0x160   :  { %5145 = vmatprep.subr.bf16.mxu0 %v8497_v34  ;;  %5309 = vmatprep.subr.bf16.mxu1 %v8500_v61  ;;  %v8573_v34 = vld [vmem:[#allocation2 + $0x5b0] ss:$48 sps:$4 sm:$0xff]   ;;  %v8576_v61 = vld [vmem:[#allocation2 + $0x5b8] ss:$48 sps:$4 sm:$0xff]  }
 0x163   :  { %5146 = vmatpush1.bf16.msra.mxu0 %v8495_v62  ;;  %5310 = vmatpush1.bf16.msra.mxu1 %v8498_v63  ;;  %v8581_v62 = vld [vmem:[#allocation2 + $0x614] ss:$48 sps:$4 sm:$0xff]   ;;  %v8584_v63 = vld [vmem:[#allocation2 + $0x61c] ss:$48 sps:$4 sm:$0xff]  }
 0x164   :  { %5147 = vmatprep.subr.bf16.mxu0 %v8503_v0  ;;  %5311 = vmatprep.subr.bf16.mxu1 %v8506_v1  ;;  %v8579_v0 = vld [vmem:[#allocation2 + $0x610] ss:$48 sps:$4 sm:$0xff]   ;;  %v8582_v1 = vld [vmem:[#allocation2 + $0x618] ss:$48 sps:$4 sm:$0xff]  }
 0x167   :  { %5148 = vmatpush1.bf16.msra.mxu0 %v8501_v2  ;;  %5312 = vmatpush1.bf16.msra.mxu1 %v8504_v3  ;;  %v8587_v2 = vld [vmem:[#allocation2 + $0x674] ss:$48 sps:$4 sm:$0xff]   ;;  %v8590_v3 = vld [vmem:[#allocation2 + $0x67c] ss:$48 sps:$4 sm:$0xff]  }
 0x168   :  { %5149 = vmatprep.subr.bf16.mxu0 %v8509_v4  ;;  %5313 = vmatprep.subr.bf16.mxu1 %v8512_v5  ;;  %v8585_v4 = vld [vmem:[#allocation2 + $0x670] ss:$48 sps:$4 sm:$0xff]   ;;  %v8588_v5 = vld [vmem:[#allocation2 + $0x678] ss:$48 sps:$4 sm:$0xff]  }
 0x16b   :  { %5150 = vmatpush1.bf16.msra.mxu0 %v8507_v6  ;;  %5314 = vmatpush1.bf16.msra.mxu1 %v8510_v7  ;;  %v8593_v6 = vld [vmem:[#allocation2 + $0x6d4] ss:$48 sps:$4 sm:$0xff]   ;;  %v8596_v7 = vld [vmem:[#allocation2 + $0x6dc] ss:$48 sps:$4 sm:$0xff]  }
 0x16c   :  { %5151 = vmatprep.subr.bf16.mxu0 %v8515_v8  ;;  %5315 = vmatprep.subr.bf16.mxu1 %v8518_v10  ;;  %v8591_v8 = vld [vmem:[#allocation2 + $0x6d0] ss:$48 sps:$4 sm:$0xff]   ;;  %v8594_v10 = vld [vmem:[#allocation2 + $0x6d8] ss:$48 sps:$4 sm:$0xff]  }
 0x16f   :  { %5152 = vmatpush1.bf16.msra.mxu0 %v8513_v11  ;;  %5316 = vmatpush1.bf16.msra.mxu1 %v8516_v12  ;;  %v8599_v11 = vld [vmem:[#allocation2 + $0x734] ss:$48 sps:$4 sm:$0xff]   ;;  %v8602_v12 = vld [vmem:[#allocation2 + $0x73c] ss:$48 sps:$4 sm:$0xff]  }
 0x170   :  { %5153 = vmatprep.subr.bf16.mxu0 %v8521_v13  ;;  %5317 = vmatprep.subr.bf16.mxu1 %v8524_v14  ;;  %v8597_v13 = vld [vmem:[#allocation2 + $0x730] ss:$48 sps:$4 sm:$0xff]   ;;  %v8600_v14 = vld [vmem:[#allocation2 + $0x738] ss:$48 sps:$4 sm:$0xff]  }
 0x173   :  { %5154 = vmatpush1.bf16.msra.mxu0 %v8519_v15  ;;  %5318 = vmatpush1.bf16.msra.mxu1 %v8522_v17  ;;  %v8605_v15 = vld [vmem:[#allocation2 + $0x794] ss:$48 sps:$4 sm:$0xff]   ;;  %v8608_v17 = vld [vmem:[#allocation2 + $0x79c] ss:$48 sps:$4 sm:$0xff]  }
 0x174   :  { %5155 = vmatprep.subr.bf16.mxu0 %v8527_v18  ;;  %5319 = vmatprep.subr.bf16.mxu1 %v8530_v19  ;;  %v8603_v18 = vld [vmem:[#allocation2 + $0x790] ss:$48 sps:$4 sm:$0xff]   ;;  %v8606_v19 = vld [vmem:[#allocation2 + $0x798] ss:$48 sps:$4 sm:$0xff]  }
 0x177   :  { %5156 = vmatpush1.bf16.msra.mxu0 %v8525_v21  ;;  %5320 = vmatpush1.bf16.msra.mxu1 %v8528_v22  ;;  %v8611_v21 = vld [vmem:[#allocation2 + $0x7f4] ss:$48 sps:$4 sm:$0xff]   ;;  %v8614_v22 = vld [vmem:[#allocation2 + $0x7fc] ss:$48 sps:$4 sm:$0xff]  }
 0x178   :  { %5157 = vmatprep.subr.bf16.mxu0 %v8533_v23  ;;  %5321 = vmatprep.subr.bf16.mxu1 %v8536_v24  ;;  %v8609_v23 = vld [vmem:[#allocation2 + $0x7f0] ss:$48 sps:$4 sm:$0xff]   ;;  %v8612_v24 = vld [vmem:[#allocation2 + $0x7f8] ss:$48 sps:$4 sm:$0xff]  }
 0x17b   :  { %5158 = vmatpush1.bf16.msra.mxu0 %v8531_v26  ;;  %5322 = vmatpush1.bf16.msra.mxu1 %v8534_v28  ;;  %v8617_v26 = vld [vmem:[#allocation2 + $0x854] ss:$48 sps:$4 sm:$0xff]   ;;  %v8620_v28 = vld [vmem:[#allocation2 + $0x85c] ss:$48 sps:$4 sm:$0xff]  }
 0x17c   :  { %5159 = vmatprep.subr.bf16.mxu0 %v8539_v29  ;;  %5323 = vmatprep.subr.bf16.mxu1 %v8542_v9  ;;  %v8615_v29 = vld [vmem:[#allocation2 + $0x850] ss:$48 sps:$4 sm:$0xff]   ;;  %v8618_v9 = vld [vmem:[#allocation2 + $0x858] ss:$48 sps:$4 sm:$0xff]  }
 0x17f   :  { %5160 = vmatpush1.bf16.msra.mxu0 %v8537_v31  ;;  %5324 = vmatpush1.bf16.msra.mxu1 %v8540_v32  ;;  %v8623_v31 = vld [vmem:[#allocation2 + $0x8b4] ss:$48 sps:$4 sm:$0xff]   ;;  %v8626_v32 = vld [vmem:[#allocation2 + $0x8bc] ss:$48 sps:$4 sm:$0xff]  }
 0x180   :  { %5161 = vmatprep.subr.bf16.mxu0 %v8545_v33  ;;  %5325 = vmatprep.subr.bf16.mxu1 %v8548_v36  ;;  %v8621_v33 = vld [vmem:[#allocation2 + $0x8b0] ss:$48 sps:$4 sm:$0xff]   ;;  %v8624_v36 = vld [vmem:[#allocation2 + $0x8b8] ss:$48 sps:$4 sm:$0xff]  }
 0x183   :  { %5162 = vmatpush1.bf16.msra.mxu0 %v8543_v37  ;;  %5326 = vmatpush1.bf16.msra.mxu1 %v8546_v39  ;;  %v8629_v37 = vld [vmem:[#allocation2 + $0x914] ss:$48 sps:$4 sm:$0xff]   ;;  %v8632_v39 = vld [vmem:[#allocation2 + $0x91c] ss:$48 sps:$4 sm:$0xff]  }
 0x184   :  { %5163 = vmatprep.subr.bf16.mxu0 %v8551_v40  ;;  %5327 = vmatprep.subr.bf16.mxu1 %v8554_v27  ;;  %v8627_v40 = vld [vmem:[#allocation2 + $0x910] ss:$48 sps:$4 sm:$0xff]   ;;  %v8630_v27 = vld [vmem:[#allocation2 + $0x918] ss:$48 sps:$4 sm:$0xff]  }
 0x187   :  { %5164 = vmatpush1.bf16.msra.mxu0 %v8549_v42  ;;  %5328 = vmatpush1.bf16.msra.mxu1 %v8552_v49  ;;  %v8635_v42 = vld [vmem:[#allocation2 + $0x974] ss:$48 sps:$4 sm:$0xff]   ;;  %v8638_v49 = vld [vmem:[#allocation2 + $0x97c] ss:$48 sps:$4 sm:$0xff]  }
 0x188   :  { %5165 = vmatprep.subr.bf16.mxu0 %v8557_v44  ;;  %5329 = vmatprep.subr.bf16.mxu1 %v8560_v45  ;;  %v8633_v44 = vld [vmem:[#allocation2 + $0x970] ss:$48 sps:$4 sm:$0xff]   ;;  %v8636_v45 = vld [vmem:[#allocation2 + $0x978] ss:$48 sps:$4 sm:$0xff]  }
 0x18b   :  { %5166 = vmatpush1.bf16.msra.mxu0 %v8555_v47  ;;  %5330 = vmatpush1.bf16.msra.mxu1 %v8558_v48  ;;  %v8641_v47 = vld [vmem:[#allocation2 + $0x9d4] ss:$48 sps:$4 sm:$0xff]   ;;  %v8644_v48 = vld [vmem:[#allocation2 + $0x9dc] ss:$48 sps:$4 sm:$0xff]  }
 0x18c   :  { %5167 = vmatprep.subr.bf16.mxu0 %v8563_v30  ;;  %5331 = vmatprep.subr.bf16.mxu1 %v8566_v50  ;;  %v8639_v30 = vld [vmem:[#allocation2 + $0x9d0] ss:$48 sps:$4 sm:$0xff]   ;;  %v8642_v50 = vld [vmem:[#allocation2 + $0x9d8] ss:$48 sps:$4 sm:$0xff]  }
 0x18f   :  { %5168 = vmatpush1.bf16.msra.mxu0 %v8561_v51  ;;  %5332 = vmatpush1.bf16.msra.mxu1 %v8564_v52  ;;  %v8647_v51 = vld [vmem:[#allocation2 + $0xa34] ss:$48 sps:$4 sm:$0xff]   ;;  %v8650_v52 = vld [vmem:[#allocation2 + $0xa3c] ss:$48 sps:$4 sm:$0xff]  }
 0x190   :  { %5169 = vmatprep.subr.bf16.mxu0 %v8569_v54  ;;  %5333 = vmatprep.subr.bf16.mxu1 %v8572_v55  ;;  %v8645_v54 = vld [vmem:[#allocation2 + $0xa30] ss:$48 sps:$4 sm:$0xff]   ;;  %v8648_v55 = vld [vmem:[#allocation2 + $0xa38] ss:$48 sps:$4 sm:$0xff]  }
 0x193   :  { %5170 = vmatpush1.bf16.msra.mxu0 %v8567_v56  ;;  %5334 = vmatpush1.bf16.msra.mxu1 %v8570_v57  ;;  %v8653_v56 = vld [vmem:[#allocation2 + $0xa94] ss:$48 sps:$4 sm:$0xff]   ;;  %v8656_v57 = vld [vmem:[#allocation2 + $0xa9c] ss:$48 sps:$4 sm:$0xff]  }
 0x194   :  { %5171 = vmatprep.subr.bf16.mxu0 %v8575_v58  ;;  %5335 = vmatprep.subr.bf16.mxu1 %v8578_v59  ;;  %v8651_v58 = vld [vmem:[#allocation2 + $0xa90] ss:$48 sps:$4 sm:$0xff]   ;;  %v8654_v59 = vld [vmem:[#allocation2 + $0xa98] ss:$48 sps:$4 sm:$0xff]  }
 0x197   :  { %5172 = vmatpush1.bf16.msra.mxu0 %v8573_v34  ;;  %5336 = vmatpush1.bf16.msra.mxu1 %v8576_v61  ;;  %v8659_v34 = vld [vmem:[#allocation2 + $0xaf4] ss:$48 sps:$4 sm:$0xff]   ;;  %v8662_v61 = vld [vmem:[#allocation2 + $0xafc] ss:$48 sps:$4 sm:$0xff]  }
 0x198   :  { %5182 = vmatprep.subr.bf16.mxu0 %v8581_v62  ;;  %5346 = vmatprep.subr.bf16.mxu1 %v8584_v63  ;;  %v8657_v62 = vld [vmem:[#allocation2 + $0xaf0] ss:$48 sps:$4 sm:$0xff]   ;;  %v8660_v63 = vld [vmem:[#allocation2 + $0xaf8] ss:$48 sps:$4 sm:$0xff]  }
 0x19a   :  { %5174 = vmatmul.mubr.bf16.vlgmr.msra.gmra.mrb[4].mxu0 %v9594_v16  ;;  %5338 = vmatmul.mubr.bf16.vlgmr.msra.gmra.mrb[4].mxu1 %v9594_v16 }
 0x19b   :  { %5183 = vmatpush1.bf16.msra.mxu0 %v8579_v0  ;;  %5347 = vmatpush1.bf16.msra.mxu1 %v8582_v1  ;;  %v8665_v0 = vld [vmem:[#allocation2 + $0xb54] ss:$48 sps:$4 sm:$0xff]   ;;  %v8668_v1 = vld [vmem:[#allocation2 + $0xb5c] ss:$48 sps:$4 sm:$0xff]  }
 0x19c   :  { %5184 = vmatprep.subr.bf16.mxu0 %v8587_v2  ;;  %5348 = vmatprep.subr.bf16.mxu1 %v8590_v3  ;;  %v8663_v2 = vld [vmem:[#allocation2 + $0xb50] ss:$48 sps:$4 sm:$0xff]   ;;  %v8666_v3 = vld [vmem:[#allocation2 + $0xb58] ss:$48 sps:$4 sm:$0xff]  }
 0x19d   :  { %5214 = vmatprep.mubr.bf16.mxu0 %v9596_v20  ;;  %5378 = vmatprep.mubr.bf16.mxu1 %v9596_v20 }
 0x19f   :  { %5185 = vmatpush1.bf16.msra.mxu0 %v8585_v4  ;;  %5349 = vmatpush1.bf16.msra.mxu1 %v8588_v5  ;;  %v8671_v4 = vld [vmem:[#allocation2 + $0xbb4] ss:$48 sps:$4 sm:$0xff]   ;;  %v8674_v5 = vld [vmem:[#allocation2 + $0xbbc] ss:$48 sps:$4 sm:$0xff]  }
 0x1a0   :  { %5186 = vmatprep.subr.bf16.mxu0 %v8593_v6  ;;  %5350 = vmatprep.subr.bf16.mxu1 %v8596_v7  ;;  %v8669_v6 = vld [vmem:[#allocation2 + $0xbb0] ss:$48 sps:$4 sm:$0xff]   ;;  %v8672_v7 = vld [vmem:[#allocation2 + $0xbb8] ss:$48 sps:$4 sm:$0xff]  }
 0x1a3   :  { %5187 = vmatpush1.bf16.msra.mxu0 %v8591_v8  ;;  %5351 = vmatpush1.bf16.msra.mxu1 %v8594_v10  ;;  %v8677_v8 = vld [vmem:[#allocation2 + $0xc14] ss:$48 sps:$4 sm:$0xff]   ;;  %v8680_v10 = vld [vmem:[#allocation2 + $0xc1c] ss:$48 sps:$4 sm:$0xff]  }
 0x1a4   :  { %5188 = vmatprep.subr.bf16.mxu0 %v8599_v11  ;;  %5352 = vmatprep.subr.bf16.mxu1 %v8602_v12  ;;  %v8675_v11 = vld [vmem:[#allocation2 + $0xc10] ss:$48 sps:$4 sm:$0xff]   ;;  %v8678_v12 = vld [vmem:[#allocation2 + $0xc18] ss:$48 sps:$4 sm:$0xff]  }
 0x1a7   :  { %5189 = vmatpush1.bf16.msra.mxu0 %v8597_v13  ;;  %5353 = vmatpush1.bf16.msra.mxu1 %v8600_v14  ;;  %v8683_v13 = vld [vmem:[#allocation2 + $0xc74] ss:$48 sps:$4 sm:$0xff]   ;;  %v8686_v14 = vld [vmem:[#allocation2 + $0xc7c] ss:$48 sps:$4 sm:$0xff]  }
 0x1a8   :  { %5190 = vmatprep.subr.bf16.mxu0 %v8605_v15  ;;  %5354 = vmatprep.subr.bf16.mxu1 %v8608_v17  ;;  %v8681_v15 = vld [vmem:[#allocation2 + $0xc70] ss:$48 sps:$4 sm:$0xff]   ;;  %v8684_v17 = vld [vmem:[#allocation2 + $0xc78] ss:$48 sps:$4 sm:$0xff]  }
 0x1ab   :  { %5191 = vmatpush1.bf16.msra.mxu0 %v8603_v18  ;;  %5355 = vmatpush1.bf16.msra.mxu1 %v8606_v19  ;;  %v8689_v18 = vld [vmem:[#allocation2 + $0xcd4] ss:$48 sps:$4 sm:$0xff]   ;;  %v8692_v19 = vld [vmem:[#allocation2 + $0xcdc] ss:$48 sps:$4 sm:$0xff]  }
 0x1ac   :  { %5192 = vmatprep.subr.bf16.mxu0 %v8611_v21  ;;  %5356 = vmatprep.subr.bf16.mxu1 %v8614_v22  ;;  %v8687_v21 = vld [vmem:[#allocation2 + $0xcd0] ss:$48 sps:$4 sm:$0xff]   ;;  %v8690_v22 = vld [vmem:[#allocation2 + $0xcd8] ss:$48 sps:$4 sm:$0xff]  }
 0x1af   :  { %5193 = vmatpush1.bf16.msra.mxu0 %v8609_v23  ;;  %5357 = vmatpush1.bf16.msra.mxu1 %v8612_v24  ;;  %v8695_v23 = vld [vmem:[#allocation2 + $0xd34] ss:$48 sps:$4 sm:$0xff]   ;;  %v8698_v24 = vld [vmem:[#allocation2 + $0xd3c] ss:$48 sps:$4 sm:$0xff]  }
 0x1b0   :  { %5194 = vmatprep.subr.bf16.mxu0 %v8617_v26  ;;  %5358 = vmatprep.subr.bf16.mxu1 %v8620_v28  ;;  %v8693_v26 = vld [vmem:[#allocation2 + $0xd30] ss:$48 sps:$4 sm:$0xff]   ;;  %v8696_v28 = vld [vmem:[#allocation2 + $0xd38] ss:$48 sps:$4 sm:$0xff]  }
 0x1b3   :  { %5195 = vmatpush1.bf16.msra.mxu0 %v8615_v29  ;;  %5359 = vmatpush1.bf16.msra.mxu1 %v8618_v9  ;;  %v8701_v29 = vld [vmem:[#allocation2 + $0xd94] ss:$48 sps:$4 sm:$0xff]   ;;  %v8704_v9 = vld [vmem:[#allocation2 + $0xd9c] ss:$48 sps:$4 sm:$0xff]  }
 0x1b4   :  { %5196 = vmatprep.subr.bf16.mxu0 %v8623_v31  ;;  %5360 = vmatprep.subr.bf16.mxu1 %v8626_v32  ;;  %v8699_v31 = vld [vmem:[#allocation2 + $0xd90] ss:$48 sps:$4 sm:$0xff]   ;;  %v8702_v32 = vld [vmem:[#allocation2 + $0xd98] ss:$48 sps:$4 sm:$0xff]  }
 0x1b7   :  { %5197 = vmatpush1.bf16.msra.mxu0 %v8621_v33  ;;  %5361 = vmatpush1.bf16.msra.mxu1 %v8624_v36  ;;  %v8707_v33 = vld [vmem:[#allocation2 + $0xdf4] ss:$48 sps:$4 sm:$0xff]   ;;  %v8710_v36 = vld [vmem:[#allocation2 + $0xdfc] ss:$48 sps:$4 sm:$0xff]  }
 0x1b8   :  { %5198 = vmatprep.subr.bf16.mxu0 %v8629_v37  ;;  %5362 = vmatprep.subr.bf16.mxu1 %v8632_v39  ;;  %v8705_v37 = vld [vmem:[#allocation2 + $0xdf0] ss:$48 sps:$4 sm:$0xff]   ;;  %v8708_v39 = vld [vmem:[#allocation2 + $0xdf8] ss:$48 sps:$4 sm:$0xff]  }
 0x1bb   :  { %5199 = vmatpush1.bf16.msra.mxu0 %v8627_v40  ;;  %5363 = vmatpush1.bf16.msra.mxu1 %v8630_v27  ;;  %v8713_v40 = vld [vmem:[#allocation2 + $0xe54] ss:$48 sps:$4 sm:$0xff]   ;;  %v8716_v27 = vld [vmem:[#allocation2 + $0xe5c] ss:$48 sps:$4 sm:$0xff]  }
 0x1bc   :  { %5200 = vmatprep.subr.bf16.mxu0 %v8635_v42  ;;  %5364 = vmatprep.subr.bf16.mxu1 %v8638_v49  ;;  %v8711_v42 = vld [vmem:[#allocation2 + $0xe50] ss:$48 sps:$4 sm:$0xff]   ;;  %v8714_v49 = vld [vmem:[#allocation2 + $0xe58] ss:$48 sps:$4 sm:$0xff]  }
 0x1bf   :  { %5201 = vmatpush1.bf16.msra.mxu0 %v8633_v44  ;;  %5365 = vmatpush1.bf16.msra.mxu1 %v8636_v45  ;;  %v8719_v44 = vld [vmem:[#allocation2 + $0xeb4] ss:$48 sps:$4 sm:$0xff]   ;;  %v8722_v45 = vld [vmem:[#allocation2 + $0xebc] ss:$48 sps:$4 sm:$0xff]  }
 0x1c0   :  { %5202 = vmatprep.subr.bf16.mxu0 %v8641_v47  ;;  %5366 = vmatprep.subr.bf16.mxu1 %v8644_v48  ;;  %v8717_v47 = vld [vmem:[#allocation2 + $0xeb0] ss:$48 sps:$4 sm:$0xff]   ;;  %v8720_v48 = vld [vmem:[#allocation2 + $0xeb8] ss:$48 sps:$4 sm:$0xff]  }
 0x1c3   :  { %5203 = vmatpush1.bf16.msra.mxu0 %v8639_v30  ;;  %5367 = vmatpush1.bf16.msra.mxu1 %v8642_v50  ;;  %v8725_v30 = vld [vmem:[#allocation2 + $0xf14] ss:$48 sps:$4 sm:$0xff]   ;;  %v8728_v50 = vld [vmem:[#allocation2 + $0xf1c] ss:$48 sps:$4 sm:$0xff]  }
 0x1c4   :  { %5204 = vmatprep.subr.bf16.mxu0 %v8647_v51  ;;  %5368 = vmatprep.subr.bf16.mxu1 %v8650_v52  ;;  %v8723_v51 = vld [vmem:[#allocation2 + $0xf10] ss:$48 sps:$4 sm:$0xff]   ;;  %v8726_v52 = vld [vmem:[#allocation2 + $0xf18] ss:$48 sps:$4 sm:$0xff]  }
 0x1c7   :  { %5205 = vmatpush1.bf16.msra.mxu0 %v8645_v54  ;;  %5369 = vmatpush1.bf16.msra.mxu1 %v8648_v55  ;;  %v8731_v54 = vld [vmem:[#allocation2 + $0xf74] ss:$48 sps:$4 sm:$0xff]   ;;  %v8734_v55 = vld [vmem:[#allocation2 + $0xf7c] ss:$48 sps:$4 sm:$0xff]  }
 0x1c8   :  { %5206 = vmatprep.subr.bf16.mxu0 %v8653_v56  ;;  %5370 = vmatprep.subr.bf16.mxu1 %v8656_v57  ;;  %v8729_v56 = vld [vmem:[#allocation2 + $0xf70] ss:$48 sps:$4 sm:$0xff]   ;;  %v8732_v57 = vld [vmem:[#allocation2 + $0xf78] ss:$48 sps:$4 sm:$0xff]  }
 0x1cb   :  { %5207 = vmatpush1.bf16.msra.mxu0 %v8651_v58  ;;  %5371 = vmatpush1.bf16.msra.mxu1 %v8654_v59  ;;  %v8737_v58 = vld [vmem:[#allocation2 + $0xfd4] ss:$48 sps:$4 sm:$0xff]   ;;  %v8740_v59 = vld [vmem:[#allocation2 + $0xfdc] ss:$48 sps:$4 sm:$0xff]  }
 0x1cc   :  { %5208 = vmatprep.subr.bf16.mxu0 %v8659_v34  ;;  %5372 = vmatprep.subr.bf16.mxu1 %v8662_v61  ;;  %v8735_v34 = vld [vmem:[#allocation2 + $0xfd0] ss:$48 sps:$4 sm:$0xff]   ;;  %v8738_v61 = vld [vmem:[#allocation2 + $0xfd8] ss:$48 sps:$4 sm:$0xff]  }
 0x1cf   :  { %5209 = vmatpush1.bf16.msra.mxu0 %v8657_v62  ;;  %5373 = vmatpush1.bf16.msra.mxu1 %v8660_v63  ;;  %v8743_v62 = vld [vmem:[#allocation2 + $0x1034] ss:$48 sps:$4 sm:$0xff]   ;;  %v8746_v63 = vld [vmem:[#allocation2 + $0x103c] ss:$48 sps:$4 sm:$0xff]  }
 0x1d0   :  { %5210 = vmatprep.subr.bf16.mxu0 %v8665_v0  ;;  %5374 = vmatprep.subr.bf16.mxu1 %v8668_v1  ;;  %v8741_v0 = vld [vmem:[#allocation2 + $0x1030] ss:$48 sps:$4 sm:$0xff]   ;;  %v8744_v1 = vld [vmem:[#allocation2 + $0x1038] ss:$48 sps:$4 sm:$0xff]  }
 0x1d3   :  { %5211 = vmatpush1.bf16.msra.mxu0 %v8663_v2  ;;  %5375 = vmatpush1.bf16.msra.mxu1 %v8666_v3  ;;  %v8749_v2 = vld [vmem:[#allocation2 + $0x1094] ss:$48 sps:$4 sm:$0xff]   ;;  %v8752_v3 = vld [vmem:[#allocation2 + $0x109c] ss:$48 sps:$4 sm:$0xff]  }
 0x1d4   :  { %5212 = vmatprep.subr.bf16.mxu0 %v8671_v4  ;;  %5376 = vmatprep.subr.bf16.mxu1 %v8674_v5  ;;  %v8747_v4 = vld [vmem:[#allocation2 + $0x1090] ss:$48 sps:$4 sm:$0xff]   ;;  %v8750_v5 = vld [vmem:[#allocation2 + $0x1098] ss:$48 sps:$4 sm:$0xff]  }
 0x1d7   :  { %5213 = vmatpush1.bf16.msra.mxu0 %v8669_v6  ;;  %5377 = vmatpush1.bf16.msra.mxu1 %v8672_v7  ;;  %v8755_v6 = vld [vmem:[#allocation2 + $0x10f4] ss:$48 sps:$4 sm:$0xff]   ;;  %v8758_v7 = vld [vmem:[#allocation2 + $0x10fc] ss:$48 sps:$4 sm:$0xff]  }
 0x1d8   :  { %5223 = vmatprep.subr.bf16.mxu0 %v8677_v8  ;;  %5387 = vmatprep.subr.bf16.mxu1 %v8680_v10  ;;  %v8753_v8 = vld [vmem:[#allocation2 + $0x10f0] ss:$48 sps:$4 sm:$0xff]   ;;  %v8756_v10 = vld [vmem:[#allocation2 + $0x10f8] ss:$48 sps:$4 sm:$0xff]  }
 0x1da   :  { %5215 = vmatmul.mubr.bf16.vlgmr.msra.gmra.mrb[4].mxu0 %v9604_v25  ;;  %5379 = vmatmul.mubr.bf16.vlgmr.msra.gmra.mrb[4].mxu1 %v9604_v25 }
 0x1db   :  { %5224 = vmatpush1.bf16.msra.mxu0 %v8675_v11  ;;  %5388 = vmatpush1.bf16.msra.mxu1 %v8678_v12  ;;  %v8761_v11 = vld [vmem:[#allocation2 + $0x1154] ss:$48 sps:$4 sm:$0xff]   ;;  %v8764_v12 = vld [vmem:[#allocation2 + $0x115c] ss:$48 sps:$4 sm:$0xff]  }
 0x1dc   :  { %5225 = vmatprep.subr.bf16.mxu0 %v8683_v13  ;;  %5389 = vmatprep.subr.bf16.mxu1 %v8686_v14  ;;  %v8759_v13 = vld [vmem:[#allocation2 + $0x1150] ss:$48 sps:$4 sm:$0xff]   ;;  %v8762_v14 = vld [vmem:[#allocation2 + $0x1158] ss:$48 sps:$4 sm:$0xff]  }
 0x1dd   :  { %5255 = vmatprep.mubr.bf16.mxu0 %v9619_v35  ;;  %5419 = vmatprep.mubr.bf16.mxu1 %v9619_v35 }
 0x1df   :  { %5226 = vmatpush1.bf16.msra.mxu0 %v8681_v15  ;;  %5390 = vmatpush1.bf16.msra.mxu1 %v8684_v17  ;;  %v8767_v15 = vld [vmem:[#allocation2 + $0x11b4] ss:$48 sps:$4 sm:$0xff]   ;;  %v8770_v17 = vld [vmem:[#allocation2 + $0x11bc] ss:$48 sps:$4 sm:$0xff]  }
 0x1e0   :  { %5227 = vmatprep.subr.bf16.mxu0 %v8689_v18  ;;  %5391 = vmatprep.subr.bf16.mxu1 %v8692_v19  ;;  %v8765_v18 = vld [vmem:[#allocation2 + $0x11b0] ss:$48 sps:$4 sm:$0xff]   ;;  %v8768_v19 = vld [vmem:[#allocation2 + $0x11b8] ss:$48 sps:$4 sm:$0xff]  }
 0x1e3   :  { %5228 = vmatpush1.bf16.msra.mxu0 %v8687_v21  ;;  %5392 = vmatpush1.bf16.msra.mxu1 %v8690_v22  ;;  %v8773_v21 = vld [vmem:[#allocation2 + $0x1214] ss:$48 sps:$4 sm:$0xff]   ;;  %v8776_v22 = vld [vmem:[#allocation2 + $0x121c] ss:$48 sps:$4 sm:$0xff]  }
 0x1e4   :  { %5229 = vmatprep.subr.bf16.mxu0 %v8695_v23  ;;  %5393 = vmatprep.subr.bf16.mxu1 %v8698_v24  ;;  %v8771_v23 = vld [vmem:[#allocation2 + $0x1210] ss:$48 sps:$4 sm:$0xff]   ;;  %v8774_v24 = vld [vmem:[#allocation2 + $0x1218] ss:$48 sps:$4 sm:$0xff]  }
 0x1e7   :  { %5230 = vmatpush1.bf16.msra.mxu0 %v8693_v26  ;;  %5394 = vmatpush1.bf16.msra.mxu1 %v8696_v28  ;;  %v8779_v26 = vld [vmem:[#allocation2 + $0x1274] ss:$48 sps:$4 sm:$0xff]   ;;  %v8782_v28 = vld [vmem:[#allocation2 + $0x127c] ss:$48 sps:$4 sm:$0xff]  }
 0x1e8   :  { %5231 = vmatprep.subr.bf16.mxu0 %v8701_v29  ;;  %5395 = vmatprep.subr.bf16.mxu1 %v8704_v9  ;;  %v8777_v29 = vld [vmem:[#allocation2 + $0x1270] ss:$48 sps:$4 sm:$0xff]   ;;  %v8780_v9 = vld [vmem:[#allocation2 + $0x1278] ss:$48 sps:$4 sm:$0xff]  }
 0x1eb   :  { %5232 = vmatpush1.bf16.msra.mxu0 %v8699_v31  ;;  %5396 = vmatpush1.bf16.msra.mxu1 %v8702_v32  ;;  %v8785_v31 = vld [vmem:[#allocation2 + $0x12d4] ss:$48 sps:$4 sm:$0xff]   ;;  %v8788_v32 = vld [vmem:[#allocation2 + $0x12dc] ss:$48 sps:$4 sm:$0xff]  }
 0x1ec   :  { %5233 = vmatprep.subr.bf16.mxu0 %v8707_v33  ;;  %5397 = vmatprep.subr.bf16.mxu1 %v8710_v36  ;;  %v8783_v33 = vld [vmem:[#allocation2 + $0x12d0] ss:$48 sps:$4 sm:$0xff]   ;;  %v8786_v36 = vld [vmem:[#allocation2 + $0x12d8] ss:$48 sps:$4 sm:$0xff]  }
 0x1ef   :  { %5234 = vmatpush1.bf16.msra.mxu0 %v8705_v37  ;;  %5398 = vmatpush1.bf16.msra.mxu1 %v8708_v39  ;;  %v8791_v37 = vld [vmem:[#allocation2 + $0x1334] ss:$48 sps:$4 sm:$0xff]   ;;  %v8794_v39 = vld [vmem:[#allocation2 + $0x133c] ss:$48 sps:$4 sm:$0xff]  }
 0x1f0   :  { %5235 = vmatprep.subr.bf16.mxu0 %v8713_v40  ;;  %5399 = vmatprep.subr.bf16.mxu1 %v8716_v27  ;;  %v8789_v40 = vld [vmem:[#allocation2 + $0x1330] ss:$48 sps:$4 sm:$0xff]   ;;  %v8792_v27 = vld [vmem:[#allocation2 + $0x1338] ss:$48 sps:$4 sm:$0xff]  }
 0x1f3   :  { %5236 = vmatpush1.bf16.msra.mxu0 %v8711_v42  ;;  %5400 = vmatpush1.bf16.msra.mxu1 %v8714_v49  ;;  %v8797_v42 = vld [vmem:[#allocation2 + $0x1394] ss:$48 sps:$4 sm:$0xff]   ;;  %v8800_v49 = vld [vmem:[#allocation2 + $0x139c] ss:$48 sps:$4 sm:$0xff]  }
 0x1f4   :  { %5237 = vmatprep.subr.bf16.mxu0 %v8719_v44  ;;  %5401 = vmatprep.subr.bf16.mxu1 %v8722_v45  ;;  %v8795_v44 = vld [vmem:[#allocation2 + $0x1390] ss:$48 sps:$4 sm:$0xff]   ;;  %v8798_v45 = vld [vmem:[#allocation2 + $0x1398] ss:$48 sps:$4 sm:$0xff]  }
 0x1f7   :  { %5238 = vmatpush1.bf16.msra.mxu0 %v8717_v47  ;;  %5402 = vmatpush1.bf16.msra.mxu1 %v8720_v48  ;;  %v8803_v47 = vld [vmem:[#allocation2 + $0x13f4] ss:$48 sps:$4 sm:$0xff]   ;;  %v8806_v48 = vld [vmem:[#allocation2 + $0x13fc] ss:$48 sps:$4 sm:$0xff]  }
 0x1f8   :  { %5239 = vmatprep.subr.bf16.mxu0 %v8725_v30  ;;  %5403 = vmatprep.subr.bf16.mxu1 %v8728_v50  ;;  %v8801_v30 = vld [vmem:[#allocation2 + $0x13f0] ss:$48 sps:$4 sm:$0xff]   ;;  %v8804_v50 = vld [vmem:[#allocation2 + $0x13f8] ss:$48 sps:$4 sm:$0xff]  }
 0x1fb   :  { %5240 = vmatpush1.bf16.msra.mxu0 %v8723_v51  ;;  %5404 = vmatpush1.bf16.msra.mxu1 %v8726_v52  ;;  %v8809_v51 = vld [vmem:[#allocation2 + $0x1454] ss:$48 sps:$4 sm:$0xff]   ;;  %v8812_v52 = vld [vmem:[#allocation2 + $0x145c] ss:$48 sps:$4 sm:$0xff]  }
 0x1fc   :  { %5241 = vmatprep.subr.bf16.mxu0 %v8731_v54  ;;  %5405 = vmatprep.subr.bf16.mxu1 %v8734_v55 }
 0x1ff   :  { %5242 = vmatpush1.bf16.msra.mxu0 %v8729_v56  ;;  %5406 = vmatpush1.bf16.msra.mxu1 %v8732_v57 }
 0x200   :  { %5243 = vmatprep.subr.bf16.mxu0 %v8737_v58  ;;  %5407 = vmatprep.subr.bf16.mxu1 %v8740_v59 }
 0x203   :  { %5244 = vmatpush1.bf16.msra.mxu0 %v8735_v34  ;;  %5408 = vmatpush1.bf16.msra.mxu1 %v8738_v61  ;;  %v8807_v34 = vld [vmem:[#allocation2 + $0x1450] ss:$48 sps:$4 sm:$0xff]   ;;  %v8810_v61 = vld [vmem:[#allocation2 + $0x1458] ss:$48 sps:$4 sm:$0xff]  }
 0x204   :  { %5245 = vmatprep.subr.bf16.mxu0 %v8743_v62  ;;  %5409 = vmatprep.subr.bf16.mxu1 %v8746_v63 }
 0x207   :  { %5246 = vmatpush1.bf16.msra.mxu0 %v8741_v0  ;;  %5410 = vmatpush1.bf16.msra.mxu1 %v8744_v1  ;;  %v8815_v0 = vld [vmem:[#allocation2 + $0x14b4] ss:$48 sps:$4 sm:$0xff]   ;;  %v8818_v1 = vld [vmem:[#allocation2 + $0x14bc] ss:$48 sps:$4 sm:$0xff]  }
 0x208   :  { %5247 = vmatprep.subr.bf16.mxu0 %v8749_v2  ;;  %5411 = vmatprep.subr.bf16.mxu1 %v8752_v3  ;;  %v8813_v2 = vld [vmem:[#allocation2 + $0x14b0] ss:$48 sps:$4 sm:$0xff]   ;;  %v8816_v3 = vld [vmem:[#allocation2 + $0x14b8] ss:$48 sps:$4 sm:$0xff]  }
 0x20b   :  { %5248 = vmatpush1.bf16.msra.mxu0 %v8747_v4  ;;  %5412 = vmatpush1.bf16.msra.mxu1 %v8750_v5  ;;  %v8821_v4 = vld [vmem:[#allocation2 + $0x1514] ss:$48 sps:$4 sm:$0xff]   ;;  %v8824_v5 = vld [vmem:[#allocation2 + $0x151c] ss:$48 sps:$4 sm:$0xff]  }
 0x20c   :  { %5249 = vmatprep.subr.bf16.mxu0 %v8755_v6  ;;  %5413 = vmatprep.subr.bf16.mxu1 %v8758_v7  ;;  %v8819_v6 = vld [vmem:[#allocation2 + $0x1510] ss:$48 sps:$4 sm:$0xff]   ;;  %v8822_v7 = vld [vmem:[#allocation2 + $0x1518] ss:$48 sps:$4 sm:$0xff]  }
 0x20f   :  { %5250 = vmatpush1.bf16.msra.mxu0 %v8753_v8  ;;  %5414 = vmatpush1.bf16.msra.mxu1 %v8756_v10  ;;  %v8827_v8 = vld [vmem:[#allocation2 + $0x1574] ss:$48 sps:$4 sm:$0xff]   ;;  %v8830_v10 = vld [vmem:[#allocation2 + $0x157c] ss:$48 sps:$4 sm:$0xff]  }
 0x210   :  { %5251 = vmatprep.subr.bf16.mxu0 %v8761_v11  ;;  %5415 = vmatprep.subr.bf16.mxu1 %v8764_v12  ;;  %v8825_v11 = vld [vmem:[#allocation2 + $0x1570] ss:$48 sps:$4 sm:$0xff]   ;;  %v8828_v12 = vld [vmem:[#allocation2 + $0x1578] ss:$48 sps:$4 sm:$0xff]  }
 0x213   :  { %5252 = vmatpush1.bf16.msra.mxu0 %v8759_v13  ;;  %5416 = vmatpush1.bf16.msra.mxu1 %v8762_v14  ;;  %v8833_v13 = vld [vmem:[#allocation2 + $0x15d4] ss:$48 sps:$4 sm:$0xff]   ;;  %v8836_v14 = vld [vmem:[#allocation2 + $0x15dc] ss:$48 sps:$4 sm:$0xff]  }
 0x214   :  { %5253 = vmatprep.subr.bf16.mxu0 %v8767_v15  ;;  %5417 = vmatprep.subr.bf16.mxu1 %v8770_v17  ;;  %v8831_v15 = vld [vmem:[#allocation2 + $0x15d0] ss:$48 sps:$4 sm:$0xff]   ;;  %v8834_v17 = vld [vmem:[#allocation2 + $0x15d8] ss:$48 sps:$4 sm:$0xff]  }
 0x217   :  { %5254 = vmatpush1.bf16.msra.mxu0 %v8765_v18  ;;  %5418 = vmatpush1.bf16.msra.mxu1 %v8768_v19  ;;  %v8839_v18 = vld [vmem:[#allocation2 + $0x1634] ss:$48 sps:$4 sm:$0xff]   ;;  %v8842_v19 = vld [vmem:[#allocation2 + $0x163c] ss:$48 sps:$4 sm:$0xff]  }
 0x218   :  { %5264 = vmatprep.subr.bf16.mxu0 %v8773_v21  ;;  %5428 = vmatprep.subr.bf16.mxu1 %v8776_v22  ;;  %v8837_v21 = vld [vmem:[#allocation2 + $0x1630] ss:$48 sps:$4 sm:$0xff]   ;;  %v8840_v22 = vld [vmem:[#allocation2 + $0x1638] ss:$48 sps:$4 sm:$0xff]  }
 0x21a   :  { %5256 = vmatmul.mubr.bf16.vlgmr.msra.gmra.mrb[4].mxu0 %v9632_v41  ;;  %5420 = vmatmul.mubr.bf16.vlgmr.msra.gmra.mrb[4].mxu1 %v9632_v41 }
 0x21b   :  { %5265 = vmatpush1.bf16.msra.mxu0 %v8771_v23  ;;  %5429 = vmatpush1.bf16.msra.mxu1 %v8774_v24  ;;  %v8845_v23 = vld [vmem:[#allocation2 + $0x1694] ss:$48 sps:$4 sm:$0xff]   ;;  %v8848_v24 = vld [vmem:[#allocation2 + $0x169c] ss:$48 sps:$4 sm:$0xff]  }
 0x21c   :  { %5266 = vmatprep.subr.bf16.mxu0 %v8779_v26  ;;  %5430 = vmatprep.subr.bf16.mxu1 %v8782_v28  ;;  %v8843_v26 = vld [vmem:[#allocation2 + $0x1690] ss:$48 sps:$4 sm:$0xff]   ;;  %v8846_v28 = vld [vmem:[#allocation2 + $0x1698] ss:$48 sps:$4 sm:$0xff]  }
 0x21d   :  { %5296 = vmatprep.mubr.bf16.mxu0 %v9634_v46  ;;  %5460 = vmatprep.mubr.bf16.mxu1 %v9634_v46 }
 0x21f   :  { %5267 = vmatpush1.bf16.msra.mxu0 %v8777_v29  ;;  %5431 = vmatpush1.bf16.msra.mxu1 %v8780_v9  ;;  %v8851_v29 = vld [vmem:[#allocation2 + $0x16f4] ss:$48 sps:$4 sm:$0xff]   ;;  %v8854_v9 = vld [vmem:[#allocation2 + $0x16fc] ss:$48 sps:$4 sm:$0xff]  }
 0x220   :  { %5268 = vmatprep.subr.bf16.mxu0 %v8785_v31  ;;  %5432 = vmatprep.subr.bf16.mxu1 %v8788_v32  ;;  %v8849_v31 = vld [vmem:[#allocation2 + $0x16f0] ss:$48 sps:$4 sm:$0xff]   ;;  %v8852_v32 = vld [vmem:[#allocation2 + $0x16f8] ss:$48 sps:$4 sm:$0xff]  }
 0x223   :  { %5269 = vmatpush1.bf16.msra.mxu0 %v8783_v33  ;;  %5433 = vmatpush1.bf16.msra.mxu1 %v8786_v36  ;;  %v8857_v33 = vld [vmem:[#allocation2 + $0x1754] ss:$48 sps:$4 sm:$0xff]   ;;  %v8860_v36 = vld [vmem:[#allocation2 + $0x175c] ss:$48 sps:$4 sm:$0xff]  }
 0x224   :  { %5270 = vmatprep.subr.bf16.mxu0 %v8791_v37  ;;  %5434 = vmatprep.subr.bf16.mxu1 %v8794_v39  ;;  %v8855_v37 = vld [vmem:[#allocation2 + $0x1750] ss:$48 sps:$4 sm:$0xff]   ;;  %v8858_v39 = vld [vmem:[#allocation2 + $0x1758] ss:$48 sps:$4 sm:$0xff]  }
 0x227   :  { %5271 = vmatpush1.bf16.msra.mxu0 %v8789_v40  ;;  %5435 = vmatpush1.bf16.msra.mxu1 %v8792_v27  ;;  %v8863_v40 = vld [vmem:[#allocation2 + $0x17b4] ss:$48 sps:$4 sm:$0xff]   ;;  %v8866_v27 = vld [vmem:[#allocation2 + $0x17bc] ss:$48 sps:$4 sm:$0xff]  }
 0x228   :  { %5272 = vmatprep.subr.bf16.mxu0 %v8797_v42  ;;  %5436 = vmatprep.subr.bf16.mxu1 %v8800_v49  ;;  %v8861_v42 = vld [vmem:[#allocation2 + $0x17b0] ss:$48 sps:$4 sm:$0xff]   ;;  %v8864_v49 = vld [vmem:[#allocation2 + $0x17b8] ss:$48 sps:$4 sm:$0xff]  }
 0x22b   :  { %5273 = vmatpush1.bf16.msra.mxu0 %v8795_v44  ;;  %5437 = vmatpush1.bf16.msra.mxu1 %v8798_v45  ;;  %v8869_v44 = vld [vmem:[#allocation2 + $0x24] ss:$48 sps:$4 sm:$0xff]   ;;  %v8872_v45 = vld [vmem:[#allocation2 + $0x2c] ss:$48 sps:$4 sm:$0xff]  }
 0x22c   :  { %5274 = vmatprep.subr.bf16.mxu0 %v8803_v47  ;;  %5438 = vmatprep.subr.bf16.mxu1 %v8806_v48  ;;  %v8867_v47 = vld [vmem:[#allocation2 + $0x20] ss:$48 sps:$4 sm:$0xff]   ;;  %v8870_v48 = vld [vmem:[#allocation2 + $0x28] ss:$48 sps:$4 sm:$0xff]  }
 0x22d   :  { %v9660_v54 = vpop.f32.mrb[0].mxu0  ;;  %v9662_v55 = vpop.f32.mrb[0].mxu1 }
 0x22e   :  { %v9664_v56 = vpop.f32.mrb[1].mxu0  ;;  %v9666_v57 = vpop.f32.mrb[1].mxu1 }
 0x22f   :  { %v4974_v58 = vpop.f32.mrb[2].mxu0  ;;  %v5138_v59 = vpop.f32.mrb[2].mxu1  ;;  %5275 = vmatpush1.bf16.msra.mxu0 %v8801_v30  ;;  %5439 = vmatpush1.bf16.msra.mxu1 %v8804_v50  ;;  %v8875_v30 = vld [vmem:[#allocation2 + $0x84] ss:$48 sps:$4 sm:$0xff]   ;;  %v8878_v50 = vld [vmem:[#allocation2 + $0x8c] ss:$48 sps:$4 sm:$0xff]  }
 0x230   :  { %v4975_v62 = vpop.f32.mrb[3].mxu0  ;;  %v5139_v63 = vpop.f32.mrb[3].mxu1  ;;  %5276 = vmatprep.subr.bf16.mxu0 %v8809_v51  ;;  %5440 = vmatprep.subr.bf16.mxu1 %v8812_v52  ;;  %v8873_v51 = vld [vmem:[#allocation2 + $0x80] ss:$48 sps:$4 sm:$0xff]   ;;  %v8876_v52 = vld [vmem:[#allocation2 + $0x88] ss:$48 sps:$4 sm:$0xff]  }
 0x231   :  { %v8881_v58 = vld [vmem:[#allocation2 + $0xe4] ss:$48 sps:$4 sm:$0xff]   ;;  %v8884_v59 = vld [vmem:[#allocation2 + $0xec] ss:$48 sps:$4 sm:$0xff]  }
 0x232   :  { %v8887_v62 = vld [vmem:[#allocation2 + $0x144] ss:$48 sps:$4 sm:$0xff]   ;;  %v8890_v63 = vld [vmem:[#allocation2 + $0x14c] ss:$48 sps:$4 sm:$0xff]  }
 0x233   :  { %5277 = vmatpush1.bf16.msra.mxu0 %v8807_v34  ;;  %5441 = vmatpush1.bf16.msra.mxu1 %v8810_v61  ;;  %v8879_v34 = vld [vmem:[#allocation2 + $0xe0] ss:$48 sps:$4 sm:$0xff]   ;;  %v8882_v61 = vld [vmem:[#allocation2 + $0xe8] ss:$48 sps:$4 sm:$0xff]  }
 0x234   :  { %5278 = vmatprep.subr.bf16.mxu0 %v8815_v0  ;;  %5442 = vmatprep.subr.bf16.mxu1 %v8818_v1  ;;  %v8885_v0 = vld [vmem:[#allocation2 + $0x140] ss:$48 sps:$4 sm:$0xff]   ;;  %v8888_v1 = vld [vmem:[#allocation2 + $0x148] ss:$48 sps:$4 sm:$0xff]  }
 0x237   :  { %5279 = vmatpush1.bf16.msra.mxu0 %v8813_v2  ;;  %5443 = vmatpush1.bf16.msra.mxu1 %v8816_v3  ;;  %v8893_v2 = vld [vmem:[#allocation2 + $0x1a4] ss:$48 sps:$4 sm:$0xff]   ;;  %v8896_v3 = vld [vmem:[#allocation2 + $0x1ac] ss:$48 sps:$4 sm:$0xff]  }
 0x238   :  { %5280 = vmatprep.subr.bf16.mxu0 %v8821_v4  ;;  %5444 = vmatprep.subr.bf16.mxu1 %v8824_v5  ;;  %v8891_v4 = vld [vmem:[#allocation2 + $0x1a0] ss:$48 sps:$4 sm:$0xff]   ;;  %v8899_v5 = vld [vmem:[#allocation2 + $0x204] ss:$48 sps:$4 sm:$0xff]  }
 0x23b   :  { %5281 = vmatpush1.bf16.msra.mxu0 %v8819_v6  ;;  %5445 = vmatpush1.bf16.msra.mxu1 %v8822_v7  ;;  %v8902_v6 = vld [vmem:[#allocation2 + $0x20c] ss:$48 sps:$4 sm:$0xff]   ;;  %v8897_v7 = vld [vmem:[#allocation2 + $0x200] ss:$48 sps:$4 sm:$0xff]  }
 0x23c   :  { %5282 = vmatprep.subr.bf16.mxu0 %v8827_v8  ;;  %5446 = vmatprep.subr.bf16.mxu1 %v8830_v10  ;;  %v8900_v8 = vld [vmem:[#allocation2 + $0x208] ss:$48 sps:$4 sm:$0xff]   ;;  %v8905_v10 = vld [vmem:[#allocation2 + $0x264] ss:$48 sps:$4 sm:$0xff]  }
 0x23f   :  { %5283 = vmatpush1.bf16.msra.mxu0 %v8825_v11  ;;  %5447 = vmatpush1.bf16.msra.mxu1 %v8828_v12  ;;  %v8908_v11 = vld [vmem:[#allocation2 + $0x26c] ss:$48 sps:$4 sm:$0xff]   ;;  %v8903_v12 = vld [vmem:[#allocation2 + $0x260] ss:$48 sps:$4 sm:$0xff]  }
 0x240   :  { %5284 = vmatprep.subr.bf16.mxu0 %v8833_v13  ;;  %5448 = vmatprep.subr.bf16.mxu1 %v8836_v14  ;;  %v8906_v13 = vld [vmem:[#allocation2 + $0x268] ss:$48 sps:$4 sm:$0xff]   ;;  %v8911_v14 = vld [vmem:[#allocation2 + $0x2c4] ss:$48 sps:$4 sm:$0xff]  }
 0x243   :  { %5285 = vmatpush1.bf16.msra.mxu0 %v8831_v15  ;;  %5449 = vmatpush1.bf16.msra.mxu1 %v8834_v17  ;;  %v8914_v15 = vld [vmem:[#allocation2 + $0x2cc] ss:$48 sps:$4 sm:$0xff]   ;;  %v8909_v17 = vld [vmem:[#allocation2 + $0x2c0] ss:$48 sps:$4 sm:$0xff]  }
 0x244   :  { %5286 = vmatprep.subr.bf16.mxu0 %v8839_v18  ;;  %5450 = vmatprep.subr.bf16.mxu1 %v8842_v19  ;;  %v8912_v18 = vld [vmem:[#allocation2 + $0x2c8] ss:$48 sps:$4 sm:$0xff]   ;;  %v8917_v19 = vld [vmem:[#allocation2 + $0x324] ss:$48 sps:$4 sm:$0xff]  }
 0x247   :  { %5287 = vmatpush1.bf16.msra.mxu0 %v8837_v21  ;;  %5451 = vmatpush1.bf16.msra.mxu1 %v8840_v22  ;;  %v8920_v21 = vld [vmem:[#allocation2 + $0x32c] ss:$48 sps:$4 sm:$0xff]   ;;  %v8915_v22 = vld [vmem:[#allocation2 + $0x320] ss:$48 sps:$4 sm:$0xff]  }
 0x248   :  { %5288 = vmatprep.subr.bf16.mxu0 %v8845_v23  ;;  %5452 = vmatprep.subr.bf16.mxu1 %v8848_v24  ;;  %v8918_v23 = vld [vmem:[#allocation2 + $0x328] ss:$48 sps:$4 sm:$0xff]   ;;  %v8923_v24 = vld [vmem:[#allocation2 + $0x384] ss:$48 sps:$4 sm:$0xff]  }
 0x24b   :  { %5289 = vmatpush1.bf16.msra.mxu0 %v8843_v26  ;;  %5453 = vmatpush1.bf16.msra.mxu1 %v8846_v28  ;;  %v8926_v26 = vld [vmem:[#allocation2 + $0x38c] ss:$48 sps:$4 sm:$0xff]   ;;  %v8921_v28 = vld [vmem:[#allocation2 + $0x380] ss:$48 sps:$4 sm:$0xff]  }
 0x24c   :  { %5290 = vmatprep.subr.bf16.mxu0 %v8851_v29  ;;  %5454 = vmatprep.subr.bf16.mxu1 %v8854_v9  ;;  %v8924_v29 = vld [vmem:[#allocation2 + $0x388] ss:$48 sps:$4 sm:$0xff]   ;;  %v8929_v9 = vld [vmem:[#allocation2 + $0x3e4] ss:$48 sps:$4 sm:$0xff]  }
 0x24f   :  { %5291 = vmatpush1.bf16.msra.mxu0 %v8849_v31  ;;  %5455 = vmatpush1.bf16.msra.mxu1 %v8852_v32  ;;  %v8932_v31 = vld [vmem:[#allocation2 + $0x3ec] ss:$48 sps:$4 sm:$0xff]   ;;  %v8927_v32 = vld [vmem:[#allocation2 + $0x3e0] ss:$48 sps:$4 sm:$0xff]  }
 0x250   :  { %5292 = vmatprep.subr.bf16.mxu0 %v8857_v33  ;;  %5456 = vmatprep.subr.bf16.mxu1 %v8860_v36  ;;  %v8930_v33 = vld [vmem:[#allocation2 + $0x3e8] ss:$48 sps:$4 sm:$0xff]   ;;  %v8935_v36 = vld [vmem:[#allocation2 + $0x444] ss:$48 sps:$4 sm:$0xff]  }
 0x253   :  { %5293 = vmatpush1.bf16.msra.mxu0 %v8855_v37  ;;  %5457 = vmatpush1.bf16.msra.mxu1 %v8858_v39  ;;  %v8938_v37 = vld [vmem:[#allocation2 + $0x44c] ss:$48 sps:$4 sm:$0xff]   ;;  %v8933_v39 = vld [vmem:[#allocation2 + $0x440] ss:$48 sps:$4 sm:$0xff]  }
 0x254   :  { %5294 = vmatprep.subr.bf16.mxu0 %v8863_v40  ;;  %5458 = vmatprep.subr.bf16.mxu1 %v8866_v27  ;;  %v8936_v40 = vld [vmem:[#allocation2 + $0x448] ss:$48 sps:$4 sm:$0xff]   ;;  %v8941_v27 = vld [vmem:[#allocation2 + $0x4a4] ss:$48 sps:$4 sm:$0xff]  }
 0x257   :  { %5295 = vmatpush1.bf16.msra.mxu0 %v8861_v42  ;;  %5459 = vmatpush1.bf16.msra.mxu1 %v8864_v49  ;;  %v8944_v42 = vld [vmem:[#allocation2 + $0x4ac] ss:$48 sps:$4 sm:$0xff]   ;;  %v8939_v49 = vld [vmem:[#allocation2 + $0x4a0] ss:$48 sps:$4 sm:$0xff]  }
 0x258   :  { %5469 = vmatprep.subr.bf16.mxu0 %v8869_v44  ;;  %5633 = vmatprep.subr.bf16.mxu1 %v8872_v45  ;;  %v8942_v44 = vld [vmem:[#allocation2 + $0x4a8] ss:$48 sps:$4 sm:$0xff]   ;;  %v8947_v45 = vld [vmem:[#allocation2 + $0x504] ss:$48 sps:$4 sm:$0xff]  }
 0x25a   :  { %5297 = vmatmul.mubr.bf16.vlgmr.msra.gmra.mrb[4].mxu0 %v9642_v53  ;;  %5461 = vmatmul.mubr.bf16.vlgmr.msra.gmra.mrb[4].mxu1 %v9642_v53 }
 0x25b   :  { %5470 = vmatpush1.bf16.msra.mxu0 %v8867_v47  ;;  %5634 = vmatpush1.bf16.msra.mxu1 %v8870_v48  ;;  %v8950_v47 = vld [vmem:[#allocation2 + $0x50c] ss:$48 sps:$4 sm:$0xff]   ;;  %v8945_v48 = vld [vmem:[#allocation2 + $0x500] ss:$48 sps:$4 sm:$0xff]  }
 0x25c   :  { %5471 = vmatprep.subr.bf16.mxu0 %v8875_v30  ;;  %5635 = vmatprep.subr.bf16.mxu1 %v8878_v50  ;;  %v8948_v30 = vld [vmem:[#allocation2 + $0x508] ss:$48 sps:$4 sm:$0xff]   ;;  %v8953_v50 = vld [vmem:[#allocation2 + $0x564] ss:$48 sps:$4 sm:$0xff]  }
 0x25d   :  { %5501 = vmatprep.mubr.bf16.mxu0 %v9585_v60  ;;  %5665 = vmatprep.mubr.bf16.mxu1 %v9585_v60  ;;  %v8894_v60 = vld [vmem:[#allocation2 + $0x1a8] ss:$48 sps:$4 sm:$0xff]  }
 0x25f   :  { %5472 = vmatpush1.bf16.msra.mxu0 %v8873_v51  ;;  %5636 = vmatpush1.bf16.msra.mxu1 %v8876_v52  ;;  %v8956_v51 = vld [vmem:[#allocation2 + $0x56c] ss:$48 sps:$4 sm:$0xff]   ;;  %v8951_v52 = vld [vmem:[#allocation2 + $0x560] ss:$48 sps:$4 sm:$0xff]  }
 0x260   :  { %5473 = vmatprep.subr.bf16.mxu0 %v8881_v58  ;;  %5637 = vmatprep.subr.bf16.mxu1 %v8884_v59  ;;  %v8954_v58 = vld [vmem:[#allocation2 + $0x568] ss:$48 sps:$4 sm:$0xff]   ;;  %v8959_v59 = vld [vmem:[#allocation2 + $0x5c4] ss:$48 sps:$4 sm:$0xff]  }
 0x263   :  { %5474 = vmatpush1.bf16.msra.mxu0 %v8879_v34  ;;  %5638 = vmatpush1.bf16.msra.mxu1 %v8882_v61  ;;  %v8962_v34 = vld [vmem:[#allocation2 + $0x5cc] ss:$48 sps:$4 sm:$0xff]   ;;  %v8957_v61 = vld [vmem:[#allocation2 + $0x5c0] ss:$48 sps:$4 sm:$0xff]  }
 0x264   :  { %5475 = vmatprep.subr.bf16.mxu0 %v8887_v62  ;;  %5639 = vmatprep.subr.bf16.mxu1 %v8890_v63  ;;  %v8960_v62 = vld [vmem:[#allocation2 + $0x5c8] ss:$48 sps:$4 sm:$0xff]   ;;  %v8965_v63 = vld [vmem:[#allocation2 + $0x624] ss:$48 sps:$4 sm:$0xff]  }
 0x267   :  { %5476 = vmatpush1.bf16.msra.mxu0 %v8885_v0  ;;  %5640 = vmatpush1.bf16.msra.mxu1 %v8888_v1  ;;  %v8968_v0 = vld [vmem:[#allocation2 + $0x62c] ss:$48 sps:$4 sm:$0xff]   ;;  %v8963_v1 = vld [vmem:[#allocation2 + $0x620] ss:$48 sps:$4 sm:$0xff]  }
 0x268   :  { %5477 = vmatprep.subr.bf16.mxu0 %v8893_v2  ;;  %5641 = vmatprep.subr.bf16.mxu1 %v8896_v3  ;;  %v8966_v2 = vld [vmem:[#allocation2 + $0x628] ss:$48 sps:$4 sm:$0xff]   ;;  %v8971_v3 = vld [vmem:[#allocation2 + $0x684] ss:$48 sps:$4 sm:$0xff]  }
 0x26b   :  { %5478 = vmatpush1.bf16.msra.mxu0 %v8891_v4  ;;  %5642 = vmatpush1.bf16.msra.mxu1 %v8894_v60  ;;  %v8974_v4 = vld [vmem:[#allocation2 + $0x68c] ss:$48 sps:$4 sm:$0xff]   ;;  %v8969_v60 = vld [vmem:[#allocation2 + $0x680] ss:$48 sps:$4 sm:$0xff]  }
 0x26c   :  { %5479 = vmatprep.subr.bf16.mxu0 %v8899_v5  ;;  %5643 = vmatprep.subr.bf16.mxu1 %v8902_v6  ;;  %v8972_v5 = vld [vmem:[#allocation2 + $0x688] ss:$48 sps:$4 sm:$0xff]   ;;  %v8977_v6 = vld [vmem:[#allocation2 + $0x6e4] ss:$48 sps:$4 sm:$0xff]  }
 0x26f   :  { %5480 = vmatpush1.bf16.msra.mxu0 %v8897_v7  ;;  %5644 = vmatpush1.bf16.msra.mxu1 %v8900_v8  ;;  %v8980_v7 = vld [vmem:[#allocation2 + $0x6ec] ss:$48 sps:$4 sm:$0xff]   ;;  %v8975_v8 = vld [vmem:[#allocation2 + $0x6e0] ss:$48 sps:$4 sm:$0xff]  }
 0x270   :  { %5481 = vmatprep.subr.bf16.mxu0 %v8905_v10  ;;  %5645 = vmatprep.subr.bf16.mxu1 %v8908_v11  ;;  %v8978_v10 = vld [vmem:[#allocation2 + $0x6e8] ss:$48 sps:$4 sm:$0xff]   ;;  %v8983_v11 = vld [vmem:[#allocation2 + $0x744] ss:$48 sps:$4 sm:$0xff]  }
 0x273   :  { %5482 = vmatpush1.bf16.msra.mxu0 %v8903_v12  ;;  %5646 = vmatpush1.bf16.msra.mxu1 %v8906_v13  ;;  %v8981_v12 = vld [vmem:[#allocation2 + $0x740] ss:$48 sps:$4 sm:$0xff]   ;;  %v8984_v13 = vld [vmem:[#allocation2 + $0x748] ss:$48 sps:$4 sm:$0xff]  }
 0x274   :  { %5483 = vmatprep.subr.bf16.mxu0 %v8911_v14  ;;  %5647 = vmatprep.subr.bf16.mxu1 %v8914_v15  ;;  %v8989_v14 = vld [vmem:[#allocation2 + $0x7a4] ss:$48 sps:$4 sm:$0xff]   ;;  %v8992_v15 = vld [vmem:[#allocation2 + $0x7ac] ss:$48 sps:$4 sm:$0xff]  }
 0x277   :  { %5484 = vmatpush1.bf16.msra.mxu0 %v8909_v17  ;;  %5648 = vmatpush1.bf16.msra.mxu1 %v8912_v18  ;;  %v8987_v17 = vld [vmem:[#allocation2 + $0x7a0] ss:$48 sps:$4 sm:$0xff]   ;;  %v8995_v18 = vld [vmem:[#allocation2 + $0x804] ss:$48 sps:$4 sm:$0xff]  }
 0x278   :  { %5485 = vmatprep.subr.bf16.mxu0 %v8917_v19  ;;  %5649 = vmatprep.subr.bf16.mxu1 %v8920_v21  ;;  %v8998_v19 = vld [vmem:[#allocation2 + $0x80c] ss:$48 sps:$4 sm:$0xff]   ;;  %v8993_v21 = vld [vmem:[#allocation2 + $0x800] ss:$48 sps:$4 sm:$0xff]  }
 0x27b   :  { %5486 = vmatpush1.bf16.msra.mxu0 %v8915_v22  ;;  %5650 = vmatpush1.bf16.msra.mxu1 %v8918_v23  ;;  %v8996_v22 = vld [vmem:[#allocation2 + $0x808] ss:$48 sps:$4 sm:$0xff]   ;;  %v9001_v23 = vld [vmem:[#allocation2 + $0x864] ss:$48 sps:$4 sm:$0xff]  }
 0x27c   :  { %5487 = vmatprep.subr.bf16.mxu0 %v8923_v24  ;;  %5651 = vmatprep.subr.bf16.mxu1 %v8926_v26  ;;  %v9004_v24 = vld [vmem:[#allocation2 + $0x86c] ss:$48 sps:$4 sm:$0xff]   ;;  %v8999_v26 = vld [vmem:[#allocation2 + $0x860] ss:$48 sps:$4 sm:$0xff]  }
 0x27f   :  { %5488 = vmatpush1.bf16.msra.mxu0 %v8921_v28  ;;  %5652 = vmatpush1.bf16.msra.mxu1 %v8924_v29  ;;  %v9002_v28 = vld [vmem:[#allocation2 + $0x868] ss:$48 sps:$4 sm:$0xff]   ;;  %v9007_v29 = vld [vmem:[#allocation2 + $0x8c4] ss:$48 sps:$4 sm:$0xff]  }
 0x280   :  { %5489 = vmatprep.subr.bf16.mxu0 %v8929_v9  ;;  %5653 = vmatprep.subr.bf16.mxu1 %v8932_v31  ;;  %v9010_v9 = vld [vmem:[#allocation2 + $0x8cc] ss:$48 sps:$4 sm:$0xff]   ;;  %v9005_v31 = vld [vmem:[#allocation2 + $0x8c0] ss:$48 sps:$4 sm:$0xff]  }
 0x283   :  { %5490 = vmatpush1.bf16.msra.mxu0 %v8927_v32  ;;  %5654 = vmatpush1.bf16.msra.mxu1 %v8930_v33  ;;  %v9008_v32 = vld [vmem:[#allocation2 + $0x8c8] ss:$48 sps:$4 sm:$0xff]   ;;  %v9013_v33 = vld [vmem:[#allocation2 + $0x924] ss:$48 sps:$4 sm:$0xff]  }
 0x284   :  { %5491 = vmatprep.subr.bf16.mxu0 %v8935_v36  ;;  %5655 = vmatprep.subr.bf16.mxu1 %v8938_v37  ;;  %v9016_v36 = vld [vmem:[#allocation2 + $0x92c] ss:$48 sps:$4 sm:$0xff]   ;;  %v9011_v37 = vld [vmem:[#allocation2 + $0x920] ss:$48 sps:$4 sm:$0xff]  }
 0x287   :  { %5492 = vmatpush1.bf16.msra.mxu0 %v8933_v39  ;;  %5656 = vmatpush1.bf16.msra.mxu1 %v8936_v40  ;;  %v9014_v39 = vld [vmem:[#allocation2 + $0x928] ss:$48 sps:$4 sm:$0xff]   ;;  %v9019_v40 = vld [vmem:[#allocation2 + $0x984] ss:$48 sps:$4 sm:$0xff]  }
 0x288   :  { %5493 = vmatprep.subr.bf16.mxu0 %v8941_v27  ;;  %5657 = vmatprep.subr.bf16.mxu1 %v8944_v42  ;;  %v9022_v27 = vld [vmem:[#allocation2 + $0x98c] ss:$48 sps:$4 sm:$0xff]   ;;  %v9017_v42 = vld [vmem:[#allocation2 + $0x980] ss:$48 sps:$4 sm:$0xff]  }
 0x28b   :  { %5494 = vmatpush1.bf16.msra.mxu0 %v8939_v49  ;;  %5658 = vmatpush1.bf16.msra.mxu1 %v8942_v44  ;;  %v9020_v49 = vld [vmem:[#allocation2 + $0x988] ss:$48 sps:$4 sm:$0xff]   ;;  %v9025_v44 = vld [vmem:[#allocation2 + $0x9e4] ss:$48 sps:$4 sm:$0xff]  }
 0x28c   :  { %5495 = vmatprep.subr.bf16.mxu0 %v8947_v45  ;;  %5659 = vmatprep.subr.bf16.mxu1 %v8950_v47  ;;  %v9028_v45 = vld [vmem:[#allocation2 + $0x9ec] ss:$48 sps:$4 sm:$0xff]   ;;  %v9023_v47 = vld [vmem:[#allocation2 + $0x9e0] ss:$48 sps:$4 sm:$0xff]  }
 0x28f   :  { %5496 = vmatpush1.bf16.msra.mxu0 %v8945_v48  ;;  %5660 = vmatpush1.bf16.msra.mxu1 %v8948_v30  ;;  %v9026_v48 = vld [vmem:[#allocation2 + $0x9e8] ss:$48 sps:$4 sm:$0xff]   ;;  %v9031_v30 = vld [vmem:[#allocation2 + $0xa44] ss:$48 sps:$4 sm:$0xff]  }
 0x290   :  { %5497 = vmatprep.subr.bf16.mxu0 %v8953_v50  ;;  %5661 = vmatprep.subr.bf16.mxu1 %v8956_v51  ;;  %v9034_v50 = vld [vmem:[#allocation2 + $0xa4c] ss:$48 sps:$4 sm:$0xff]   ;;  %v9029_v51 = vld [vmem:[#allocation2 + $0xa40] ss:$48 sps:$4 sm:$0xff]  }
 0x293   :  { %5498 = vmatpush1.bf16.msra.mxu0 %v8951_v52  ;;  %5662 = vmatpush1.bf16.msra.mxu1 %v8954_v58  ;;  %v9032_v52 = vld [vmem:[#allocation2 + $0xa48] ss:$48 sps:$4 sm:$0xff]   ;;  %v9037_v58 = vld [vmem:[#allocation2 + $0xaa4] ss:$48 sps:$4 sm:$0xff]  }
 0x294   :  { %5499 = vmatprep.subr.bf16.mxu0 %v8959_v59  ;;  %5663 = vmatprep.subr.bf16.mxu1 %v8962_v34  ;;  %v9040_v59 = vld [vmem:[#allocation2 + $0xaac] ss:$48 sps:$4 sm:$0xff]   ;;  %v9035_v34 = vld [vmem:[#allocation2 + $0xaa0] ss:$48 sps:$4 sm:$0xff]  }
 0x297   :  { %5500 = vmatpush1.bf16.msra.mxu0 %v8957_v61  ;;  %5664 = vmatpush1.bf16.msra.mxu1 %v8960_v62  ;;  %v9038_v61 = vld [vmem:[#allocation2 + $0xaa8] ss:$48 sps:$4 sm:$0xff]   ;;  %v9043_v62 = vld [vmem:[#allocation2 + $0xb04] ss:$48 sps:$4 sm:$0xff]  }
 0x298   :  { %5510 = vmatprep.subr.bf16.mxu0 %v8965_v63  ;;  %5674 = vmatprep.subr.bf16.mxu1 %v8968_v0  ;;  %v9046_v63 = vld [vmem:[#allocation2 + $0xb0c] ss:$48 sps:$4 sm:$0xff]   ;;  %v9041_v0 = vld [vmem:[#allocation2 + $0xb00] ss:$48 sps:$4 sm:$0xff]  }
 0x29a   :  { %5502 = vmatmul.mubr.bf16.vlgmr.msra.gmra.mrb[8].mxu0 %v9594_v16  ;;  %5666 = vmatmul.mubr.bf16.vlgmr.msra.gmra.mrb[8].mxu1 %v9594_v16  ;;  %v8986_v16 = vld [vmem:[#allocation2 + $0x74c] ss:$48 sps:$4 sm:$0xff]  }
 0x29b   :  { %5511 = vmatpush1.bf16.msra.mxu0 %v8963_v1  ;;  %5675 = vmatpush1.bf16.msra.mxu1 %v8966_v2  ;;  %v9044_v1 = vld [vmem:[#allocation2 + $0xb08] ss:$48 sps:$4 sm:$0xff]   ;;  %v9049_v2 = vld [vmem:[#allocation2 + $0xb64] ss:$48 sps:$4 sm:$0xff]  }
 0x29c   :  { %5512 = vmatprep.subr.bf16.mxu0 %v8971_v3  ;;  %5676 = vmatprep.subr.bf16.mxu1 %v8974_v4  ;;  %v9052_v3 = vld [vmem:[#allocation2 + $0xb6c] ss:$48 sps:$4 sm:$0xff]   ;;  %v9047_v4 = vld [vmem:[#allocation2 + $0xb60] ss:$48 sps:$4 sm:$0xff]  }
 0x29d   :  { %5542 = vmatprep.mubr.bf16.mxu0 %v9596_v20  ;;  %5706 = vmatprep.mubr.bf16.mxu1 %v9596_v20  ;;  %v8990_v20 = vld [vmem:[#allocation2 + $0x7a8] ss:$48 sps:$4 sm:$0xff]  }
 0x29f   :  { %5513 = vmatpush1.bf16.msra.mxu0 %v8969_v60  ;;  %5677 = vmatpush1.bf16.msra.mxu1 %v8972_v5  ;;  %v9050_v60 = vld [vmem:[#allocation2 + $0xb68] ss:$48 sps:$4 sm:$0xff]   ;;  %v9055_v5 = vld [vmem:[#allocation2 + $0xbc4] ss:$48 sps:$4 sm:$0xff]  }
 0x2a0   :  { %5514 = vmatprep.subr.bf16.mxu0 %v8977_v6  ;;  %5678 = vmatprep.subr.bf16.mxu1 %v8980_v7  ;;  %v9058_v6 = vld [vmem:[#allocation2 + $0xbcc] ss:$48 sps:$4 sm:$0xff]   ;;  %v9053_v7 = vld [vmem:[#allocation2 + $0xbc0] ss:$48 sps:$4 sm:$0xff]  }
 0x2a3   :  { %5515 = vmatpush1.bf16.msra.mxu0 %v8975_v8  ;;  %5679 = vmatpush1.bf16.msra.mxu1 %v8978_v10  ;;  %v9056_v8 = vld [vmem:[#allocation2 + $0xbc8] ss:$48 sps:$4 sm:$0xff]   ;;  %v9061_v10 = vld [vmem:[#allocation2 + $0xc24] ss:$48 sps:$4 sm:$0xff]  }
 0x2a4   :  { %5516 = vmatprep.subr.bf16.mxu0 %v8983_v11  ;;  %5680 = vmatprep.subr.bf16.mxu1 %v8986_v16  ;;  %v9064_v11 = vld [vmem:[#allocation2 + $0xc2c] ss:$48 sps:$4 sm:$0xff]   ;;  %v9059_v16 = vld [vmem:[#allocation2 + $0xc20] ss:$48 sps:$4 sm:$0xff]  }
 0x2a7   :  { %5517 = vmatpush1.bf16.msra.mxu0 %v8981_v12  ;;  %5681 = vmatpush1.bf16.msra.mxu1 %v8984_v13  ;;  %v9062_v12 = vld [vmem:[#allocation2 + $0xc28] ss:$48 sps:$4 sm:$0xff]   ;;  %v9067_v13 = vld [vmem:[#allocation2 + $0xc84] ss:$48 sps:$4 sm:$0xff]  }
 0x2a8   :  { %5518 = vmatprep.subr.bf16.mxu0 %v8989_v14  ;;  %5682 = vmatprep.subr.bf16.mxu1 %v8992_v15  ;;  %v9070_v14 = vld [vmem:[#allocation2 + $0xc8c] ss:$48 sps:$4 sm:$0xff]   ;;  %v9065_v15 = vld [vmem:[#allocation2 + $0xc80] ss:$48 sps:$4 sm:$0xff]  }
 0x2ab   :  { %5519 = vmatpush1.bf16.msra.mxu0 %v8987_v17  ;;  %5683 = vmatpush1.bf16.msra.mxu1 %v8990_v20  ;;  %v9068_v17 = vld [vmem:[#allocation2 + $0xc88] ss:$48 sps:$4 sm:$0xff]   ;;  %v9073_v20 = vld [vmem:[#allocation2 + $0xce4] ss:$48 sps:$4 sm:$0xff]  }
 0x2ac   :  { %5520 = vmatprep.subr.bf16.mxu0 %v8995_v18  ;;  %5684 = vmatprep.subr.bf16.mxu1 %v8998_v19  ;;  %v9076_v18 = vld [vmem:[#allocation2 + $0xcec] ss:$48 sps:$4 sm:$0xff]   ;;  %v9071_v19 = vld [vmem:[#allocation2 + $0xce0] ss:$48 sps:$4 sm:$0xff]  }
 0x2af   :  { %5521 = vmatpush1.bf16.msra.mxu0 %v8993_v21  ;;  %5685 = vmatpush1.bf16.msra.mxu1 %v8996_v22  ;;  %v9074_v21 = vld [vmem:[#allocation2 + $0xce8] ss:$48 sps:$4 sm:$0xff]   ;;  %v9079_v22 = vld [vmem:[#allocation2 + $0xd44] ss:$48 sps:$4 sm:$0xff]  }
 0x2b0   :  { %5522 = vmatprep.subr.bf16.mxu0 %v9001_v23  ;;  %5686 = vmatprep.subr.bf16.mxu1 %v9004_v24  ;;  %v9077_v23 = vld [vmem:[#allocation2 + $0xd40] ss:$48 sps:$4 sm:$0xff]   ;;  %v9080_v24 = vld [vmem:[#allocation2 + $0xd48] ss:$48 sps:$4 sm:$0xff]  }
 0x2b3   :  { %5523 = vmatpush1.bf16.msra.mxu0 %v8999_v26  ;;  %5687 = vmatpush1.bf16.msra.mxu1 %v9002_v28  ;;  %v9085_v26 = vld [vmem:[#allocation2 + $0xda4] ss:$48 sps:$4 sm:$0xff]   ;;  %v9088_v28 = vld [vmem:[#allocation2 + $0xdac] ss:$48 sps:$4 sm:$0xff]  }
 0x2b4   :  { %5524 = vmatprep.subr.bf16.mxu0 %v9007_v29  ;;  %5688 = vmatprep.subr.bf16.mxu1 %v9010_v9  ;;  %v9083_v29 = vld [vmem:[#allocation2 + $0xda0] ss:$48 sps:$4 sm:$0xff]   ;;  %v9091_v9 = vld [vmem:[#allocation2 + $0xe04] ss:$48 sps:$4 sm:$0xff]  }
 0x2b7   :  { %5525 = vmatpush1.bf16.msra.mxu0 %v9005_v31  ;;  %5689 = vmatpush1.bf16.msra.mxu1 %v9008_v32  ;;  %v9094_v31 = vld [vmem:[#allocation2 + $0xe0c] ss:$48 sps:$4 sm:$0xff]   ;;  %v9089_v32 = vld [vmem:[#allocation2 + $0xe00] ss:$48 sps:$4 sm:$0xff]  }
 0x2b8   :  { %5526 = vmatprep.subr.bf16.mxu0 %v9013_v33  ;;  %5690 = vmatprep.subr.bf16.mxu1 %v9016_v36  ;;  %v9092_v33 = vld [vmem:[#allocation2 + $0xe08] ss:$48 sps:$4 sm:$0xff]   ;;  %v9097_v36 = vld [vmem:[#allocation2 + $0xe64] ss:$48 sps:$4 sm:$0xff]  }
 0x2bb   :  { %5527 = vmatpush1.bf16.msra.mxu0 %v9011_v37  ;;  %5691 = vmatpush1.bf16.msra.mxu1 %v9014_v39  ;;  %v9100_v37 = vld [vmem:[#allocation2 + $0xe6c] ss:$48 sps:$4 sm:$0xff]   ;;  %v9095_v39 = vld [vmem:[#allocation2 + $0xe60] ss:$48 sps:$4 sm:$0xff]  }
 0x2bc   :  { %5528 = vmatprep.subr.bf16.mxu0 %v9019_v40  ;;  %5692 = vmatprep.subr.bf16.mxu1 %v9022_v27  ;;  %v9098_v40 = vld [vmem:[#allocation2 + $0xe68] ss:$48 sps:$4 sm:$0xff]   ;;  %v9103_v27 = vld [vmem:[#allocation2 + $0xec4] ss:$48 sps:$4 sm:$0xff]  }
 0x2bf   :  { %5529 = vmatpush1.bf16.msra.mxu0 %v9017_v42  ;;  %5693 = vmatpush1.bf16.msra.mxu1 %v9020_v49  ;;  %v9106_v42 = vld [vmem:[#allocation2 + $0xecc] ss:$48 sps:$4 sm:$0xff]   ;;  %v9101_v49 = vld [vmem:[#allocation2 + $0xec0] ss:$48 sps:$4 sm:$0xff]  }
 0x2c0   :  { %5530 = vmatprep.subr.bf16.mxu0 %v9025_v44  ;;  %5694 = vmatprep.subr.bf16.mxu1 %v9028_v45  ;;  %v9104_v44 = vld [vmem:[#allocation2 + $0xec8] ss:$48 sps:$4 sm:$0xff]   ;;  %v9109_v45 = vld [vmem:[#allocation2 + $0xf24] ss:$48 sps:$4 sm:$0xff]  }
 0x2c3   :  { %5531 = vmatpush1.bf16.msra.mxu0 %v9023_v47  ;;  %5695 = vmatpush1.bf16.msra.mxu1 %v9026_v48  ;;  %v9112_v47 = vld [vmem:[#allocation2 + $0xf2c] ss:$48 sps:$4 sm:$0xff]   ;;  %v9107_v48 = vld [vmem:[#allocation2 + $0xf20] ss:$48 sps:$4 sm:$0xff]  }
 0x2c4   :  { %5532 = vmatprep.subr.bf16.mxu0 %v9031_v30  ;;  %5696 = vmatprep.subr.bf16.mxu1 %v9034_v50  ;;  %v9110_v30 = vld [vmem:[#allocation2 + $0xf28] ss:$48 sps:$4 sm:$0xff]   ;;  %v9115_v50 = vld [vmem:[#allocation2 + $0xf84] ss:$48 sps:$4 sm:$0xff]  }
 0x2c7   :  { %5533 = vmatpush1.bf16.msra.mxu0 %v9029_v51  ;;  %5697 = vmatpush1.bf16.msra.mxu1 %v9032_v52  ;;  %v9118_v51 = vld [vmem:[#allocation2 + $0xf8c] ss:$48 sps:$4 sm:$0xff]   ;;  %v9113_v52 = vld [vmem:[#allocation2 + $0xf80] ss:$48 sps:$4 sm:$0xff]  }
 0x2c8   :  { %5534 = vmatprep.subr.bf16.mxu0 %v9037_v58  ;;  %5698 = vmatprep.subr.bf16.mxu1 %v9040_v59  ;;  %v9116_v58 = vld [vmem:[#allocation2 + $0xf88] ss:$48 sps:$4 sm:$0xff]   ;;  %v9121_v59 = vld [vmem:[#allocation2 + $0xfe4] ss:$48 sps:$4 sm:$0xff]  }
 0x2cb   :  { %5535 = vmatpush1.bf16.msra.mxu0 %v9035_v34  ;;  %5699 = vmatpush1.bf16.msra.mxu1 %v9038_v61  ;;  %v9124_v34 = vld [vmem:[#allocation2 + $0xfec] ss:$48 sps:$4 sm:$0xff]   ;;  %v9119_v61 = vld [vmem:[#allocation2 + $0xfe0] ss:$48 sps:$4 sm:$0xff]  }
 0x2cc   :  { %5536 = vmatprep.subr.bf16.mxu0 %v9043_v62  ;;  %5700 = vmatprep.subr.bf16.mxu1 %v9046_v63  ;;  %v9122_v62 = vld [vmem:[#allocation2 + $0xfe8] ss:$48 sps:$4 sm:$0xff]   ;;  %v9127_v63 = vld [vmem:[#allocation2 + $0x1044] ss:$48 sps:$4 sm:$0xff]  }
 0x2cf   :  { %5537 = vmatpush1.bf16.msra.mxu0 %v9041_v0  ;;  %5701 = vmatpush1.bf16.msra.mxu1 %v9044_v1  ;;  %v9130_v0 = vld [vmem:[#allocation2 + $0x104c] ss:$48 sps:$4 sm:$0xff]   ;;  %v9125_v1 = vld [vmem:[#allocation2 + $0x1040] ss:$48 sps:$4 sm:$0xff]  }
 0x2d0   :  { %5538 = vmatprep.subr.bf16.mxu0 %v9049_v2  ;;  %5702 = vmatprep.subr.bf16.mxu1 %v9052_v3  ;;  %v9128_v2 = vld [vmem:[#allocation2 + $0x1048] ss:$48 sps:$4 sm:$0xff]   ;;  %v9133_v3 = vld [vmem:[#allocation2 + $0x10a4] ss:$48 sps:$4 sm:$0xff]  }
 0x2d3   :  { %5539 = vmatpush1.bf16.msra.mxu0 %v9047_v4  ;;  %5703 = vmatpush1.bf16.msra.mxu1 %v9050_v60  ;;  %v9136_v4 = vld [vmem:[#allocation2 + $0x10ac] ss:$48 sps:$4 sm:$0xff]   ;;  %v9131_v60 = vld [vmem:[#allocation2 + $0x10a0] ss:$48 sps:$4 sm:$0xff]  }
 0x2d4   :  { %5540 = vmatprep.subr.bf16.mxu0 %v9055_v5  ;;  %5704 = vmatprep.subr.bf16.mxu1 %v9058_v6  ;;  %v9134_v5 = vld [vmem:[#allocation2 + $0x10a8] ss:$48 sps:$4 sm:$0xff]   ;;  %v9139_v6 = vld [vmem:[#allocation2 + $0x1104] ss:$48 sps:$4 sm:$0xff]  }
 0x2d7   :  { %5541 = vmatpush1.bf16.msra.mxu0 %v9053_v7  ;;  %5705 = vmatpush1.bf16.msra.mxu1 %v9056_v8  ;;  %v9142_v7 = vld [vmem:[#allocation2 + $0x110c] ss:$48 sps:$4 sm:$0xff]   ;;  %v9137_v8 = vld [vmem:[#allocation2 + $0x1100] ss:$48 sps:$4 sm:$0xff]  }
 0x2d8   :  { %5551 = vmatprep.subr.bf16.mxu0 %v9061_v10  ;;  %5715 = vmatprep.subr.bf16.mxu1 %v9064_v11  ;;  %v9140_v10 = vld [vmem:[#allocation2 + $0x1108] ss:$48 sps:$4 sm:$0xff]   ;;  %v9145_v11 = vld [vmem:[#allocation2 + $0x1164] ss:$48 sps:$4 sm:$0xff]  }
 0x2da   :  { %5543 = vmatmul.mubr.bf16.vlgmr.msra.gmra.mrb[8].mxu0 %v9604_v25  ;;  %5707 = vmatmul.mubr.bf16.vlgmr.msra.gmra.mrb[8].mxu1 %v9604_v25  ;;  %v9082_v25 = vld [vmem:[#allocation2 + $0xd4c] ss:$48 sps:$4 sm:$0xff]  }
 0x2db   :  { %5552 = vmatpush1.bf16.msra.mxu0 %v9059_v16  ;;  %5716 = vmatpush1.bf16.msra.mxu1 %v9062_v12  ;;  %v9148_v16 = vld [vmem:[#allocation2 + $0x116c] ss:$48 sps:$4 sm:$0xff]   ;;  %v9143_v12 = vld [vmem:[#allocation2 + $0x1160] ss:$48 sps:$4 sm:$0xff]  }
 0x2dc   :  { %5553 = vmatprep.subr.bf16.mxu0 %v9067_v13  ;;  %5717 = vmatprep.subr.bf16.mxu1 %v9070_v14  ;;  %v9146_v13 = vld [vmem:[#allocation2 + $0x1168] ss:$48 sps:$4 sm:$0xff]   ;;  %v9151_v14 = vld [vmem:[#allocation2 + $0x11c4] ss:$48 sps:$4 sm:$0xff]  }
 0x2dd   :  { %5583 = vmatprep.mubr.bf16.mxu0 %v9619_v35  ;;  %5747 = vmatprep.mubr.bf16.mxu1 %v9619_v35  ;;  %v9086_v35 = vld [vmem:[#allocation2 + $0xda8] ss:$48 sps:$4 sm:$0xff]  }
 0x2df   :  { %5554 = vmatpush1.bf16.msra.mxu0 %v9065_v15  ;;  %5718 = vmatpush1.bf16.msra.mxu1 %v9068_v17  ;;  %v9154_v15 = vld [vmem:[#allocation2 + $0x11cc] ss:$48 sps:$4 sm:$0xff]   ;;  %v9149_v17 = vld [vmem:[#allocation2 + $0x11c0] ss:$48 sps:$4 sm:$0xff]  }
 0x2e0   :  { %5555 = vmatprep.subr.bf16.mxu0 %v9073_v20  ;;  %5719 = vmatprep.subr.bf16.mxu1 %v9076_v18  ;;  %v9152_v20 = vld [vmem:[#allocation2 + $0x11c8] ss:$48 sps:$4 sm:$0xff]   ;;  %v9157_v18 = vld [vmem:[#allocation2 + $0x1224] ss:$48 sps:$4 sm:$0xff]  }
 0x2e3   :  { %5556 = vmatpush1.bf16.msra.mxu0 %v9071_v19  ;;  %5720 = vmatpush1.bf16.msra.mxu1 %v9074_v21  ;;  %v9160_v19 = vld [vmem:[#allocation2 + $0x122c] ss:$48 sps:$4 sm:$0xff]   ;;  %v9155_v21 = vld [vmem:[#allocation2 + $0x1220] ss:$48 sps:$4 sm:$0xff]  }
 0x2e4   :  { %5557 = vmatprep.subr.bf16.mxu0 %v9079_v22  ;;  %5721 = vmatprep.subr.bf16.mxu1 %v9082_v25  ;;  %v9158_v22 = vld [vmem:[#allocation2 + $0x1228] ss:$48 sps:$4 sm:$0xff]   ;;  %v9163_v25 = vld [vmem:[#allocation2 + $0x1284] ss:$48 sps:$4 sm:$0xff]  }
 0x2e7   :  { %5558 = vmatpush1.bf16.msra.mxu0 %v9077_v23  ;;  %5722 = vmatpush1.bf16.msra.mxu1 %v9080_v24  ;;  %v9166_v23 = vld [vmem:[#allocation2 + $0x128c] ss:$48 sps:$4 sm:$0xff]   ;;  %v9161_v24 = vld [vmem:[#allocation2 + $0x1280] ss:$48 sps:$4 sm:$0xff]  }
 0x2e8   :  { %5559 = vmatprep.subr.bf16.mxu0 %v9085_v26  ;;  %5723 = vmatprep.subr.bf16.mxu1 %v9088_v28  ;;  %v9164_v26 = vld [vmem:[#allocation2 + $0x1288] ss:$48 sps:$4 sm:$0xff]   ;;  %v9169_v28 = vld [vmem:[#allocation2 + $0x12e4] ss:$48 sps:$4 sm:$0xff]  }
 0x2eb   :  { %5560 = vmatpush1.bf16.msra.mxu0 %v9083_v29  ;;  %5724 = vmatpush1.bf16.msra.mxu1 %v9086_v35  ;;  %v9172_v29 = vld [vmem:[#allocation2 + $0x12ec] ss:$48 sps:$4 sm:$0xff]   ;;  %v9167_v35 = vld [vmem:[#allocation2 + $0x12e0] ss:$48 sps:$4 sm:$0xff]  }
 0x2ec   :  { %5561 = vmatprep.subr.bf16.mxu0 %v9091_v9  ;;  %5725 = vmatprep.subr.bf16.mxu1 %v9094_v31  ;;  %v9170_v9 = vld [vmem:[#allocation2 + $0x12e8] ss:$48 sps:$4 sm:$0xff]   ;;  %v9175_v31 = vld [vmem:[#allocation2 + $0x1344] ss:$48 sps:$4 sm:$0xff]  }
 0x2ef   :  { %5562 = vmatpush1.bf16.msra.mxu0 %v9089_v32  ;;  %5726 = vmatpush1.bf16.msra.mxu1 %v9092_v33  ;;  %v9173_v32 = vld [vmem:[#allocation2 + $0x1340] ss:$48 sps:$4 sm:$0xff]   ;;  %v9176_v33 = vld [vmem:[#allocation2 + $0x1348] ss:$48 sps:$4 sm:$0xff]  }
 0x2f0   :  { %5563 = vmatprep.subr.bf16.mxu0 %v9097_v36  ;;  %5727 = vmatprep.subr.bf16.mxu1 %v9100_v37  ;;  %v9181_v36 = vld [vmem:[#allocation2 + $0x13a4] ss:$48 sps:$4 sm:$0xff]   ;;  %v9184_v37 = vld [vmem:[#allocation2 + $0x13ac] ss:$48 sps:$4 sm:$0xff]  }
 0x2f3   :  { %5564 = vmatpush1.bf16.msra.mxu0 %v9095_v39  ;;  %5728 = vmatpush1.bf16.msra.mxu1 %v9098_v40  ;;  %v939_v39 = vsub.s32 6, %v9576_v43  ;;  %v9182_v40 = vld [vmem:[#allocation2 + $0x13a8] ss:$48 sps:$4 sm:$0xff]  }
 0x2f4   :  { %5565 = vmatprep.subr.bf16.mxu0 %v9103_v27  ;;  %5729 = vmatprep.subr.bf16.mxu1 %v9106_v42  ;;  %v9187_v27 = vld [vmem:[#allocation2 + $0x1404] ss:$48 sps:$4 sm:$0xff]   ;;  %v9190_v42 = vld [vmem:[#allocation2 + $0x140c] ss:$48 sps:$4 sm:$0xff]  }
 0x2f7   :  { %5566 = vmatpush1.bf16.msra.mxu0 %v9101_v49  ;;  %5730 = vmatpush1.bf16.msra.mxu1 %v9104_v44  ;;  %v9685_v49 = vld [vmem:[#allocation4] sm:$0xff] }
 0x2f8   :  { %5567 = vmatprep.subr.bf16.mxu0 %v9109_v45  ;;  %5731 = vmatprep.subr.bf16.mxu1 %v9112_v47  ;;  %v940_v44 = vrot.slane %v9685_v49, %v939_v39  ;;  %v9185_v45 = vld [vmem:[#allocation2 + $0x1400] ss:$48 sps:$4 sm:$0xff]   ;;  %v9188_v47 = vld [vmem:[#allocation2 + $0x1408] ss:$48 sps:$4 sm:$0xff]  }
 0x2fb   :  { %5568 = vmatpush1.bf16.msra.mxu0 %v9107_v48  ;;  %5732 = vmatpush1.bf16.msra.mxu1 %v9110_v30  ;;  %v9193_v48 = vld [vmem:[#allocation2 + $0x1464] ss:$48 sps:$4 sm:$0xff]   ;;  %v9196_v30 = vld [vmem:[#allocation2 + $0x146c] ss:$48 sps:$4 sm:$0xff]  }
 0x2fc   :  { %5569 = vmatprep.subr.bf16.mxu0 %v9115_v50  ;;  %5733 = vmatprep.subr.bf16.mxu1 %v9118_v51  ;;  %v9688_v50 = vld [vmem:[#allocation6] sm:$0xff] }
 0x2ff   :  { %5570 = vmatpush1.bf16.msra.mxu0 %v9113_v52  ;;  %5734 = vmatpush1.bf16.msra.mxu1 %v9116_v58  ;;  %v9692_v58 = vld [vmem:[#allocation7] sm:$0xff] }
 0x300   :  { %5571 = vmatprep.subr.bf16.mxu0 %v9121_v59  ;;  %5735 = vmatprep.subr.bf16.mxu1 %v9124_v34  ;;  %v5840_v34 = vrot.slane %v9688_v50, %v939_v39 }
 0x303   :  { %5572 = vmatpush1.bf16.msra.mxu0 %v9119_v61  ;;  %5736 = vmatpush1.bf16.msra.mxu1 %v9122_v62 }
 0x304   :  { %5573 = vmatprep.subr.bf16.mxu0 %v9127_v63  ;;  %5737 = vmatprep.subr.bf16.mxu1 %v9130_v0  ;;  %v9191_v63 = vld [vmem:[#allocation2 + $0x1460] ss:$48 sps:$4 sm:$0xff]  }
 0x307   :  { %5574 = vmatpush1.bf16.msra.mxu0 %v9125_v1  ;;  %5738 = vmatpush1.bf16.msra.mxu1 %v9128_v2  ;;  %v9194_v2 = vld [vmem:[#allocation2 + $0x1468] ss:$48 sps:$4 sm:$0xff]  }
 0x308   :  { %5575 = vmatprep.subr.bf16.mxu0 %v9133_v3  ;;  %5739 = vmatprep.subr.bf16.mxu1 %v9136_v4  ;;  %v9199_v3 = vld [vmem:[#allocation2 + $0x14c4] ss:$48 sps:$4 sm:$0xff]  }
 0x30b   :  { %5576 = vmatpush1.bf16.msra.mxu0 %v9131_v60  ;;  %5740 = vmatpush1.bf16.msra.mxu1 %v9134_v5  ;;  %v5916_v60 = vrot.slane %v9692_v58, %v939_v39  ;;  %v9235_v39 = vld [vmem:[#allocation2 + $0x1704] ss:$48 sps:$4 sm:$0xff]  }
 0x30c   :  { %5577 = vmatprep.subr.bf16.mxu0 %v9139_v6  ;;  %5741 = vmatprep.subr.bf16.mxu1 %v9142_v7  ;;  %v9202_v7 = vld [vmem:[#allocation2 + $0x14cc] ss:$48 sps:$4 sm:$0xff]  }
 0x30f   :  { %5578 = vmatpush1.bf16.msra.mxu0 %v9137_v8  ;;  %5742 = vmatpush1.bf16.msra.mxu1 %v9140_v10  ;;  %v9197_v10 = vld [vmem:[#allocation2 + $0x14c0] ss:$48 sps:$4 sm:$0xff]  }
 0x310   :  { %5579 = vmatprep.subr.bf16.mxu0 %v9145_v11  ;;  %5743 = vmatprep.subr.bf16.mxu1 %v9148_v16  ;;  %v9200_v11 = vld [vmem:[#allocation2 + $0x14c8] ss:$48 sps:$4 sm:$0xff]  }
 0x313   :  { %5580 = vmatpush1.bf16.msra.mxu0 %v9143_v12  ;;  %5744 = vmatpush1.bf16.msra.mxu1 %v9146_v13  ;;  %v9205_v12 = vld [vmem:[#allocation2 + $0x1524] ss:$48 sps:$4 sm:$0xff]   ;;  %v9208_v13 = vld [vmem:[#allocation2 + $0x152c] ss:$48 sps:$4 sm:$0xff]  }
 0x314   :  { %5581 = vmatprep.subr.bf16.mxu0 %v9151_v14  ;;  %5745 = vmatprep.subr.bf16.mxu1 %v9154_v15  ;;  %v9203_v14 = vld [vmem:[#allocation2 + $0x1520] ss:$48 sps:$4 sm:$0xff]   ;;  %v9206_v15 = vld [vmem:[#allocation2 + $0x1528] ss:$48 sps:$4 sm:$0xff]  }
 0x317   :  { %5582 = vmatpush1.bf16.msra.mxu0 %v9149_v17  ;;  %5746 = vmatpush1.bf16.msra.mxu1 %v9152_v20  ;;  %v9211_v17 = vld [vmem:[#allocation2 + $0x1584] ss:$48 sps:$4 sm:$0xff]   ;;  %v9214_v20 = vld [vmem:[#allocation2 + $0x158c] ss:$48 sps:$4 sm:$0xff]  }
 0x318   :  { %5592 = vmatprep.subr.bf16.mxu0 %v9157_v18  ;;  %5756 = vmatprep.subr.bf16.mxu1 %v9160_v19  ;;  %v9209_v18 = vld [vmem:[#allocation2 + $0x1580] ss:$48 sps:$4 sm:$0xff]   ;;  %v9212_v19 = vld [vmem:[#allocation2 + $0x1588] ss:$48 sps:$4 sm:$0xff]  }
 0x31a   :  { %5584 = vmatmul.mubr.bf16.vlgmr.msra.gmra.mrb[8].mxu0 %v9632_v41  ;;  %5748 = vmatmul.mubr.bf16.vlgmr.msra.gmra.mrb[8].mxu1 %v9632_v41  ;;  %v9178_v41 = vld [vmem:[#allocation2 + $0x134c] ss:$48 sps:$4 sm:$0xff]  }
 0x31b   :  { %5593 = vmatpush1.bf16.msra.mxu0 %v9155_v21  ;;  %5757 = vmatpush1.bf16.msra.mxu1 %v9158_v22  ;;  %v9217_v21 = vld [vmem:[#allocation2 + $0x15e4] ss:$48 sps:$4 sm:$0xff]   ;;  %v9220_v22 = vld [vmem:[#allocation2 + $0x15ec] ss:$48 sps:$4 sm:$0xff]  }
 0x31c   :  { %5594 = vmatprep.subr.bf16.mxu0 %v9163_v25  ;;  %5758 = vmatprep.subr.bf16.mxu1 %v9166_v23  ;;  %v9215_v25 = vld [vmem:[#allocation2 + $0x15e0] ss:$48 sps:$4 sm:$0xff]   ;;  %v9218_v23 = vld [vmem:[#allocation2 + $0x15e8] ss:$48 sps:$4 sm:$0xff]  }
 0x31d   :  { %5624 = vmatprep.mubr.bf16.mxu0 %v9634_v46  ;;  %5788 = vmatprep.mubr.bf16.mxu1 %v9634_v46  ;;  %v9179_v46 = vld [vmem:[#allocation2 + $0x13a0] ss:$48 sps:$4 sm:$0xff]  }
 0x31f   :  { %5595 = vmatpush1.bf16.msra.mxu0 %v9161_v24  ;;  %5759 = vmatpush1.bf16.msra.mxu1 %v9164_v26  ;;  %v9223_v24 = vld [vmem:[#allocation2 + $0x1644] ss:$48 sps:$4 sm:$0xff]   ;;  %v9226_v26 = vld [vmem:[#allocation2 + $0x164c] ss:$48 sps:$4 sm:$0xff]  }
 0x320   :  { %5596 = vmatprep.subr.bf16.mxu0 %v9169_v28  ;;  %5760 = vmatprep.subr.bf16.mxu1 %v9172_v29  ;;  %v9703_v28 = vsub.s32 1, %v9576_v43  ;;  %v9706_v29 = vsub.s32 3, %v9576_v43 }
 0x323   :  { %5597 = vmatpush1.bf16.msra.mxu0 %v9167_v35  ;;  %5761 = vmatpush1.bf16.msra.mxu1 %v9170_v9  ;;  %v9221_v35 = vld [vmem:[#allocation2 + $0x1640] ss:$48 sps:$4 sm:$0xff]   ;;  %v9224_v9 = vld [vmem:[#allocation2 + $0x1648] ss:$48 sps:$4 sm:$0xff]  }
 0x324   :  { %5598 = vmatprep.subr.bf16.mxu0 %v9175_v31  ;;  %5762 = vmatprep.subr.bf16.mxu1 %v9178_v41  ;;  %v9229_v31 = vld [vmem:[#allocation2 + $0x16a4] ss:$48 sps:$4 sm:$0xff]   ;;  %v9232_v41 = vld [vmem:[#allocation2 + $0x16ac] ss:$48 sps:$4 sm:$0xff]  }
 0x327   :  { %5599 = vmatpush1.bf16.msra.mxu0 %v9173_v32  ;;  %5763 = vmatpush1.bf16.msra.mxu1 %v9176_v33  ;;  %v920_v32 = vrot.slane %v9685_v49, %v9703_v28  ;;  %v928_v33 = vrot.slane %v9685_v49, %v9706_v29 }
 0x328   :  { %5600 = vmatprep.subr.bf16.mxu0 %v9181_v36  ;;  %5764 = vmatprep.subr.bf16.mxu1 %v9184_v37  ;;  %v9227_v36 = vld [vmem:[#allocation2 + $0x16a0] ss:$48 sps:$4 sm:$0xff]   ;;  %v9230_v37 = vld [vmem:[#allocation2 + $0x16a8] ss:$48 sps:$4 sm:$0xff]  }
 0x32b   :  { %5601 = vmatpush1.bf16.msra.mxu0 %v9179_v46  ;;  %5765 = vmatpush1.bf16.msra.mxu1 %v9182_v40  ;;  %v9238_v46 = vld [vmem:[#allocation2 + $0x170c] ss:$48 sps:$4 sm:$0xff]   ;;  %v8006_v40 = vadd.f32 %v9664_v56, %v920_v32  ;;  %v9239_v56 = vld [vmem:[#allocation2 + $0x1760] ss:$48 sps:$4 sm:$0xff]  }
 0x32c   :  { %5602 = vmatprep.subr.bf16.mxu0 %v9187_v27  ;;  %5766 = vmatprep.subr.bf16.mxu1 %v9190_v42  ;;  %v8008_v27 = vadd.f32 %v9666_v57, %v928_v33  ;;  %v9233_v42 = vld [vmem:[#allocation2 + $0x1700] ss:$48 sps:$4 sm:$0xff]   ;;  %v9242_v57 = vld [vmem:[#allocation2 + $0x1768] ss:$48 sps:$4 sm:$0xff]  }
 0x32d   :  { %v9690_v51 = vpop.f32.mrb[4].mxu0  ;;  %v5462_v52 = vpop.f32.mrb[4].mxu1  ;;  %v9267_v32 = vld [vmem:[%s10080_s5 + $0x60] sm:$0xff]  }
 0x32e   :  { %v8011_v59 = vadd.f32 %v5462_v52, %v940_v44  ;;  %v9695_v61 = vpop.f32.mrb[5].mxu0  ;;  %v9697_v62 = vpop.f32.mrb[5].mxu1  ;;  %v9236_v44 = vld [vmem:[#allocation2 + $0x1708] ss:$48 sps:$4 sm:$0xff]   ;;  %v5800_v52 = vmax.f32 %v8008_v27, 0.0  ;;  %v9270_v27 = vld [vmem:[%s10080_s5 + $0xa0] sm:$0xff]  }
 0x32f   :  { %v5302_v0 = vpop.f32.mrb[6].mxu0  ;;  %v5466_v1 = vpop.f32.mrb[6].mxu1  ;;  %5603 = vmatpush1.bf16.msra.mxu0 %v9185_v45  ;;  %5767 = vmatpush1.bf16.msra.mxu1 %v9188_v47  ;;  %v9241_v45 = vld [vmem:[#allocation2 + $0x1764] ss:$48 sps:$4 sm:$0xff]   ;;  %v9244_v47 = vld [vmem:[#allocation2 + $0x176c] ss:$48 sps:$4 sm:$0xff]  }
 0x330   :  { %v5803_v4 = vmax.f32 %v8011_v59, 0.0  ;;  %v5303_v5 = vpop.f32.mrb[7].mxu0  ;;  %v5467_v6 = vpop.f32.mrb[7].mxu1  ;;  %5604 = vmatprep.subr.bf16.mxu0 %v9193_v48  ;;  %5768 = vmatprep.subr.bf16.mxu1 %v9196_v30  ;;  %v5798_v48 = vmax.f32 %v8006_v40, 0.0  ;;  %v5820_v30 = vrot.slane %v9688_v50, %v9703_v28  ;;  %v5828_v59 = vrot.slane %v9688_v50, %v9706_v29 }
 0x331   :  { %v5896_v1 = vrot.slane %v9692_v58, %v9703_v28  ;;  %v9251_v5 = vld [vmem:[%s10080_s5 + $0x40] sm:$0xff]  }
 0x332   :  { %v5879_v8 = vmul.f32 %v5840_v34, %v5803_v4  ;;  %v9247_v34 = vld [vmem:[#allocation2 + $0x17c4] ss:$48 sps:$4 sm:$0xff]   ;;  %v5874_v0 = vmul.f32 %v5820_v30, %v5798_v48  ;;  %v9245_v4 = vld [vmem:[#allocation2 + $0x17c0] ss:$48 sps:$4 sm:$0xff]   ;;  %v9273_v48 = vld [vmem:[%s10080_s5 + $0x28] sm:$0xff]  }
 0x333   :  { %5605 = vmatpush1.bf16.msra.mxu0 %v9191_v63  ;;  %5769 = vmatpush1.bf16.msra.mxu1 %v9194_v2  ;;  %v9250_v63 = vld [vmem:[#allocation2 + $0x17cc] ss:$48 sps:$4 sm:$0xff]   ;;  %v5876_v2 = vmul.f32 %v5828_v59, %v5800_v52  ;;  %v9252_v6 = vld [vmem:[%s10080_s5 + $0xc0] sm:$0xff]  }
 0x334   :  { %v9700_v16 = vadd.f32 %v5916_v60, %v5879_v8  ;;  %5606 = vmatprep.subr.bf16.mxu0 %v9199_v3  ;;  %5770 = vmatprep.subr.bf16.mxu1 %v9202_v7  ;;  %v5904_v3 = vrot.slane %v9692_v58, %v9706_v29  ;;  %v9248_v60 = vld [vmem:[#allocation2 + $0x17c8] ss:$48 sps:$4 sm:$0xff]   ;;  %v5950_v7 = vadd.f32 %v5896_v1, %v5874_v0  ;;  %v9277_v1 = vld [vmem:[%s10080_s5 + $0x30] sm:$0xff]  }
 0x336   :  { %v5952_v8 = vadd.f32 %v5904_v3, %v5876_v2 }
 0x337   :  { %5607 = vmatpush1.bf16.msra.mxu0 %v9197_v10  ;;  %5771 = vmatpush1.bf16.msra.mxu1 %v9200_v11  ;;  %v9253_v10 = vld [vmem:[%s10080_s5] sm:$0xff]  }
 0x338   :  { %5608 = vmatprep.subr.bf16.mxu0 %v9205_v12  ;;  %5772 = vmatprep.subr.bf16.mxu1 %v9208_v13  ;;  %v9254_v11 = vld [vmem:[%s10080_s5 + $0x80] sm:$0xff]   ;;  %v5962_v12 = vpack.c.bf16 %v5950_v7, %v5950_v7  ;;  %v9255_v13 = vld [vmem:[%s10080_s5 + $0x48] sm:$0xff]   ;;  %v9280_v7 = vld [vmem:[%s10080_s5 + $0xf8] sm:$0xff]  }
 0x33b   :  { %5609 = vmatpush1.bf16.msra.mxu0 %v9203_v14  ;;  %5773 = vmatpush1.bf16.msra.mxu1 %v9206_v15  ;;  %v9256_v14 = vld [vmem:[%s10080_s5 + $0xc8] sm:$0xff]   ;;  %v5964_v15 = vpack.c.bf16 %v5952_v8, %v5952_v8 }
 0x33c   :  { %5610 = vmatprep.subr.bf16.mxu0 %v9211_v17  ;;  %5774 = vmatprep.subr.bf16.mxu1 %v9214_v20  ;;  %v9257_v17 = vld [vmem:[%s10080_s5 + $0x8] sm:$0xff]  }
 0x33d   :  { %v9258_v20 = vld [vmem:[%s10080_s5 + $0x88] sm:$0xff]  }
 0x33f   :  { %5611 = vmatpush1.bf16.msra.mxu0 %v9209_v18  ;;  %5775 = vmatpush1.bf16.msra.mxu1 %v9212_v19  ;;  %v9259_v18 = vld [vmem:[%s10080_s5 + $0x50] sm:$0xff]  }
 0x340   :  { %5612 = vmatprep.subr.bf16.mxu0 %v9217_v21  ;;  %5776 = vmatprep.subr.bf16.mxu1 %v9220_v22  ;;  %v9261_v19 = vld [vmem:[%s10080_s5 + $0x10] sm:$0xff]   ;;  %v9758_v21 = vsub.s32 0, %v9576_v43 }
 0x341   :  { %v9262_v22 = vld [vmem:[%s10080_s5 + $0x90] sm:$0xff]  }
 0x342   :  { %v5816_v52 = vrot.slane %v9688_v50, %v9758_v21  ;;  %v5892_v3 = vrot.slane %v9692_v58, %v9758_v21 }
 0x343   :  { %5613 = vmatpush1.bf16.msra.mxu0 %v9215_v25  ;;  %5777 = vmatpush1.bf16.msra.mxu1 %v9218_v23  ;;  %v9263_v25 = vld [vmem:[%s10080_s5 + $0x58] sm:$0xff]   ;;  %v9767_v23 = vsub.s32 2, %v9576_v43 }
 0x344   :  { %5614 = vmatprep.subr.bf16.mxu0 %v9223_v24  ;;  %5778 = vmatprep.subr.bf16.mxu1 %v9226_v26  ;;  %v9264_v24 = vld [vmem:[%s10080_s5 + $0xd8] sm:$0xff]   ;;  %v9773_v26 = vsub.s32 5, %v9576_v43 }
 0x345   :  { %v924_v33 = vrot.slane %v9685_v49, %v9767_v23  ;;  %v5824_v59 = vrot.slane %v9688_v50, %v9767_v23 }
 0x347   :  { %5615 = vmatpush1.bf16.msra.mxu0 %v9221_v35  ;;  %5779 = vmatpush1.bf16.msra.mxu1 %v9224_v9  ;;  %v9776_v35 = vsub.s32 7, %v9576_v43  ;;  %v9265_v9 = vld [vmem:[%s10080_s5 + $0x18] sm:$0xff]  }
 0x348   :  { %5616 = vmatprep.subr.bf16.mxu0 %v9229_v31  ;;  %5780 = vmatprep.subr.bf16.mxu1 %v9232_v41  ;;  %v916_v31 = vrot.slane %v9685_v49, %v9758_v21  ;;  %v9266_v41 = vld [vmem:[%s10080_s5 + $0x98] sm:$0xff]  }
 0x349   :  { %v5844_v0 = vrot.slane %v9688_v50, %v9776_v35 }
 0x34a   :  { %v8005_v40 = vadd.f32 %v9660_v54, %v916_v31  ;;  %v9288_v31 = vld [vmem:[%s10080_s5 + $0x1c8] sm:$0xff]  }
 0x34b   :  { %5617 = vmatpush1.bf16.msra.mxu0 %v9227_v36  ;;  %5781 = vmatpush1.bf16.msra.mxu1 %v9230_v37  ;;  %v9268_v36 = vld [vmem:[%s10080_s5 + $0xe0] sm:$0xff]   ;;  %v936_v37 = vrot.slane %v9685_v49, %v9773_v26 }
 0x34c   :  { %5618 = vmatprep.subr.bf16.mxu0 %v9235_v39  ;;  %5782 = vmatprep.subr.bf16.mxu1 %v9238_v46  ;;  %v944_v39 = vrot.slane %v9685_v49, %v9776_v35  ;;  %v9269_v46 = vld [vmem:[%s10080_s5 + $0x20] sm:$0xff]   ;;  %v5797_v30 = vmax.f32 %v8005_v40, 0.0  ;;  %v9294_v40 = vld [vmem:[%s10080_s5 + $0x190] sm:$0xff]  }
 0x34e   :  { %v8012_v54 = vadd.f32 %v9697_v62, %v944_v39  ;;  %v5873_v2 = vmul.f32 %v5816_v52, %v5797_v30  ;;  %v9293_v39 = vld [vmem:[%s10080_s5 + $0x110] sm:$0xff]   ;;  %v9302_v30 = vld [vmem:[%s10080_s5 + $0x1a0] sm:$0xff]   ;;  %v9303_v52 = vld [vmem:[%s10080_s5 + $0x168] sm:$0xff]  }
 0x34f   :  { %5619 = vmatpush1.bf16.msra.mxu0 %v9233_v42  ;;  %5783 = vmatpush1.bf16.msra.mxu1 %v9236_v44  ;;  %v9271_v42 = vld [vmem:[%s10080_s5 + $0x68] sm:$0xff]   ;;  %v8007_v44 = vadd.f32 %v9662_v55, %v924_v33 }
 0x350   :  { %5620 = vmatprep.subr.bf16.mxu0 %v9241_v45  ;;  %5784 = vmatprep.subr.bf16.mxu1 %v9244_v47  ;;  %v9272_v45 = vld [vmem:[%s10080_s5 + $0xe8] sm:$0xff]   ;;  %v8010_v47 = vadd.f32 %v9695_v61, %v936_v37  ;;  %v9275_v61 = vld [vmem:[%s10080_s5 + $0x70] sm:$0xff]  }
 0x351   :  { %v9274_v55 = vld [vmem:[%s10080_s5 + $0xa8] sm:$0xff]   ;;  %v5799_v62 = vmax.f32 %v8007_v44, 0.0  ;;  %v9292_v37 = vld [vmem:[%s10080_s5 + $0x1d0] sm:$0xff]  }
 0x352   :  { %v9290_v33 = vld [vmem:[%s10080_s5 + $0x188] sm:$0xff]  }
 0x353   :  { %5621 = vmatpush1.bf16.msra.mxu0 %v9239_v56  ;;  %5785 = vmatpush1.bf16.msra.mxu1 %v9242_v57  ;;  %v9276_v56 = vld [vmem:[%s10080_s5 + $0xf0] sm:$0xff]   ;;  %v5802_v57 = vmax.f32 %v8010_v47, 0.0  ;;  %v9299_v47 = vld [vmem:[%s10080_s5 + $0x160] sm:$0xff]  }
 0x354   :  { %5622 = vmatprep.subr.bf16.mxu0 %v9247_v34  ;;  %5786 = vmatprep.subr.bf16.mxu1 %v9250_v63  ;;  %v5836_v34 = vrot.slane %v9688_v50, %v9773_v26  ;;  %v5804_v63 = vmax.f32 %v8012_v54, 0.0  ;;  %v9300_v54 = vld [vmem:[%s10080_s5 + $0x1e0] sm:$0xff]  }
 0x356   :  { %v5878_v8 = vmul.f32 %v5836_v34, %v5802_v57  ;;  %v9308_v57 = vld [vmem:[%s10080_s5 + $0x1f0] sm:$0xff]  }
 0x357   :  { %5623 = vmatpush1.bf16.msra.mxu0 %v9245_v4  ;;  %5787 = vmatpush1.bf16.msra.mxu1 %v9248_v60  ;;  %v9278_v4 = vld [vmem:[%s10080_s5 + $0xb0] sm:$0xff]   ;;  %v9279_v60 = vld [vmem:[%s10080_s5 + $0x78] sm:$0xff]  }
 0x358   :  { %7873 = vmatprep.subr.bf16.mxu0 %v9251_v5  ;;  %7895 = vmatprep.subr.bf16.mxu1 %v9252_v6  ;;  %v5875_v5 = vmul.f32 %v5824_v59, %v5799_v62  ;;  %v5900_v6 = vrot.slane %v9692_v58, %v9767_v23  ;;  %v9306_v59 = vld [vmem:[%s10080_s5 + $0x1a8] sm:$0xff]  }
 0x35a   :  { %5625 = vmatmul.mubr.bf16.vlgmr.msra.gmra.mrb[8].mxu0 %v9642_v53  ;;  %5789 = vmatmul.mubr.bf16.vlgmr.msra.gmra.mrb[8].mxu1 %v9642_v53  ;;  %v9260_v53 = vld [vmem:[%s10080_s5 + $0xd0] sm:$0xff]  }
 0x35b   :  { %7874 = vmatpush3.bf16.msra.mxu0 %v9253_v10  ;;  %6780 = vmatprep.mubr.bf16.mxu0 %v5962_v12  ;;  %v5912_v10 = vrot.slane %v9692_v58, %v9773_v26  ;;  %v9281_v12 = vld [vmem:[%s10080_s5 + $0x38] sm:$0xff]  }
 0x35c   :  { %7896 = vmatpush3.bf16.msra.mxu1 %v9254_v11  ;;  %6820 = vmatprep.mubr.bf16.mxu1 %v5964_v15  ;;  %v5880_v11 = vmul.f32 %v5844_v0, %v5804_v63  ;;  %v9282_v15 = vld [vmem:[%s10080_s5 + $0xb8] sm:$0xff]   ;;  %v9310_v0 = vld [vmem:[%s10080_s5 + $0x1b0] sm:$0xff]  }
 0x35d   :  { %7875 = vmatprep.subr.bf16.mxu0 %v9255_v13  ;;  %7897 = vmatprep.subr.bf16.mxu1 %v9256_v14  ;;  %v5920_v13 = vrot.slane %v9692_v58, %v9776_v35  ;;  %v5949_v14 = vadd.f32 %v5892_v3, %v5873_v2  ;;  %v9287_v35 = vld [vmem:[%s10080_s5 + $0x148] sm:$0xff]   ;;  %v9312_v2 = vld [vmem:[%s10080_s5 + $0x1f8] sm:$0xff]  }
 0x35f   :  { %7876 = vmatpush3.bf16.msra.mxu0 %v9257_v17  ;;  %v9283_v17 = vld [vmem:[%s10080_s5 + $0x140] sm:$0xff]  }
 0x360   :  { %7898 = vmatpush3.bf16.msra.mxu1 %v9258_v20  ;;  %7877 = vmatprep.subr.bf16.mxu0 %v9259_v18  ;;  %v5951_v20 = vadd.f32 %v5900_v6, %v5875_v5  ;;  %v9284_v18 = vld [vmem:[%s10080_s5 + $0x1c0] sm:$0xff]  }
 0x361   :  { %7899 = vmatprep.subr.bf16.mxu1 %v9260_v53  ;;  %v5954_v53 = vadd.f32 %v5912_v10, %v5878_v8  ;;  %v9316_v5 = vld [vmem:[%s10080_s5 + $0x2c0] sm:$0xff]   ;;  %v9319_v10 = vld [vmem:[%s10080_s5 + $0x248] sm:$0xff]  }
 0x362   :  { %v5963_v26 = vpack.c.bf16 %v5951_v20, %v5951_v20  ;;  %v9317_v6 = vld [vmem:[%s10080_s5 + $0x200] sm:$0xff]   ;;  %v9326_v20 = vld [vmem:[%s10080_s5 + $0x290] sm:$0xff]  }
 0x363   :  { %7878 = vmatpush3.bf16.msra.mxu0 %v9261_v19  ;;  %v9285_v19 = vld [vmem:[%s10080_s5 + $0x100] sm:$0xff]  }
 0x364   :  { %7900 = vmatpush3.bf16.msra.mxu1 %v9262_v22  ;;  %7879 = vmatprep.subr.bf16.mxu0 %v9263_v25  ;;  %v5956_v22 = vadd.f32 %v5920_v13, %v5880_v11  ;;  %v5961_v25 = vpack.c.bf16 %v5949_v14, %v5949_v14  ;;  %v9318_v8 = vld [vmem:[%s10080_s5 + $0x280] sm:$0xff]   ;;  %v5967_v11 = vpack.c.bf16 %v9700_v16, %v9700_v16  ;;  %v9321_v13 = vld [vmem:[%s10080_s5 + $0x208] sm:$0xff]   ;;  %v9323_v16 = vld [vmem:[%s10080_s5 + $0x250] sm:$0xff]  }
 0x365   :  { %7901 = vmatprep.subr.bf16.mxu1 %v9264_v24  ;;  %v9286_v24 = vld [vmem:[%s10080_s5 + $0x180] sm:$0xff]   ;;  %v9322_v14 = vld [vmem:[%s10080_s5 + $0x288] sm:$0xff]  }
 0x367   :  { %7880 = vmatpush3.bf16.msra.mxu0 %v9265_v9  ;;  %v5966_v9 = vpack.c.bf16 %v5954_v53, %v5954_v53  ;;  %v9328_v53 = vld [vmem:[%s10080_s5 + $0x2d8] sm:$0xff]  }
 0x368   :  { %7902 = vmatpush3.bf16.msra.mxu1 %v9266_v41  ;;  %7881 = vmatprep.subr.bf16.mxu0 %v9267_v32  ;;  %v5968_v41 = vpack.c.bf16 %v5956_v22, %v5956_v22  ;;  %v9289_v32 = vld [vmem:[%s10080_s5 + $0x108] sm:$0xff]   ;;  %v9330_v22 = vld [vmem:[%s10080_s5 + $0x298] sm:$0xff]  }
 0x369   :  { %7903 = vmatprep.subr.bf16.mxu1 %v9268_v36  ;;  %v9291_v36 = vld [vmem:[%s10080_s5 + $0x150] sm:$0xff]  }
 0x36b   :  { %7882 = vmatpush3.bf16.msra.mxu0 %v9269_v46  ;;  %v931_v46 = vsub.s32 4, %v9576_v43  ;;  %v9297_v43 = vld [vmem:[%s10080_s5 + $0x118] sm:$0xff]  }
 0x36c   :  { %7904 = vmatpush3.bf16.msra.mxu1 %v9270_v27  ;;  %7883 = vmatprep.subr.bf16.mxu0 %v9271_v42  ;;  %v9295_v27 = vld [vmem:[%s10080_s5 + $0x158] sm:$0xff]  }
 0x36d   :  { %7905 = vmatprep.subr.bf16.mxu1 %v9272_v45  ;;  %v9296_v42 = vld [vmem:[%s10080_s5 + $0x1d8] sm:$0xff]   ;;  %v932_v44 = vrot.slane %v9685_v49, %v931_v46  ;;  %v9301_v49 = vld [vmem:[%s10080_s5 + $0x120] sm:$0xff]   ;;  %v5832_v62 = vrot.slane %v9688_v50, %v931_v46  ;;  %v9309_v50 = vld [vmem:[%s10080_s5 + $0x130] sm:$0xff]   ;;  %v5908_v63 = vrot.slane %v9692_v58, %v931_v46 }
 0x36e   :  { %v9298_v45 = vld [vmem:[%s10080_s5 + $0x198] sm:$0xff]  }
 0x36f   :  { %7884 = vmatpush3.bf16.msra.mxu0 %v9273_v48  ;;  %v8009_v48 = vadd.f32 %v9690_v51, %v932_v44  ;;  %v9305_v51 = vld [vmem:[%s10080_s5 + $0x128] sm:$0xff]   ;;  %v9313_v58 = vld [vmem:[%s10080_s5 + $0x138] sm:$0xff]  }
 0x370   :  { %7906 = vmatpush3.bf16.msra.mxu1 %v9274_v55  ;;  %7885 = vmatprep.subr.bf16.mxu0 %v9275_v61  ;;  %v9304_v55 = vld [vmem:[%s10080_s5 + $0x1e8] sm:$0xff]   ;;  %v9343_v46 = vld [vmem:[%s10080_s5 + $0x278] sm:$0xff]  }
 0x371   :  { %7907 = vmatprep.subr.bf16.mxu1 %v9276_v56  ;;  %v5801_v61 = vmax.f32 %v8009_v48, 0.0  ;;  %v9307_v56 = vld [vmem:[%s10080_s5 + $0x170] sm:$0xff]  }
 0x373   :  { %7886 = vmatpush3.bf16.msra.mxu0 %v9277_v1  ;;  %v5877_v34 = vmul.f32 %v5832_v62, %v5801_v61  ;;  %v9311_v1 = vld [vmem:[%s10080_s5 + $0x178] sm:$0xff]  }
 0x374   :  { %7908 = vmatpush3.bf16.msra.mxu1 %v9278_v4  ;;  %7887 = vmatprep.subr.bf16.mxu0 %v9279_v60  ;;  %v9314_v4 = vld [vmem:[%s10080_s5 + $0x1b8] sm:$0xff]   ;;  %v9315_v60 = vld [vmem:[%s10080_s5 + $0x240] sm:$0xff]  }
 0x375   :  { %7909 = vmatprep.subr.bf16.mxu1 %v9280_v7  ;;  %v5953_v3 = vadd.f32 %v5908_v63, %v5877_v34 }
 0x377   :  { %7888 = vmatpush3.bf16.msra.mxu0 %v9281_v12  ;;  %v5965_v7 = vpack.c.bf16 %v5953_v3, %v5953_v3  ;;  %v9320_v12 = vld [vmem:[%s10080_s5 + $0x2c8] sm:$0xff]  }
 0x378   :  { %7910 = vmatpush3.bf16.msra.mxu1 %v9282_v15  ;;  %7917 = vmatprep.subr.bf16.mxu0 %v9283_v17  ;;  %v9324_v15 = vld [vmem:[%s10080_s5 + $0x2d0] sm:$0xff]  }
 0x379   :  { %7939 = vmatprep.subr.bf16.mxu1 %v9284_v18  ;;  %v9325_v17 = vld [vmem:[%s10080_s5 + $0x210] sm:$0xff]   ;;  %v9327_v18 = vld [vmem:[%s10080_s5 + $0x258] sm:$0xff]  }
 0x37a   :  { %6781 = vmatmul.mubr.bf16.vlgmr.msra.gmra.mrb[12].mxu0 %v5961_v25  ;;  %v9331_v25 = vld [vmem:[%s10080_s5 + $0x260] sm:$0xff]  }
 0x37b   :  { %6821 = vmatmul.mubr.bf16.vlgmr.msra.gmra.mrb[12].mxu1 %v5963_v26  ;;  %7918 = vmatpush3.bf16.msra.mxu0 %v9285_v19  ;;  %v9329_v19 = vld [vmem:[%s10080_s5 + $0x218] sm:$0xff]   ;;  %v9333_v26 = vld [vmem:[%s10080_s5 + $0x220] sm:$0xff]  }
 0x37c   :  { %6860 = vmatprep.mubr.bf16.mxu0 %v5966_v9  ;;  %7940 = vmatpush3.bf16.msra.mxu1 %v9286_v24  ;;  %v9332_v24 = vld [vmem:[%s10080_s5 + $0x2e0] sm:$0xff]   ;;  %v9335_v9 = vld [vmem:[%s10080_s5 + $0x268] sm:$0xff]  }
 0x37d   :  { %6900 = vmatprep.mubr.bf16.mxu1 %v5968_v41  ;;  %7919 = vmatprep.subr.bf16.mxu0 %v9287_v35  ;;  %v9334_v35 = vld [vmem:[%s10080_s5 + $0x2a0] sm:$0xff]   ;;  %v9337_v41 = vld [vmem:[%s10080_s5 + $0x228] sm:$0xff]  }
 0x37e   :  { %7941 = vmatprep.subr.bf16.mxu1 %v9288_v31  ;;  %v9336_v31 = vld [vmem:[%s10080_s5 + $0x2e8] sm:$0xff]  }
 0x37f   :  { %7920 = vmatpush3.bf16.msra.mxu0 %v9289_v32  ;;  %v9338_v32 = vld [vmem:[%s10080_s5 + $0x2a8] sm:$0xff]  }
 0x380   :  { %7942 = vmatpush3.bf16.msra.mxu1 %v9290_v33  ;;  %7921 = vmatprep.subr.bf16.mxu0 %v9291_v36  ;;  %v9339_v33 = vld [vmem:[%s10080_s5 + $0x270] sm:$0xff]  }
 0x381   :  { %7943 = vmatprep.subr.bf16.mxu1 %v9292_v37  ;;  %v9340_v36 = vld [vmem:[%s10080_s5 + $0x2f0] sm:$0xff]  }
 0x382   :  { %v9341_v37 = vld [vmem:[%s10080_s5 + $0x230] sm:$0xff]  }
 0x383   :  { %7922 = vmatpush3.bf16.msra.mxu0 %v9293_v39  ;;  %v9342_v39 = vld [vmem:[%s10080_s5 + $0x2b0] sm:$0xff]  }
 0x384   :  { %7944 = vmatpush3.bf16.msra.mxu1 %v9294_v40  ;;  %7923 = vmatprep.subr.bf16.mxu0 %v9295_v27  ;;  %v9344_v40 = vld [vmem:[%s10080_s5 + $0x2f8] sm:$0xff]  }
 0x385   :  { %7945 = vmatprep.subr.bf16.mxu1 %v9296_v42  ;;  %v9345_v27 = vld [vmem:[%s10080_s5 + $0x238] sm:$0xff]  }
 0x386   :  { %v9346_v42 = vld [vmem:[%s10080_s5 + $0x2b8] sm:$0xff]  }
 0x387   :  { %7924 = vmatpush3.bf16.msra.mxu0 %v9297_v43  ;;  %v910_v43 = vld [vmem:[#allocation4 + $0x8] sm:$0xf] }
 0x388   :  { %7946 = vmatpush3.bf16.msra.mxu1 %v9298_v45  ;;  %7925 = vmatprep.subr.bf16.mxu0 %v9299_v47  ;;  %v948_v44 = vrot.slane %v910_v43, %v9758_v21  ;;  %v956_v45 = vrot.slane %v910_v43, %v9767_v23  ;;  %v5810_v47 = vld [vmem:[#allocation6 + $0x8] sm:$0xf] }
 0x389   :  { %7947 = vmatprep.subr.bf16.mxu1 %v9300_v54  ;;  %v952_v54 = vrot.slane %v910_v43, %v9703_v28  ;;  %v5856_v62 = vrot.slane %v5810_v47, %v9767_v23  ;;  %v5860_v63 = vrot.slane %v5810_v47, %v9706_v29 }
 0x38b   :  { %7926 = vmatpush3.bf16.msra.mxu0 %v9301_v49  ;;  %v960_v49 = vrot.slane %v910_v43, %v9706_v29 }
 0x38c   :  { %7948 = vmatpush3.bf16.msra.mxu1 %v9302_v30  ;;  %7927 = vmatprep.subr.bf16.mxu0 %v9303_v52  ;;  %v5886_v30 = vld [vmem:[#allocation7 + $0x8] sm:$0xf] }
 0x38d   :  { %7949 = vmatprep.subr.bf16.mxu1 %v9304_v55 }
 0x38f   :  { %7928 = vmatpush3.bf16.msra.mxu0 %v9305_v51  ;;  %v5848_v51 = vrot.slane %v5810_v47, %v9758_v21 }
 0x390   :  { %7950 = vmatpush3.bf16.msra.mxu1 %v9306_v59  ;;  %7929 = vmatprep.subr.bf16.mxu0 %v9307_v56 }
 0x391   :  { %7951 = vmatprep.subr.bf16.mxu1 %v9308_v57 }
 0x393   :  { %7930 = vmatpush3.bf16.msra.mxu0 %v9309_v50  ;;  %v5852_v50 = vrot.slane %v5810_v47, %v9703_v28 }
 0x394   :  { %7952 = vmatpush3.bf16.msra.mxu1 %v9310_v0  ;;  %7931 = vmatprep.subr.bf16.mxu0 %v9311_v1 }
 0x395   :  { %7953 = vmatprep.subr.bf16.mxu1 %v9312_v2 }
 0x397   :  { %7932 = vmatpush3.bf16.msra.mxu0 %v9313_v58  ;;  %v5924_v58 = vrot.slane %v5886_v30, %v9758_v21 }
 0x398   :  { %7954 = vmatpush3.bf16.msra.mxu1 %v9314_v4  ;;  %7961 = vmatprep.subr.bf16.mxu0 %v9315_v60  ;;  %v5932_v4 = vrot.slane %v5886_v30, %v9767_v23 }
 0x399   :  { %7983 = vmatprep.subr.bf16.mxu1 %v9316_v5 }
 0x39a   :  { %6861 = vmatmul.mubr.bf16.vlgmr.msra.gmra.mrb[16].mxu0 %v5965_v7 }
 0x39b   :  { %6901 = vmatmul.mubr.bf16.vlgmr.msra.gmra.mrb[16].mxu1 %v5967_v11  ;;  %7962 = vmatpush3.bf16.msra.mxu0 %v9317_v6 }
 0x39c   :  { %7984 = vmatpush3.bf16.msra.mxu1 %v9318_v8  ;;  %7963 = vmatprep.subr.bf16.mxu0 %v9319_v10  ;;  %v5928_v8 = vrot.slane %v5886_v30, %v9703_v28  ;;  %v5936_v10 = vrot.slane %v5886_v30, %v9706_v29 }
 0x39d   :  { %7985 = vmatprep.subr.bf16.mxu1 %v9320_v12 }
 0x39f   :  { %7964 = vmatpush3.bf16.msra.mxu0 %v9321_v13 }
 0x3a0   :  { %7986 = vmatpush3.bf16.msra.mxu1 %v9322_v14  ;;  %7965 = vmatprep.subr.bf16.mxu0 %v9323_v16 }
 0x3a1   :  { %7987 = vmatprep.subr.bf16.mxu1 %v9324_v15 }
 0x3a3   :  { %7966 = vmatpush3.bf16.msra.mxu0 %v9325_v17 }
 0x3a4   :  { %7988 = vmatpush3.bf16.msra.mxu1 %v9326_v20  ;;  %7967 = vmatprep.subr.bf16.mxu0 %v9327_v18 }
 0x3a5   :  { %7989 = vmatprep.subr.bf16.mxu1 %v9328_v53 }
 0x3a7   :  { %7968 = vmatpush3.bf16.msra.mxu0 %v9329_v19 }
 0x3a8   :  { %7990 = vmatpush3.bf16.msra.mxu1 %v9330_v22  ;;  %7969 = vmatprep.subr.bf16.mxu0 %v9331_v25  ;;  %v7775_v22 = vld [vmem:[#allocation9] ss:$0 sm:$0xff] }
 0x3a9   :  { %7991 = vmatprep.subr.bf16.mxu1 %v9332_v24 }
 0x3ab   :  { %7970 = vmatpush3.bf16.msra.mxu0 %v9333_v26 }
 0x3ac   :  { %7992 = vmatpush3.bf16.msra.mxu1 %v9334_v35  ;;  %7971 = vmatprep.subr.bf16.mxu0 %v9335_v9 }
 0x3ad   :  { %7993 = vmatprep.subr.bf16.mxu1 %v9336_v31 }
 0x3af   :  { %7972 = vmatpush3.bf16.msra.mxu0 %v9337_v41 }
 0x3b0   :  { %7994 = vmatpush3.bf16.msra.mxu1 %v9338_v32  ;;  %7973 = vmatprep.subr.bf16.mxu0 %v9339_v33 }
 0x3b1   :  { %7995 = vmatprep.subr.bf16.mxu1 %v9340_v36 }
 0x3b3   :  { %7974 = vmatpush3.bf16.msra.mxu0 %v9341_v37 }
 0x3b4   :  { %7996 = vmatpush3.bf16.msra.mxu1 %v9342_v39  ;;  %7975 = vmatprep.subr.bf16.mxu0 %v9343_v46 }
 0x3b5   :  { %7997 = vmatprep.subr.bf16.mxu1 %v9344_v40 }
 0x3b7   :  { %7976 = vmatpush3.bf16.msra.mxu0 %v9345_v27 }
 0x3b8   :  { %7998 = vmatpush3.bf16.msra.mxu1 %v9346_v42 }
 0x42d   :  { %v5626_v48 = vpop.f32.mrb[8].mxu0  ;;  %v5790_v52 = vpop.f32.mrb[8].mxu1 }
 0x42e   :  { %v8013_v55 = vadd.f32 %v5626_v48, %v948_v44  ;;  %v8015_v61 = vadd.f32 %v5790_v52, %v956_v45  ;;  %v5628_v59 = vpop.f32.mrb[9].mxu0  ;;  %v5792_v56 = vpop.f32.mrb[9].mxu1 }
 0x42f   :  { %v8014_v57 = vadd.f32 %v5628_v59, %v952_v54  ;;  %v8016_v34 = vadd.f32 %v5792_v56, %v960_v49  ;;  %v5630_v0 = vpop.f32.mrb[10].mxu0  ;;  %v5794_v1 = vpop.f32.mrb[10].mxu1 }
 0x430   :  { %v5805_v2 = vmax.f32 %v8013_v55, 0.0  ;;  %v5807_v3 = vmax.f32 %v8015_v61, 0.0  ;;  %v5631_v60 = vpop.f32.mrb[11].mxu0  ;;  %v5795_v5 = vpop.f32.mrb[11].mxu1  ;;  %v6989_v1 = vand.u32 127, %v95_v38 }
 0x431   :  { %v5806_v6 = vmax.f32 %v8014_v57, 0.0  ;;  %v5808_v7 = vmax.f32 %v8016_v34, 0.0 }
 0x432   :  { %v5881_v11 = vmul.f32 %v5848_v51, %v5805_v2  ;;  %v5883_v12 = vmul.f32 %v5856_v62, %v5807_v3  ;;  %vm6990_vm0 = vcmp.eq.s32.totalorder %v6989_v1, 0 }
 0x433   :  { %v5882_v13 = vmul.f32 %v5852_v50, %v5806_v6  ;;  %v5884_v14 = vmul.f32 %v5860_v63, %v5808_v7 }
 0x434   :  { %v5957_v16 = vadd.f32 %v5924_v58, %v5881_v11  ;;  %v5959_v15 = vadd.f32 %v5932_v4, %v5883_v12 }
 0x435   :  { %v5958_v17 = vadd.f32 %v5928_v8, %v5882_v13  ;;  %v5960_v20 = vadd.f32 %v5936_v10, %v5884_v14 }
 0x436   :  { %v5969_v53 = vpack.c.bf16 %v5957_v16, %v5957_v16  ;;  %v5971_v23 = vpack.c.bf16 %v5959_v15, %v5959_v15 }
 0x437   :  { %v5970_v21 = vpack.c.bf16 %v5958_v17, %v5958_v17  ;;  %v5972_v18 = vpack.c.bf16 %v5960_v20, %v5960_v20 }
 0x439   :  { %6940 = vmatprep.mubr.bf16.mxu0 %v5970_v21  ;;  %6980 = vmatprep.mubr.bf16.mxu1 %v5972_v18 }
 0x43a   :  { %6941 = vmatmul.mubr.bf16.vlgmr.msra.gmra.mrb[20].mxu0 %v5969_v53  ;;  %6981 = vmatmul.mubr.bf16.vlgmr.msra.gmra.mrb[20].mxu1 %v5971_v23 }
 0x44d   :  { %v7889_v19 = vpop.f32.mrb[12].mxu0 }
 0x44e   :  { %v7911_v28 = vpop.f32.mrb[12].mxu1  ;;  %v7890_v29 = vpop.f32.mrb[13].mxu0 }
 0x44f   :  { %v7891_v25 = vadd.f32 %v7890_v29, %v7889_v19  ;;  %v7912_v24 = vpop.f32.mrb[13].mxu1  ;;  %v7892_v26 = vpop.f32.mrb[14].mxu0 }
 0x450   :  { %v7913_v35 = vadd.f32 %v7912_v24, %v7911_v28  ;;  %v7914_v9 = vpop.f32.mrb[14].mxu1  ;;  %v7893_v31 = vpop.f32.mrb[15].mxu0 }
 0x451   :  { %v6783_v41 = vadd.f32 %v7891_v25, %v7775_v22  ;;  %v7915_v32 = vpop.f32.mrb[15].mxu1 }
 0x453   :  { %v6823_v33 = vadd.f32 %v7913_v35, %v6783_v41 }
 0x46d   :  { %v7933_v36 = vpop.f32.mrb[16].mxu0 }
 0x46e   :  { %v7955_v37 = vpop.f32.mrb[16].mxu1  ;;  %v7934_v39 = vpop.f32.mrb[17].mxu0 }
 0x46f   :  { %v7935_v46 = vadd.f32 %v7934_v39, %v7933_v36  ;;  %v7956_v40 = vpop.f32.mrb[17].mxu1  ;;  %v7936_v27 = vpop.f32.mrb[18].mxu0 }
 0x470   :  { %v7957_v42 = vadd.f32 %v7956_v40, %v7955_v37  ;;  %v7958_v43 = vpop.f32.mrb[18].mxu1  ;;  %v7937_v44 = vpop.f32.mrb[19].mxu0 }
 0x471   :  { %v6863_v45 = vadd.f32 %v7935_v46, %v6823_v33  ;;  %v7959_v47 = vpop.f32.mrb[19].mxu1 }
 0x473   :  { %v6903_v54 = vadd.f32 %v7957_v42, %v6863_v45 }
 0x50d   :  { %v7977_v49 = vpop.f32.mrb[20].mxu0  ;;  %v7999_v48 = vpop.f32.mrb[20].mxu1 }
 0x50e   :  { %v7978_v30 = vpop.f32.mrb[21].mxu0  ;;  %v8000_v52 = vpop.f32.mrb[21].mxu1 }
 0x50f   :  { %v7979_v55 = vadd.f32 %v7978_v30, %v7977_v49  ;;  %v8001_v51 = vadd.f32 %v8000_v52, %v7999_v48  ;;  %v7980_v61 = vpop.f32.mrb[22].mxu0  ;;  %v8002_v62 = vpop.f32.mrb[22].mxu1 }
 0x510   :  { %v7981_v59 = vpop.f32.mrb[23].mxu0  ;;  %v8003_v56 = vpop.f32.mrb[23].mxu1 }
 0x511   :  { %v6943_v57 = vadd.f32 %v7979_v55, %v6903_v54 }
 0x513   :  { %v6983_v50 = vadd.f32 %v8001_v51, %v6943_v57 }
 0x515   :  { %v7872_v34 = vmul.f32 -1.442695, %v6983_v50 }
 0x517   :  { %9347 = vpow2.f32 %v7872_v34 }
 0x521   :  { %v9348_v63 = vpop.eup %9347 }
 0x522   :  { %v6994_v0 = vadd.f32 1.0, %v9348_v63 }
 0x524   :  { %9349 = vrcp.f32 %v6994_v0 }
 0x52e   :  { %v9350_v2 = vpop.eup %9349 }
 0x52f   :  { %v6997_v58 = vsel %vm6990_vm0, %v9350_v2, %v6983_v50 }
 0x530   :  { %6999 = vst.msk [vmem:[%s10082_s7] sm:$0x3] %vm6998_vm1, %v6997_v58 }
 0x531   :  { %7004 = vsyncpa [#allocation3], 1 }
 0x532   :  { %7005 = vsyncpa [#allocation5], 1 }
 0x533   :  { %7006 = vsyncpa [#allocation8], 1 }

</bundles_post_ra>
